<compile_context>
chip_gen: v5e
topology: v5e:2x2
jax: 0.10.0
libtpu: 0.0.40
codegen_flags: <defaults>
</compile_context>

<pallas_src>
import numpy as np
import jax
import jax.numpy as jnp
from jax import lax
from jax.experimental import pallas as pl
from jax.experimental.pallas import tpu as pltpu

N_FEATURE = 16
ENC_IN = N_FEATURE + 6                 # 22
DEC_IN = N_FEATURE + 6                 # 22
DEC_OUT = (N_FEATURE + 6 + 1) * 2      # 46
M_PTS = 8                              # AE(m=8, n=8) -> 2m+2n = 32 edge points / box
N_PTS = 8

VMEM_SPEC = pl.BlockSpec(memory_space=pltpu.MemorySpace.VMEM)


# ----------------------------------------------------------------------------
# Static column-selection matrices for the per-level box propagation
# state columns: [feat(16) | X_orig(6) | X_ab(6) | X_ab_r(6)]  -> 34 columns
# new_child_row = C * (parent_row @ SCALE_SEL + ONE_MASK) + (parent_row @ OFF_SEL)
# ----------------------------------------------------------------------------
def _sel_constants(nf):
    d = nf + 18
    scale_sel = np.zeros((d, d), np.float32)
    off_sel = np.zeros((d, d), np.float32)
    one_mask = np.zeros((1, d), np.float32)
    one_mask[0, :nf + 6] = 1.0                 # feature + original-X columns pass through
    for base in (nf + 6, nf + 12):             # X_ab block, X_ab_r block
        scale_sel[base + 2, base + 0] = 1.0    # new x <- child x * parent s
        scale_sel[base + 2, base + 1] = 1.0    # new y <- child y * parent s
        off_sel[base + 0, base + 0] = 1.0      #   ... + parent x
        off_sel[base + 1, base + 1] = 1.0      #   ... + parent y
        one_mask[0, base + 2] = 1.0            # s passes through
        scale_sel[base + 3, base + 3] = 1.0    # new w <- child w * parent w
        scale_sel[base + 4, base + 4] = 1.0    # new h <- child h * parent h
        one_mask[0, base + 5] = 1.0            # sin passes through
    return scale_sel, off_sel, one_mask


# ----------------------------------------------------------------------------
# Fused forward kernel builder (tree structure is static => unrolled in-kernel)
# ----------------------------------------------------------------------------
def _build_fused_kernel(level_sizes, num_nodes, m, n, nf):
    L = len(level_sizes)
    N = num_nodes
    f32 = jnp.float32
    XAB = nf + 6        # 22: col offset of X_ab inside the decode state
    XR = nf + 12        # 28: col offset of X_ab_r

    def dot(a, b):
        return jnp.dot(a, b, preferred_element_type=f32)

    def kernel(*refs):
        x_ref, f_ref = refs[0], refs[1]
        idx_refs = refs[2:2 + L]               # per level (ni, 3) int32
        idxT_refs = refs[2 + L:2 + 2 * L]      # per level (3, ni) int32
        ssel_ref, osel_ref, ones_ref = refs[2 + 2 * L:5 + 2 * L]
        (ew1r, eb1r, ew2r, eb2r, ew3r, eb3r,
         dw1r, db1r, dw2r, db2r, dw3r, db3r) = refs[5 + 2 * L:17 + 2 * L]
        o_ref = refs[17 + 2 * L]

        # ---- hoisted single reads of weights / constants --------------------
        ew1, eb1 = ew1r[...], eb1r[...]
        ew2, eb2 = ew2r[...], eb2r[...]
        ew3, eb3 = ew3r[...], eb3r[...]
        dw1, db1 = dw1r[...], db1r[...]
        dw2, db2 = dw2r[...], db2r[...]
        dw3, db3 = dw3r[...], db3r[...]
        ssel, osel, one_mask = ssel_ref[...], osel_ref[...], ones_ref[...]

        X = x_ref[...]         # (N, 6)  original positions (never mutated)
        F0 = f_ref[...]        # (N, 16) original features

        # ---- in-kernel constants (no captured arrays allowed) ---------------
        # activation column pattern of left_P/right_P: (x,y,sin)=tanh, (s,w,h)=sigmoid
        col6 = lax.broadcasted_iota(jnp.int32, (1, 6), 1)
        is_sig = jnp.logical_and(col6 >= 2, col6 <= 4)
        act_scale = jnp.where(is_sig, 0.5, 1.0)
        act_off = jnp.where(is_sig, 0.5, 0.0)

        def act_P(raw):  # one tanh pass; sigmoid(x) == 0.5*tanh(0.5*x)+0.5
            return jnp.tanh(raw * act_scale) * act_scale + act_off

        # edge-point interpolation vectors
        t_m = lax.broadcasted_iota(jnp.int32, (1, m), 1).astype(f32) * (1.0 / (m - 1))
        t_n = lax.broadcasted_iota(jnp.int32, (1, n), 1).astype(f32) * (1.0 / (n - 1))
        t_m_rev = 1.0 - t_m
        t_n_rev = 1.0 - t_n

        # ===================== ENCODE (bottom-up) ============================
        # Reference encoder always reads ORIGINAL child features, so the MLP is
        # level-invariant: evaluate W([x_v | f_v]) once for every node.
        XF0 = jnp.concatenate([X, F0], axis=1)                  # (N, 22)
        h = jnp.maximum(dot(XF0, ew1) + eb1, 0.0)
        h = jnp.maximum(dot(h, ew2) + eb2, 0.0)
        E_all = dot(h, ew3) + eb3                                # (N, 16)

        F_new = F0
        for l in range(L):
            ni = level_sizes[l]
            idx = idx_refs[l][...]                               # (ni, 3)
            idxT = idxT_refs[l][...]                             # (3, ni)
            iota_c = lax.broadcasted_iota(jnp.int32, (ni, N), 1)
            child_sum = ((iota_c == idx[:, 0:1]).astype(f32)
                         + (iota_c == idx[:, 1:2]).astype(f32))  # (ni, N)
            out = dot(child_sum, E_all)                          # (ni, 16) = W(left)+W(right)
            scat = (lax.broadcasted_iota(jnp.int32, (N, ni), 0)
                    == idxT[2:3, :]).astype(f32)                 # (N, ni) parent scatter
            pmask = jnp.sum(scat, axis=1, keepdims=True)         # (N, 1)
            F_new = F_new * (1.0 - pmask) + dot(scat, out)

        # ===================== DECODE (top-down) =============================
        # state columns: [Feature(16) | X_orig(6) | X_ab(6) | X_ab_r(6)]
        AB = jnp.concatenate([F_new, X, X, X], axis=1)           # (N, 34)
        for l in reversed(range(L)):
            ni = level_sizes[l]
            idx = idx_refs[l][...]
            idxT = idxT_refs[l][...]
            p_col = idx[:, 2:3]
            pp = jnp.concatenate([p_col, p_col], axis=0)                    # (2ni, 1)
            lr = jnp.concatenate([idx[:, 0:1], idx[:, 1:2]], axis=0)        # (2ni, 1)
            lrT = jnp.concatenate([idxT[0:1, :], idxT[1:2, :]], axis=1)     # (1, 2ni)
            iota2 = lax.broadcasted_iota(jnp.int32, (2 * ni, N), 1)
            O_P2 = (iota2 == pp).astype(f32)      # parent gather (duplicated for L/R)
            O_CH = (iota2 == lr).astype(f32)      # child gather
            T = (lax.broadcasted_iota(jnp.int32, (N, 2 * ni), 0)
                 == lrT).astype(f32)              # child scatter
            cmask = jnp.sum(T, axis=1, keepdims=True)                       # (N, 1)

            pa2 = dot(O_P2, AB)                   # (2ni, 34) parents (read pre-update)
            ch = dot(O_CH, AB)                    # (2ni, 34) children (read pre-update)

            father = pa2[:ni, :XAB]               # (ni, 22) = [feat | original X] of parents
            hh = jnp.maximum(dot(father, dw1) + db1, 0.0)
            hh = jnp.maximum(dot(hh, dw2) + db2, 0.0)
            out = dot(hh, dw3) + db3              # (ni, 46)

            feats = jnp.concatenate(
                [out[:, :nf], out[:, nf + 7:2 * nf + 7]], axis=0)           # (2ni, 16)
            rawP = jnp.concatenate(
                [out[:, nf:nf + 6], out[:, 2 * nf + 7:2 * nf + 13]], axis=0)
            P_lr = act_P(rawP)                                              # (2ni, 6)
            # (leaf logits out[:, nf+6:nf+7] / out[:, 2nf+13:] unused in loss)

            # new child rows via masked FMA (no narrow per-column concats)
            C = jnp.concatenate([feats, ch[:, nf:XR], P_lr], axis=1)        # (2ni, 34)
            scale = dot(pa2, ssel) + one_mask
            offset = dot(pa2, osel)
            new_rows = C * scale + offset
            AB = AB * (1.0 - cmask) + dot(T, new_rows)

        # ============== box edge points + Chamfer loss =======================
        # stack decoded (X_ab_r) and ground-truth (X_ab) boxes: one edge pass
        boxes = jnp.concatenate([AB[:, XR:XR + 6], AB[:, XAB:XAB + 6]], axis=0)  # (2N, 6)
        rows = 2 * N
        cx, cy = boxes[:, 0:1], boxes[:, 1:2]
        w, hgt, s = boxes[:, 3:4], boxes[:, 4:5], boxes[:, 5:6]
        lx, rx = cx - 0.5 * w, cx + 0.5 * w
        dny, upy = cy - 0.5 * hgt, cy + 0.5 * hgt
        # down (m), right (n), up (m, reversed x), left (n, reversed y)
        px = jnp.concatenate(
            [lx + w * t_m, jnp.broadcast_to(rx, (rows, n)),
             lx + w * t_m_rev, jnp.broadcast_to(lx, (rows, n))], axis=1)
        py = jnp.concatenate(
            [jnp.broadcast_to(dny, (rows, m)), dny + hgt * t_n,
             jnp.broadcast_to(upy, (rows, m)), dny + hgt * t_n_rev], axis=1)
        cos = jnp.sqrt(jnp.maximum(1.0 - s * s, 0.0))       # == cos(arcsin(s))
        pxr = (px - cx) * cos - (py - cy) * s + cx           # (2N, P)
        pyr = (px - cx) * s + (py - cy) * cos + cy

        dX = pxr[:N, :, None] - pxr[N:, None, :]             # (N, P, P) decoded vs gt
        dY = pyr[:N, :, None] - pyr[N:, None, :]
        d2 = dX * dX + dY * dY                               # squared distances
        dist0 = jnp.sqrt(jnp.min(d2, axis=1))                # (N, P) min over decoded pts
        dist1 = jnp.sqrt(jnp.min(d2, axis=2))                # (N, P) min over gt pts
        per_node = jnp.sum(dist0 + dist1, axis=1, keepdims=True)   # (N, 1)
        total = jnp.sum(per_node, axis=0, keepdims=True)           # (1, 1)
        o_ref[...] = total * (1.0 / N)                       # mean over nodes

    return kernel


# ----------------------------------------------------------------------------
# AE forward: single fused pallas_call
# ----------------------------------------------------------------------------
def ae_forward(params, X, Feature, I_list, Node_is_leaf, m=M_PTS, n=N_PTS):
    X = X[0]                 # (num_nodes, 6)
    Feature = Feature[0]     # (num_nodes, 16)
    _ = Node_is_leaf         # leaf marks are unused in this module version's loss

    levels = [jnp.asarray(item[0], jnp.int32) for item in I_list]   # (ni, 3)
    levels_T = [jnp.transpose(lv) for lv in levels]                 # (3, ni)
    level_sizes = tuple(int(lv.shape[0]) for lv in levels)
    num_nodes = int(X.shape[0])
    L = len(levels)

    scale_sel, off_sel, one_mask = _sel_constants(N_FEATURE)
    kernel = _build_fused_kernel(level_sizes, num_nodes, m, n, N_FEATURE)
    enc, dec = params["enc"], params["dec"]

    n_inputs = 17 + 2 * L
    loss_ab = pl.pallas_call(
        kernel,
        out_shape=jax.ShapeDtypeStruct((1, 1), jnp.float32),
        in_specs=[VMEM_SPEC] * n_inputs,
        out_specs=VMEM_SPEC,
    )(X, Feature, *levels, *levels_T,
      jnp.asarray(scale_sel), jnp.asarray(off_sel), jnp.asarray(one_mask),
      enc["w1"], enc["b1"], enc["w2"], enc["b2"], enc["w3"], enc["b3"],
      dec["w1"], dec["b1"], dec["w2"], dec["b2"], dec["w3"], dec["b3"])[0, 0]

    Num = L
    Loss_P = jnp.float32(0.0) / Num       # identically zero in this module version
    Loss_Leaf = jnp.float32(0.0) / Num
    Loss = loss_ab + Loss_P + Loss_Leaf
    return Loss, loss_ab, Loss_P, Loss_Leaf


# ----------------------------------------------------------------------------
# Deterministic parameter init (shapes from Encoder/Decoder __init__)
# ----------------------------------------------------------------------------
def _init_linear(key, din, dout):
    kw, kb = jax.random.split(key)
    gain = jnp.sqrt(2.0)                              # calculate_gain('relu')
    lim = gain * jnp.sqrt(6.0 / (din + dout))         # xavier_uniform_
    w = jax.random.uniform(kw, (din, dout), jnp.float32, -lim, lim)
    blim = 1.0 / jnp.sqrt(din)
    b = jax.random.uniform(kb, (1, dout), jnp.float32, -blim, blim)
    return w, b


def init_params(key):
    keys = jax.random.split(key, 6)
    enc_dims = (ENC_IN, N_FEATURE, N_FEATURE, N_FEATURE)        # (22,16,16,16)
    dec_dims = (DEC_IN, N_FEATURE, 2 * N_FEATURE, DEC_OUT)      # (22,16,32,46)
    enc, dec = {}, {}
    for i in range(3):
        w, b = _init_linear(keys[i], enc_dims[i], enc_dims[i + 1])
        enc[f"w{i + 1}"], enc[f"b{i + 1}"] = w, b
        w, b = _init_linear(keys[3 + i], dec_dims[i], dec_dims[i + 1])
        dec[f"w{i + 1}"], dec[f"b{i + 1}"] = w, b
    return {"enc": enc, "dec": dec}


# ----------------------------------------------------------------------------
# Example run
# ----------------------------------------------------------------------------
if __name__ == "__main__":
    key = jax.random.PRNGKey(0)
    kp, kx, kf = jax.random.split(key, 3)
    params = init_params(kp)

    num_nodes = 7
    # Complete binary tree: 0 <- (1,2); 1 <- (3,4); 2 <- (5,6)
    I_list = [
        jnp.array([[[3, 4, 1], [5, 6, 2]]], dtype=jnp.int32),   # deepest merges (encode first)
        jnp.array([[[1, 2, 0]]], dtype=jnp.int32),              # root merge (encode last)
    ]

    u = jax.random.uniform(kx, (1, num_nodes, 6), jnp.float32)
    X = jnp.concatenate(
        [
            u[..., 0:2] - 0.5,          # x, y in (-0.5, 0.5)
            0.5 + 0.5 * u[..., 2:3],    # scale in (0.5, 1.0)
            0.2 + 0.6 * u[..., 3:5],    # w, h in (0.2, 0.8)
            u[..., 5:6] - 0.5,          # sin(angle) in (-0.5, 0.5)
        ],
        axis=-1,
    )
    Feature = 0.1 * jax.random.normal(kf, (1, num_nodes, N_FEATURE), jnp.float32)
    Node_is_leaf = jnp.array([[[0.0], [0.0], [0.0], [1.0], [1.0], [1.0], [1.0]]], jnp.float32)

    fwd = jax.jit(ae_forward)
    loss, loss_ab, loss_p, loss_leaf = fwd(params, X, Feature, I_list, Node_is_leaf)
    jax.block_until_ready(loss)
    assert bool(jnp.isfinite(loss)), "loss is not finite"
    print("KERNEL_OK")
</pallas_src>

<mosaic_0001>
module attributes {stable_mosaic.version = 11 : i64} {
  func.func @kernel(%arg0: memref<7x6xf32, #tpu.memory_space<vmem>>, %arg1: memref<7x16xf32, #tpu.memory_space<vmem>>, %arg2: memref<2x3xi32, #tpu.memory_space<vmem>>, %arg3: memref<1x3xi32, #tpu.memory_space<vmem>>, %arg4: memref<3x2xi32, #tpu.memory_space<vmem>>, %arg5: memref<3x1xi32, #tpu.memory_space<vmem>>, %arg6: memref<34x34xf32, #tpu.memory_space<vmem>>, %arg7: memref<34x34xf32, #tpu.memory_space<vmem>>, %arg8: memref<1x34xf32, #tpu.memory_space<vmem>>, %arg9: memref<22x16xf32, #tpu.memory_space<vmem>>, %arg10: memref<1x16xf32, #tpu.memory_space<vmem>>, %arg11: memref<16x16xf32, #tpu.memory_space<vmem>>, %arg12: memref<1x16xf32, #tpu.memory_space<vmem>>, %arg13: memref<16x16xf32, #tpu.memory_space<vmem>>, %arg14: memref<1x16xf32, #tpu.memory_space<vmem>>, %arg15: memref<22x16xf32, #tpu.memory_space<vmem>>, %arg16: memref<1x16xf32, #tpu.memory_space<vmem>>, %arg17: memref<16x32xf32, #tpu.memory_space<vmem>>, %arg18: memref<1x32xf32, #tpu.memory_space<vmem>>, %arg19: memref<32x46xf32, #tpu.memory_space<vmem>>, %arg20: memref<1x46xf32, #tpu.memory_space<vmem>>, %arg21: memref<1x1xf32, #tpu.memory_space<vmem>>) attributes {dimension_semantics = [], scalar_prefetch = 0 : i64, scratch_operands = 0 : i64, tpu.core_type = #tpu.core_type<tc>} {
    %c0 = arith.constant 0 : index
    %c0_0 = arith.constant 0 : index
    %0 = vector.load %arg9[%c0, %c0_0] : memref<22x16xf32, #tpu.memory_space<vmem>>, vector<22x16xf32>
    %c0_1 = arith.constant 0 : index
    %c0_2 = arith.constant 0 : index
    %1 = vector.load %arg10[%c0_1, %c0_2] : memref<1x16xf32, #tpu.memory_space<vmem>>, vector<1x16xf32>
    %c0_3 = arith.constant 0 : index
    %c0_4 = arith.constant 0 : index
    %2 = vector.load %arg11[%c0_3, %c0_4] : memref<16x16xf32, #tpu.memory_space<vmem>>, vector<16x16xf32>
    %c0_5 = arith.constant 0 : index
    %c0_6 = arith.constant 0 : index
    %3 = vector.load %arg12[%c0_5, %c0_6] : memref<1x16xf32, #tpu.memory_space<vmem>>, vector<1x16xf32>
    %c0_7 = arith.constant 0 : index
    %c0_8 = arith.constant 0 : index
    %4 = vector.load %arg13[%c0_7, %c0_8] : memref<16x16xf32, #tpu.memory_space<vmem>>, vector<16x16xf32>
    %c0_9 = arith.constant 0 : index
    %c0_10 = arith.constant 0 : index
    %5 = vector.load %arg14[%c0_9, %c0_10] : memref<1x16xf32, #tpu.memory_space<vmem>>, vector<1x16xf32>
    %c0_11 = arith.constant 0 : index
    %c0_12 = arith.constant 0 : index
    %6 = vector.load %arg15[%c0_11, %c0_12] : memref<22x16xf32, #tpu.memory_space<vmem>>, vector<22x16xf32>
    %c0_13 = arith.constant 0 : index
    %c0_14 = arith.constant 0 : index
    %7 = vector.load %arg16[%c0_13, %c0_14] : memref<1x16xf32, #tpu.memory_space<vmem>>, vector<1x16xf32>
    %c0_15 = arith.constant 0 : index
    %c0_16 = arith.constant 0 : index
    %8 = vector.load %arg17[%c0_15, %c0_16] : memref<16x32xf32, #tpu.memory_space<vmem>>, vector<16x32xf32>
    %c0_17 = arith.constant 0 : index
    %c0_18 = arith.constant 0 : index
    %9 = vector.load %arg18[%c0_17, %c0_18] : memref<1x32xf32, #tpu.memory_space<vmem>>, vector<1x32xf32>
    %c0_19 = arith.constant 0 : index
    %c0_20 = arith.constant 0 : index
    %10 = vector.load %arg19[%c0_19, %c0_20] : memref<32x46xf32, #tpu.memory_space<vmem>>, vector<32x46xf32>
    %c0_21 = arith.constant 0 : index
    %c0_22 = arith.constant 0 : index
    %11 = vector.load %arg20[%c0_21, %c0_22] : memref<1x46xf32, #tpu.memory_space<vmem>>, vector<1x46xf32>
    %c0_23 = arith.constant 0 : index
    %c0_24 = arith.constant 0 : index
    %12 = vector.load %arg6[%c0_23, %c0_24] : memref<34x34xf32, #tpu.memory_space<vmem>>, vector<34x34xf32>
    %c0_25 = arith.constant 0 : index
    %c0_26 = arith.constant 0 : index
    %13 = vector.load %arg7[%c0_25, %c0_26] : memref<34x34xf32, #tpu.memory_space<vmem>>, vector<34x34xf32>
    %c0_27 = arith.constant 0 : index
    %c0_28 = arith.constant 0 : index
    %14 = vector.load %arg8[%c0_27, %c0_28] : memref<1x34xf32, #tpu.memory_space<vmem>>, vector<1x34xf32>
    %c0_29 = arith.constant 0 : index
    %c0_30 = arith.constant 0 : index
    %15 = vector.load %arg0[%c0_29, %c0_30] : memref<7x6xf32, #tpu.memory_space<vmem>>, vector<7x6xf32>
    %c0_31 = arith.constant 0 : index
    %c0_32 = arith.constant 0 : index
    %16 = vector.load %arg1[%c0_31, %c0_32] : memref<7x16xf32, #tpu.memory_space<vmem>>, vector<7x16xf32>
    %17 = tpu.iota {dimensions = array<i32: 1>} : vector<1x6xi32>
    %c2_i32 = arith.constant 2 : i32
    %18 = vector.broadcast %c2_i32 : i32 to vector<1x6xi32>
    %19 = arith.cmpi sge, %17, %18 : vector<1x6xi32>
    %c4_i32 = arith.constant 4 : i32
    %20 = vector.broadcast %c4_i32 : i32 to vector<1x6xi32>
    %21 = arith.cmpi sle, %17, %20 : vector<1x6xi32>
    %22 = arith.andi %19, %21 : vector<1x6xi1>
    %cst = arith.constant 5.000000e-01 : f32
    %cst_33 = arith.constant 1.000000e+00 : f32
    %23 = vector.broadcast %cst : f32 to vector<1x6xf32>
    %24 = vector.broadcast %cst_33 : f32 to vector<1x6xf32>
    %25 = arith.select %22, %23, %24 : vector<1x6xi1>, vector<1x6xf32>
    %cst_34 = arith.constant 5.000000e-01 : f32
    %cst_35 = arith.constant 0.000000e+00 : f32
    %26 = vector.broadcast %cst_34 : f32 to vector<1x6xf32>
    %27 = vector.broadcast %cst_35 : f32 to vector<1x6xf32>
    %28 = arith.select %22, %26, %27 : vector<1x6xi1>, vector<1x6xf32>
    %29 = tpu.iota {dimensions = array<i32: 1>} : vector<1x8xi32>
    %30 = arith.sitofp %29 : vector<1x8xi32> to vector<1x8xf32>
    %cst_36 = arith.constant 0.142857149 : f32
    %31 = vector.broadcast %cst_36 : f32 to vector<1x8xf32>
    %32 = arith.mulf %30, %31 : vector<1x8xf32>
    %33 = tpu.iota {dimensions = array<i32: 1>} : vector<1x8xi32>
    %34 = arith.sitofp %33 : vector<1x8xi32> to vector<1x8xf32>
    %cst_37 = arith.constant 0.142857149 : f32
    %35 = vector.broadcast %cst_37 : f32 to vector<1x8xf32>
    %36 = arith.mulf %34, %35 : vector<1x8xf32>
    %cst_38 = arith.constant 1.000000e+00 : f32
    %37 = vector.broadcast %cst_38 : f32 to vector<1x8xf32>
    %38 = arith.subf %37, %32 : vector<1x8xf32>
    %cst_39 = arith.constant 1.000000e+00 : f32
    %39 = vector.broadcast %cst_39 : f32 to vector<1x8xf32>
    %40 = arith.subf %39, %36 : vector<1x8xf32>
    %41 = tpu.concatenate %15, %16 in 1 : vector<7x6xf32>, vector<7x16xf32> -> vector<7x22xf32>
    %cst_40 = arith.constant dense<0.000000e+00> : vector<7x16xf32>
    %42 = tpu.matmul %41, %0, %cst_40 {dimension_numbers = #tpu.dot_dimension_numbers<[1], [0], [0], [1], [0, 0, 1, 1], [], []>} : vector<7x22xf32>, vector<22x16xf32>, vector<7x16xf32> -> vector<7x16xf32>
    %43 = vector.broadcast %1 : vector<1x16xf32> to vector<7x16xf32>
    %44 = arith.addf %42, %43 : vector<7x16xf32>
    %cst_41 = arith.constant 0.000000e+00 : f32
    %45 = vector.broadcast %cst_41 : f32 to vector<7x16xf32>
    %46 = arith.maximumf %44, %45 : vector<7x16xf32>
    %cst_42 = arith.constant dense<0.000000e+00> : vector<7x16xf32>
    %47 = tpu.matmul %46, %2, %cst_42 {dimension_numbers = #tpu.dot_dimension_numbers<[1], [0], [0], [1], [0, 0, 1, 1], [], []>} : vector<7x16xf32>, vector<16x16xf32>, vector<7x16xf32> -> vector<7x16xf32>
    %48 = vector.broadcast %3 : vector<1x16xf32> to vector<7x16xf32>
    %49 = arith.addf %47, %48 : vector<7x16xf32>
    %cst_43 = arith.constant 0.000000e+00 : f32
    %50 = vector.broadcast %cst_43 : f32 to vector<7x16xf32>
    %51 = arith.maximumf %49, %50 : vector<7x16xf32>
    %cst_44 = arith.constant dense<0.000000e+00> : vector<7x16xf32>
    %52 = tpu.matmul %51, %4, %cst_44 {dimension_numbers = #tpu.dot_dimension_numbers<[1], [0], [0], [1], [0, 0, 1, 1], [], []>} : vector<7x16xf32>, vector<16x16xf32>, vector<7x16xf32> -> vector<7x16xf32>
    %53 = vector.broadcast %5 : vector<1x16xf32> to vector<7x16xf32>
    %54 = arith.addf %52, %53 : vector<7x16xf32>
    %c0_45 = arith.constant 0 : index
    %c0_46 = arith.constant 0 : index
    %55 = vector.load %arg2[%c0_45, %c0_46] : memref<2x3xi32, #tpu.memory_space<vmem>>, vector<2x3xi32>
    %c0_47 = arith.constant 0 : index
    %c0_48 = arith.constant 0 : index
    %56 = vector.load %arg4[%c0_47, %c0_48] : memref<3x2xi32, #tpu.memory_space<vmem>>, vector<3x2xi32>
    %57 = tpu.iota {dimensions = array<i32: 1>} : vector<2x7xi32>
    %58 = vector.extract_strided_slice %55 {offsets = [0, 0], sizes = [2, 1], strides = [1, 1]} : vector<2x3xi32> to vector<2x1xi32>
    %59 = vector.broadcast %58 : vector<2x1xi32> to vector<2x7xi32>
    %60 = arith.cmpi eq, %57, %59 : vector<2x7xi32>
    %61 = arith.extui %60 : vector<2x7xi1> to vector<2x7xi32>
    %62 = arith.sitofp %61 : vector<2x7xi32> to vector<2x7xf32>
    %63 = vector.extract_strided_slice %55 {offsets = [0, 1], sizes = [2, 1], strides = [1, 1]} : vector<2x3xi32> to vector<2x1xi32>
    %64 = vector.broadcast %63 : vector<2x1xi32> to vector<2x7xi32>
    %65 = arith.cmpi eq, %57, %64 : vector<2x7xi32>
    %66 = arith.extui %65 : vector<2x7xi1> to vector<2x7xi32>
    %67 = arith.sitofp %66 : vector<2x7xi32> to vector<2x7xf32>
    %68 = arith.addf %62, %67 : vector<2x7xf32>
    %cst_49 = arith.constant dense<0.000000e+00> : vector<2x16xf32>
    %69 = tpu.matmul %68, %54, %cst_49 {dimension_numbers = #tpu.dot_dimension_numbers<[1], [0], [0], [1], [0, 0, 1, 1], [], []>} : vector<2x7xf32>, vector<7x16xf32>, vector<2x16xf32> -> vector<2x16xf32>
    %70 = tpu.iota {dimensions = array<i32: 0>} : vector<7x2xi32>
    %71 = vector.extract_strided_slice %56 {offsets = [2, 0], sizes = [1, 2], strides = [1, 1]} : vector<3x2xi32> to vector<1x2xi32>
    %72 = vector.broadcast %71 : vector<1x2xi32> to vector<7x2xi32>
    %73 = arith.cmpi eq, %70, %72 : vector<7x2xi32>
    %74 = arith.extui %73 : vector<7x2xi1> to vector<7x2xi32>
    %75 = arith.sitofp %74 : vector<7x2xi32> to vector<7x2xf32>
    %cst_50 = arith.constant dense<0.000000e+00> : vector<7xf32>
    %76 = vector.multi_reduction <add>, %75, %cst_50 [1] : vector<7x2xf32> to vector<7xf32>
    %77 = vector.shape_cast %76 : vector<7xf32> to vector<7x1xf32>
    %cst_51 = arith.constant 1.000000e+00 : f32
    %78 = vector.broadcast %cst_51 : f32 to vector<7x1xf32>
    %79 = arith.subf %78, %77 : vector<7x1xf32>
    %80 = vector.broadcast %79 : vector<7x1xf32> to vector<7x16xf32>
    %81 = arith.mulf %16, %80 : vector<7x16xf32>
    %cst_52 = arith.constant dense<0.000000e+00> : vector<7x16xf32>
    %82 = tpu.matmul %75, %69, %cst_52 {dimension_numbers = #tpu.dot_dimension_numbers<[1], [0], [0], [1], [0, 0, 1, 1], [], []>} : vector<7x2xf32>, vector<2x16xf32>, vector<7x16xf32> -> vector<7x16xf32>
    %83 = arith.addf %81, %82 : vector<7x16xf32>
    %c0_53 = arith.constant 0 : index
    %c0_54 = arith.constant 0 : index
    %84 = vector.load %arg3[%c0_53, %c0_54] : memref<1x3xi32, #tpu.memory_space<vmem>>, vector<1x3xi32>
    %c0_55 = arith.constant 0 : index
    %c0_56 = arith.constant 0 : index
    %85 = vector.load %arg5[%c0_55, %c0_56] : memref<3x1xi32, #tpu.memory_space<vmem>>, vector<3x1xi32>
    %86 = tpu.iota {dimensions = array<i32: 1>} : vector<1x7xi32>
    %87 = vector.extract_strided_slice %84 {offsets = [0, 0], sizes = [1, 1], strides = [1, 1]} : vector<1x3xi32> to vector<1x1xi32>
    %88 = vector.broadcast %87 : vector<1x1xi32> to vector<1x7xi32>
    %89 = arith.cmpi eq, %86, %88 : vector<1x7xi32>
    %90 = arith.extui %89 : vector<1x7xi1> to vector<1x7xi32>
    %91 = arith.sitofp %90 : vector<1x7xi32> to vector<1x7xf32>
    %92 = vector.extract_strided_slice %84 {offsets = [0, 1], sizes = [1, 1], strides = [1, 1]} : vector<1x3xi32> to vector<1x1xi32>
    %93 = vector.broadcast %92 : vector<1x1xi32> to vector<1x7xi32>
    %94 = arith.cmpi eq, %86, %93 : vector<1x7xi32>
    %95 = arith.extui %94 : vector<1x7xi1> to vector<1x7xi32>
    %96 = arith.sitofp %95 : vector<1x7xi32> to vector<1x7xf32>
    %97 = arith.addf %91, %96 : vector<1x7xf32>
    %cst_57 = arith.constant dense<0.000000e+00> : vector<1x16xf32>
    %98 = tpu.matmul %97, %54, %cst_57 {dimension_numbers = #tpu.dot_dimension_numbers<[1], [0], [0], [1], [0, 0, 1, 1], [], []>} : vector<1x7xf32>, vector<7x16xf32>, vector<1x16xf32> -> vector<1x16xf32>
    %99 = tpu.iota {dimensions = array<i32: 0>} : vector<7x1xi32>
    %100 = vector.extract_strided_slice %85 {offsets = [2, 0], sizes = [1, 1], strides = [1, 1]} : vector<3x1xi32> to vector<1x1xi32>
    %101 = vector.broadcast %100 : vector<1x1xi32> to vector<7x1xi32>
    %102 = arith.cmpi eq, %99, %101 : vector<7x1xi32>
    %103 = arith.extui %102 : vector<7x1xi1> to vector<7x1xi32>
    %104 = arith.sitofp %103 : vector<7x1xi32> to vector<7x1xf32>
    %cst_58 = arith.constant dense<0.000000e+00> : vector<7xf32>
    %105 = vector.multi_reduction <add>, %104, %cst_58 [1] : vector<7x1xf32> to vector<7xf32>
    %106 = vector.shape_cast %105 : vector<7xf32> to vector<7x1xf32>
    %cst_59 = arith.constant 1.000000e+00 : f32
    %107 = vector.broadcast %cst_59 : f32 to vector<7x1xf32>
    %108 = arith.subf %107, %106 : vector<7x1xf32>
    %109 = vector.broadcast %108 : vector<7x1xf32> to vector<7x16xf32>
    %110 = arith.mulf %83, %109 : vector<7x16xf32>
    %cst_60 = arith.constant dense<0.000000e+00> : vector<7x16xf32>
    %111 = tpu.matmul %104, %98, %cst_60 {dimension_numbers = #tpu.dot_dimension_numbers<[1], [0], [0], [1], [0, 0, 1, 1], [], []>} : vector<7x1xf32>, vector<1x16xf32>, vector<7x16xf32> -> vector<7x16xf32>
    %112 = arith.addf %110, %111 : vector<7x16xf32>
    %113 = tpu.concatenate %112, %15, %15, %15 in 1 : vector<7x16xf32>, vector<7x6xf32>, vector<7x6xf32>, vector<7x6xf32> -> vector<7x34xf32>
    %c0_61 = arith.constant 0 : index
    %c0_62 = arith.constant 0 : index
    %114 = vector.load %arg3[%c0_61, %c0_62] : memref<1x3xi32, #tpu.memory_space<vmem>>, vector<1x3xi32>
    %c0_63 = arith.constant 0 : index
    %c0_64 = arith.constant 0 : index
    %115 = vector.load %arg5[%c0_63, %c0_64] : memref<3x1xi32, #tpu.memory_space<vmem>>, vector<3x1xi32>
    %116 = vector.extract_strided_slice %114 {offsets = [0, 2], sizes = [1, 1], strides = [1, 1]} : vector<1x3xi32> to vector<1x1xi32>
    %117 = tpu.concatenate %116, %116 in 0 : vector<1x1xi32>, vector<1x1xi32> -> vector<2x1xi32>
    %118 = vector.extract_strided_slice %114 {offsets = [0, 0], sizes = [1, 1], strides = [1, 1]} : vector<1x3xi32> to vector<1x1xi32>
    %119 = vector.extract_strided_slice %114 {offsets = [0, 1], sizes = [1, 1], strides = [1, 1]} : vector<1x3xi32> to vector<1x1xi32>
    %120 = tpu.concatenate %118, %119 in 0 : vector<1x1xi32>, vector<1x1xi32> -> vector<2x1xi32>
    %121 = vector.extract_strided_slice %115 {offsets = [0, 0], sizes = [1, 1], strides = [1, 1]} : vector<3x1xi32> to vector<1x1xi32>
    %122 = vector.extract_strided_slice %115 {offsets = [1, 0], sizes = [1, 1], strides = [1, 1]} : vector<3x1xi32> to vector<1x1xi32>
    %123 = tpu.concatenate %121, %122 in 1 : vector<1x1xi32>, vector<1x1xi32> -> vector<1x2xi32>
    %124 = tpu.iota {dimensions = array<i32: 1>} : vector<2x7xi32>
    %125 = vector.broadcast %117 : vector<2x1xi32> to vector<2x7xi32>
    %126 = arith.cmpi eq, %124, %125 : vector<2x7xi32>
    %127 = arith.extui %126 : vector<2x7xi1> to vector<2x7xi32>
    %128 = arith.sitofp %127 : vector<2x7xi32> to vector<2x7xf32>
    %129 = vector.broadcast %120 : vector<2x1xi32> to vector<2x7xi32>
    %130 = arith.cmpi eq, %124, %129 : vector<2x7xi32>
    %131 = arith.extui %130 : vector<2x7xi1> to vector<2x7xi32>
    %132 = arith.sitofp %131 : vector<2x7xi32> to vector<2x7xf32>
    %133 = tpu.iota {dimensions = array<i32: 0>} : vector<7x2xi32>
    %134 = vector.broadcast %123 : vector<1x2xi32> to vector<7x2xi32>
    %135 = arith.cmpi eq, %133, %134 : vector<7x2xi32>
    %136 = arith.extui %135 : vector<7x2xi1> to vector<7x2xi32>
    %137 = arith.sitofp %136 : vector<7x2xi32> to vector<7x2xf32>
    %cst_65 = arith.constant dense<0.000000e+00> : vector<7xf32>
    %138 = vector.multi_reduction <add>, %137, %cst_65 [1] : vector<7x2xf32> to vector<7xf32>
    %139 = vector.shape_cast %138 : vector<7xf32> to vector<7x1xf32>
    %cst_66 = arith.constant dense<0.000000e+00> : vector<2x34xf32>
    %140 = tpu.matmul %128, %113, %cst_66 {dimension_numbers = #tpu.dot_dimension_numbers<[1], [0], [0], [1], [0, 0, 1, 1], [], []>} : vector<2x7xf32>, vector<7x34xf32>, vector<2x34xf32> -> vector<2x34xf32>
    %cst_67 = arith.constant dense<0.000000e+00> : vector<2x34xf32>
    %141 = tpu.matmul %132, %113, %cst_67 {dimension_numbers = #tpu.dot_dimension_numbers<[1], [0], [0], [1], [0, 0, 1, 1], [], []>} : vector<2x7xf32>, vector<7x34xf32>, vector<2x34xf32> -> vector<2x34xf32>
    %142 = vector.extract_strided_slice %140 {offsets = [0, 0], sizes = [1, 22], strides = [1, 1]} : vector<2x34xf32> to vector<1x22xf32>
    %cst_68 = arith.constant dense<0.000000e+00> : vector<1x16xf32>
    %143 = tpu.matmul %142, %6, %cst_68 {dimension_numbers = #tpu.dot_dimension_numbers<[1], [0], [0], [1], [0, 0, 1, 1], [], []>} : vector<1x22xf32>, vector<22x16xf32>, vector<1x16xf32> -> vector<1x16xf32>
    %144 = arith.addf %143, %7 : vector<1x16xf32>
    %cst_69 = arith.constant 0.000000e+00 : f32
    %145 = vector.broadcast %cst_69 : f32 to vector<1x16xf32>
    %146 = arith.maximumf %144, %145 : vector<1x16xf32>
    %cst_70 = arith.constant dense<0.000000e+00> : vector<1x32xf32>
    %147 = tpu.matmul %146, %8, %cst_70 {dimension_numbers = #tpu.dot_dimension_numbers<[1], [0], [0], [1], [0, 0, 1, 1], [], []>} : vector<1x16xf32>, vector<16x32xf32>, vector<1x32xf32> -> vector<1x32xf32>
    %148 = arith.addf %147, %9 : vector<1x32xf32>
    %cst_71 = arith.constant 0.000000e+00 : f32
    %149 = vector.broadcast %cst_71 : f32 to vector<1x32xf32>
    %150 = arith.maximumf %148, %149 : vector<1x32xf32>
    %cst_72 = arith.constant dense<0.000000e+00> : vector<1x46xf32>
    %151 = tpu.matmul %150, %10, %cst_72 {dimension_numbers = #tpu.dot_dimension_numbers<[1], [0], [0], [1], [0, 0, 1, 1], [], []>} : vector<1x32xf32>, vector<32x46xf32>, vector<1x46xf32> -> vector<1x46xf32>
    %152 = arith.addf %151, %11 : vector<1x46xf32>
    %153 = vector.extract_strided_slice %152 {offsets = [0, 0], sizes = [1, 16], strides = [1, 1]} : vector<1x46xf32> to vector<1x16xf32>
    %154 = vector.extract_strided_slice %152 {offsets = [0, 23], sizes = [1, 16], strides = [1, 1]} : vector<1x46xf32> to vector<1x16xf32>
    %155 = tpu.concatenate %153, %154 in 0 : vector<1x16xf32>, vector<1x16xf32> -> vector<2x16xf32>
    %156 = vector.extract_strided_slice %152 {offsets = [0, 16], sizes = [1, 6], strides = [1, 1]} : vector<1x46xf32> to vector<1x6xf32>
    %157 = vector.extract_strided_slice %152 {offsets = [0, 39], sizes = [1, 6], strides = [1, 1]} : vector<1x46xf32> to vector<1x6xf32>
    %158 = tpu.concatenate %156, %157 in 0 : vector<1x6xf32>, vector<1x6xf32> -> vector<2x6xf32>
    %159 = vector.broadcast %25 : vector<1x6xf32> to vector<2x6xf32>
    %160 = arith.mulf %158, %159 : vector<2x6xf32>
    %161 = math.tanh %160 : vector<2x6xf32>
    %162 = vector.broadcast %25 : vector<1x6xf32> to vector<2x6xf32>
    %163 = arith.mulf %161, %162 : vector<2x6xf32>
    %164 = vector.broadcast %28 : vector<1x6xf32> to vector<2x6xf32>
    %165 = arith.addf %163, %164 : vector<2x6xf32>
    %166 = vector.extract_strided_slice %141 {offsets = [0, 16], sizes = [2, 12], strides = [1, 1]} : vector<2x34xf32> to vector<2x12xf32>
    %167 = tpu.concatenate %155, %166, %165 in 1 : vector<2x16xf32>, vector<2x12xf32>, vector<2x6xf32> -> vector<2x34xf32>
    %cst_73 = arith.constant dense<0.000000e+00> : vector<2x34xf32>
    %168 = tpu.matmul %140, %12, %cst_73 {dimension_numbers = #tpu.dot_dimension_numbers<[1], [0], [0], [1], [0, 0, 1, 1], [], []>} : vector<2x34xf32>, vector<34x34xf32>, vector<2x34xf32> -> vector<2x34xf32>
    %169 = vector.broadcast %14 : vector<1x34xf32> to vector<2x34xf32>
    %170 = arith.addf %168, %169 : vector<2x34xf32>
    %cst_74 = arith.constant dense<0.000000e+00> : vector<2x34xf32>
    %171 = tpu.matmul %140, %13, %cst_74 {dimension_numbers = #tpu.dot_dimension_numbers<[1], [0], [0], [1], [0, 0, 1, 1], [], []>} : vector<2x34xf32>, vector<34x34xf32>, vector<2x34xf32> -> vector<2x34xf32>
    %172 = arith.mulf %167, %170 : vector<2x34xf32>
    %173 = arith.addf %172, %171 : vector<2x34xf32>
    %cst_75 = arith.constant 1.000000e+00 : f32
    %174 = vector.broadcast %cst_75 : f32 to vector<7x1xf32>
    %175 = arith.subf %174, %139 : vector<7x1xf32>
    %176 = vector.broadcast %175 : vector<7x1xf32> to vector<7x34xf32>
    %177 = arith.mulf %113, %176 : vector<7x34xf32>
    %cst_76 = arith.constant dense<0.000000e+00> : vector<7x34xf32>
    %178 = tpu.matmul %137, %173, %cst_76 {dimension_numbers = #tpu.dot_dimension_numbers<[1], [0], [0], [1], [0, 0, 1, 1], [], []>} : vector<7x2xf32>, vector<2x34xf32>, vector<7x34xf32> -> vector<7x34xf32>
    %179 = arith.addf %177, %178 : vector<7x34xf32>
    %c0_77 = arith.constant 0 : index
    %c0_78 = arith.constant 0 : index
    %180 = vector.load %arg2[%c0_77, %c0_78] : memref<2x3xi32, #tpu.memory_space<vmem>>, vector<2x3xi32>
    %c0_79 = arith.constant 0 : index
    %c0_80 = arith.constant 0 : index
    %181 = vector.load %arg4[%c0_79, %c0_80] : memref<3x2xi32, #tpu.memory_space<vmem>>, vector<3x2xi32>
    %182 = vector.extract_strided_slice %180 {offsets = [0, 2], sizes = [2, 1], strides = [1, 1]} : vector<2x3xi32> to vector<2x1xi32>
    %183 = tpu.concatenate %182, %182 in 0 : vector<2x1xi32>, vector<2x1xi32> -> vector<4x1xi32>
    %184 = vector.extract_strided_slice %180 {offsets = [0, 0], sizes = [2, 1], strides = [1, 1]} : vector<2x3xi32> to vector<2x1xi32>
    %185 = vector.extract_strided_slice %180 {offsets = [0, 1], sizes = [2, 1], strides = [1, 1]} : vector<2x3xi32> to vector<2x1xi32>
    %186 = tpu.concatenate %184, %185 in 0 : vector<2x1xi32>, vector<2x1xi32> -> vector<4x1xi32>
    %187 = vector.extract_strided_slice %181 {offsets = [0, 0], sizes = [1, 2], strides = [1, 1]} : vector<3x2xi32> to vector<1x2xi32>
    %188 = vector.extract_strided_slice %181 {offsets = [1, 0], sizes = [1, 2], strides = [1, 1]} : vector<3x2xi32> to vector<1x2xi32>
    %189 = tpu.concatenate %187, %188 in 1 : vector<1x2xi32>, vector<1x2xi32> -> vector<1x4xi32>
    %190 = tpu.iota {dimensions = array<i32: 1>} : vector<4x7xi32>
    %191 = vector.broadcast %183 : vector<4x1xi32> to vector<4x7xi32>
    %192 = arith.cmpi eq, %190, %191 : vector<4x7xi32>
    %193 = arith.extui %192 : vector<4x7xi1> to vector<4x7xi32>
    %194 = arith.sitofp %193 : vector<4x7xi32> to vector<4x7xf32>
    %195 = vector.broadcast %186 : vector<4x1xi32> to vector<4x7xi32>
    %196 = arith.cmpi eq, %190, %195 : vector<4x7xi32>
    %197 = arith.extui %196 : vector<4x7xi1> to vector<4x7xi32>
    %198 = arith.sitofp %197 : vector<4x7xi32> to vector<4x7xf32>
    %199 = tpu.iota {dimensions = array<i32: 0>} : vector<7x4xi32>
    %200 = vector.broadcast %189 : vector<1x4xi32> to vector<7x4xi32>
    %201 = arith.cmpi eq, %199, %200 : vector<7x4xi32>
    %202 = arith.extui %201 : vector<7x4xi1> to vector<7x4xi32>
    %203 = arith.sitofp %202 : vector<7x4xi32> to vector<7x4xf32>
    %cst_81 = arith.constant dense<0.000000e+00> : vector<7xf32>
    %204 = vector.multi_reduction <add>, %203, %cst_81 [1] : vector<7x4xf32> to vector<7xf32>
    %205 = vector.shape_cast %204 : vector<7xf32> to vector<7x1xf32>
    %cst_82 = arith.constant dense<0.000000e+00> : vector<4x34xf32>
    %206 = tpu.matmul %194, %179, %cst_82 {dimension_numbers = #tpu.dot_dimension_numbers<[1], [0], [0], [1], [0, 0, 1, 1], [], []>} : vector<4x7xf32>, vector<7x34xf32>, vector<4x34xf32> -> vector<4x34xf32>
    %cst_83 = arith.constant dense<0.000000e+00> : vector<4x34xf32>
    %207 = tpu.matmul %198, %179, %cst_83 {dimension_numbers = #tpu.dot_dimension_numbers<[1], [0], [0], [1], [0, 0, 1, 1], [], []>} : vector<4x7xf32>, vector<7x34xf32>, vector<4x34xf32> -> vector<4x34xf32>
    %208 = vector.extract_strided_slice %206 {offsets = [0, 0], sizes = [2, 22], strides = [1, 1]} : vector<4x34xf32> to vector<2x22xf32>
    %cst_84 = arith.constant dense<0.000000e+00> : vector<2x16xf32>
    %209 = tpu.matmul %208, %6, %cst_84 {dimension_numbers = #tpu.dot_dimension_numbers<[1], [0], [0], [1], [0, 0, 1, 1], [], []>} : vector<2x22xf32>, vector<22x16xf32>, vector<2x16xf32> -> vector<2x16xf32>
    %210 = vector.broadcast %7 : vector<1x16xf32> to vector<2x16xf32>
    %211 = arith.addf %209, %210 : vector<2x16xf32>
    %cst_85 = arith.constant 0.000000e+00 : f32
    %212 = vector.broadcast %cst_85 : f32 to vector<2x16xf32>
    %213 = arith.maximumf %211, %212 : vector<2x16xf32>
    %cst_86 = arith.constant dense<0.000000e+00> : vector<2x32xf32>
    %214 = tpu.matmul %213, %8, %cst_86 {dimension_numbers = #tpu.dot_dimension_numbers<[1], [0], [0], [1], [0, 0, 1, 1], [], []>} : vector<2x16xf32>, vector<16x32xf32>, vector<2x32xf32> -> vector<2x32xf32>
    %215 = vector.broadcast %9 : vector<1x32xf32> to vector<2x32xf32>
    %216 = arith.addf %214, %215 : vector<2x32xf32>
    %cst_87 = arith.constant 0.000000e+00 : f32
    %217 = vector.broadcast %cst_87 : f32 to vector<2x32xf32>
    %218 = arith.maximumf %216, %217 : vector<2x32xf32>
    %cst_88 = arith.constant dense<0.000000e+00> : vector<2x46xf32>
    %219 = tpu.matmul %218, %10, %cst_88 {dimension_numbers = #tpu.dot_dimension_numbers<[1], [0], [0], [1], [0, 0, 1, 1], [], []>} : vector<2x32xf32>, vector<32x46xf32>, vector<2x46xf32> -> vector<2x46xf32>
    %220 = vector.broadcast %11 : vector<1x46xf32> to vector<2x46xf32>
    %221 = arith.addf %219, %220 : vector<2x46xf32>
    %222 = vector.extract_strided_slice %221 {offsets = [0, 0], sizes = [2, 16], strides = [1, 1]} : vector<2x46xf32> to vector<2x16xf32>
    %223 = vector.extract_strided_slice %221 {offsets = [0, 23], sizes = [2, 16], strides = [1, 1]} : vector<2x46xf32> to vector<2x16xf32>
    %224 = tpu.concatenate %222, %223 in 0 : vector<2x16xf32>, vector<2x16xf32> -> vector<4x16xf32>
    %225 = vector.extract_strided_slice %221 {offsets = [0, 16], sizes = [2, 6], strides = [1, 1]} : vector<2x46xf32> to vector<2x6xf32>
    %226 = vector.extract_strided_slice %221 {offsets = [0, 39], sizes = [2, 6], strides = [1, 1]} : vector<2x46xf32> to vector<2x6xf32>
    %227 = tpu.concatenate %225, %226 in 0 : vector<2x6xf32>, vector<2x6xf32> -> vector<4x6xf32>
    %228 = vector.broadcast %25 : vector<1x6xf32> to vector<4x6xf32>
    %229 = arith.mulf %227, %228 : vector<4x6xf32>
    %230 = math.tanh %229 : vector<4x6xf32>
    %231 = vector.broadcast %25 : vector<1x6xf32> to vector<4x6xf32>
    %232 = arith.mulf %230, %231 : vector<4x6xf32>
    %233 = vector.broadcast %28 : vector<1x6xf32> to vector<4x6xf32>
    %234 = arith.addf %232, %233 : vector<4x6xf32>
    %235 = vector.extract_strided_slice %207 {offsets = [0, 16], sizes = [4, 12], strides = [1, 1]} : vector<4x34xf32> to vector<4x12xf32>
    %236 = tpu.concatenate %224, %235, %234 in 1 : vector<4x16xf32>, vector<4x12xf32>, vector<4x6xf32> -> vector<4x34xf32>
    %cst_89 = arith.constant dense<0.000000e+00> : vector<4x34xf32>
    %237 = tpu.matmul %206, %12, %cst_89 {dimension_numbers = #tpu.dot_dimension_numbers<[1], [0], [0], [1], [0, 0, 1, 1], [], []>} : vector<4x34xf32>, vector<34x34xf32>, vector<4x34xf32> -> vector<4x34xf32>
    %238 = vector.broadcast %14 : vector<1x34xf32> to vector<4x34xf32>
    %239 = arith.addf %237, %238 : vector<4x34xf32>
    %cst_90 = arith.constant dense<0.000000e+00> : vector<4x34xf32>
    %240 = tpu.matmul %206, %13, %cst_90 {dimension_numbers = #tpu.dot_dimension_numbers<[1], [0], [0], [1], [0, 0, 1, 1], [], []>} : vector<4x34xf32>, vector<34x34xf32>, vector<4x34xf32> -> vector<4x34xf32>
    %241 = arith.mulf %236, %239 : vector<4x34xf32>
    %242 = arith.addf %241, %240 : vector<4x34xf32>
    %cst_91 = arith.constant 1.000000e+00 : f32
    %243 = vector.broadcast %cst_91 : f32 to vector<7x1xf32>
    %244 = arith.subf %243, %205 : vector<7x1xf32>
    %245 = vector.broadcast %244 : vector<7x1xf32> to vector<7x34xf32>
    %246 = arith.mulf %179, %245 : vector<7x34xf32>
    %cst_92 = arith.constant dense<0.000000e+00> : vector<7x34xf32>
    %247 = tpu.matmul %203, %242, %cst_92 {dimension_numbers = #tpu.dot_dimension_numbers<[1], [0], [0], [1], [0, 0, 1, 1], [], []>} : vector<7x4xf32>, vector<4x34xf32>, vector<7x34xf32> -> vector<7x34xf32>
    %248 = arith.addf %246, %247 : vector<7x34xf32>
    %249 = vector.extract_strided_slice %248 {offsets = [0, 28], sizes = [7, 6], strides = [1, 1]} : vector<7x34xf32> to vector<7x6xf32>
    %250 = vector.extract_strided_slice %248 {offsets = [0, 22], sizes = [7, 6], strides = [1, 1]} : vector<7x34xf32> to vector<7x6xf32>
    %251 = tpu.concatenate %249, %250 in 0 : vector<7x6xf32>, vector<7x6xf32> -> vector<14x6xf32>
    %252 = vector.extract_strided_slice %251 {offsets = [0, 0], sizes = [14, 1], strides = [1, 1]} : vector<14x6xf32> to vector<14x1xf32>
    %253 = vector.extract_strided_slice %251 {offsets = [0, 1], sizes = [14, 1], strides = [1, 1]} : vector<14x6xf32> to vector<14x1xf32>
    %254 = vector.extract_strided_slice %251 {offsets = [0, 3], sizes = [14, 1], strides = [1, 1]} : vector<14x6xf32> to vector<14x1xf32>
    %255 = vector.extract_strided_slice %251 {offsets = [0, 4], sizes = [14, 1], strides = [1, 1]} : vector<14x6xf32> to vector<14x1xf32>
    %256 = vector.extract_strided_slice %251 {offsets = [0, 5], sizes = [14, 1], strides = [1, 1]} : vector<14x6xf32> to vector<14x1xf32>
    %cst_93 = arith.constant 5.000000e-01 : f32
    %257 = vector.broadcast %cst_93 : f32 to vector<14x1xf32>
    %258 = arith.mulf %257, %254 : vector<14x1xf32>
    %259 = arith.subf %252, %258 : vector<14x1xf32>
    %cst_94 = arith.constant 5.000000e-01 : f32
    %260 = vector.broadcast %cst_94 : f32 to vector<14x1xf32>
    %261 = arith.mulf %260, %254 : vector<14x1xf32>
    %262 = arith.addf %252, %261 : vector<14x1xf32>
    %cst_95 = arith.constant 5.000000e-01 : f32
    %263 = vector.broadcast %cst_95 : f32 to vector<14x1xf32>
    %264 = arith.mulf %263, %255 : vector<14x1xf32>
    %265 = arith.subf %253, %264 : vector<14x1xf32>
    %cst_96 = arith.constant 5.000000e-01 : f32
    %266 = vector.broadcast %cst_96 : f32 to vector<14x1xf32>
    %267 = arith.mulf %266, %255 : vector<14x1xf32>
    %268 = arith.addf %253, %267 : vector<14x1xf32>
    %269 = vector.broadcast %254 : vector<14x1xf32> to vector<14x8xf32>
    %270 = vector.broadcast %32 : vector<1x8xf32> to vector<14x8xf32>
    %271 = arith.mulf %269, %270 : vector<14x8xf32>
    %272 = vector.broadcast %259 : vector<14x1xf32> to vector<14x8xf32>
    %273 = arith.addf %272, %271 : vector<14x8xf32>
    %274 = vector.shape_cast %262 : vector<14x1xf32> to vector<14x1xf32>
    %275 = vector.broadcast %274 : vector<14x1xf32> to vector<14x8xf32>
    %276 = vector.broadcast %254 : vector<14x1xf32> to vector<14x8xf32>
    %277 = vector.broadcast %38 : vector<1x8xf32> to vector<14x8xf32>
    %278 = arith.mulf %276, %277 : vector<14x8xf32>
    %279 = vector.broadcast %259 : vector<14x1xf32> to vector<14x8xf32>
    %280 = arith.addf %279, %278 : vector<14x8xf32>
    %281 = vector.shape_cast %259 : vector<14x1xf32> to vector<14x1xf32>
    %282 = vector.broadcast %281 : vector<14x1xf32> to vector<14x8xf32>
    %283 = tpu.concatenate %273, %275, %280, %282 in 1 : vector<14x8xf32>, vector<14x8xf32>, vector<14x8xf32>, vector<14x8xf32> -> vector<14x32xf32>
    %284 = vector.shape_cast %265 : vector<14x1xf32> to vector<14x1xf32>
    %285 = vector.broadcast %284 : vector<14x1xf32> to vector<14x8xf32>
    %286 = vector.broadcast %255 : vector<14x1xf32> to vector<14x8xf32>
    %287 = vector.broadcast %36 : vector<1x8xf32> to vector<14x8xf32>
    %288 = arith.mulf %286, %287 : vector<14x8xf32>
    %289 = vector.broadcast %265 : vector<14x1xf32> to vector<14x8xf32>
    %290 = arith.addf %289, %288 : vector<14x8xf32>
    %291 = vector.shape_cast %268 : vector<14x1xf32> to vector<14x1xf32>
    %292 = vector.broadcast %291 : vector<14x1xf32> to vector<14x8xf32>
    %293 = vector.broadcast %255 : vector<14x1xf32> to vector<14x8xf32>
    %294 = vector.broadcast %40 : vector<1x8xf32> to vector<14x8xf32>
    %295 = arith.mulf %293, %294 : vector<14x8xf32>
    %296 = vector.broadcast %265 : vector<14x1xf32> to vector<14x8xf32>
    %297 = arith.addf %296, %295 : vector<14x8xf32>
    %298 = tpu.concatenate %285, %290, %292, %297 in 1 : vector<14x8xf32>, vector<14x8xf32>, vector<14x8xf32>, vector<14x8xf32> -> vector<14x32xf32>
    %299 = arith.mulf %256, %256 : vector<14x1xf32>
    %cst_97 = arith.constant 1.000000e+00 : f32
    %300 = vector.broadcast %cst_97 : f32 to vector<14x1xf32>
    %301 = arith.subf %300, %299 : vector<14x1xf32>
    %cst_98 = arith.constant 0.000000e+00 : f32
    %302 = vector.broadcast %cst_98 : f32 to vector<14x1xf32>
    %303 = arith.maximumf %301, %302 : vector<14x1xf32>
    %304 = math.sqrt %303 : vector<14x1xf32>
    %305 = vector.broadcast %252 : vector<14x1xf32> to vector<14x32xf32>
    %306 = arith.subf %283, %305 : vector<14x32xf32>
    %307 = vector.broadcast %304 : vector<14x1xf32> to vector<14x32xf32>
    %308 = arith.mulf %306, %307 : vector<14x32xf32>
    %309 = vector.broadcast %253 : vector<14x1xf32> to vector<14x32xf32>
    %310 = arith.subf %298, %309 : vector<14x32xf32>
    %311 = vector.broadcast %256 : vector<14x1xf32> to vector<14x32xf32>
    %312 = arith.mulf %310, %311 : vector<14x32xf32>
    %313 = arith.subf %308, %312 : vector<14x32xf32>
    %314 = vector.broadcast %252 : vector<14x1xf32> to vector<14x32xf32>
    %315 = arith.addf %313, %314 : vector<14x32xf32>
    %316 = vector.broadcast %252 : vector<14x1xf32> to vector<14x32xf32>
    %317 = arith.subf %283, %316 : vector<14x32xf32>
    %318 = vector.broadcast %256 : vector<14x1xf32> to vector<14x32xf32>
    %319 = arith.mulf %317, %318 : vector<14x32xf32>
    %320 = vector.broadcast %253 : vector<14x1xf32> to vector<14x32xf32>
    %321 = arith.subf %298, %320 : vector<14x32xf32>
    %322 = vector.broadcast %304 : vector<14x1xf32> to vector<14x32xf32>
    %323 = arith.mulf %321, %322 : vector<14x32xf32>
    %324 = arith.addf %319, %323 : vector<14x32xf32>
    %325 = vector.broadcast %253 : vector<14x1xf32> to vector<14x32xf32>
    %326 = arith.addf %324, %325 : vector<14x32xf32>
    %327 = vector.extract_strided_slice %315 {offsets = [0, 0], sizes = [7, 32], strides = [1, 1]} : vector<14x32xf32> to vector<7x32xf32>
    %328 = vector.shape_cast %327 : vector<7x32xf32> to vector<7x32x1xf32>
    %329 = vector.extract_strided_slice %315 {offsets = [7, 0], sizes = [7, 32], strides = [1, 1]} : vector<14x32xf32> to vector<7x32xf32>
    %330 = vector.shape_cast %329 : vector<7x32xf32> to vector<7x1x32xf32>
    %331 = vector.broadcast %328 : vector<7x32x1xf32> to vector<7x32x32xf32>
    %332 = vector.broadcast %330 : vector<7x1x32xf32> to vector<7x32x32xf32>
    %333 = arith.subf %331, %332 : vector<7x32x32xf32>
    %334 = vector.extract_strided_slice %326 {offsets = [0, 0], sizes = [7, 32], strides = [1, 1]} : vector<14x32xf32> to vector<7x32xf32>
    %335 = vector.shape_cast %334 : vector<7x32xf32> to vector<7x32x1xf32>
    %336 = vector.extract_strided_slice %326 {offsets = [7, 0], sizes = [7, 32], strides = [1, 1]} : vector<14x32xf32> to vector<7x32xf32>
    %337 = vector.shape_cast %336 : vector<7x32xf32> to vector<7x1x32xf32>
    %338 = vector.broadcast %335 : vector<7x32x1xf32> to vector<7x32x32xf32>
    %339 = vector.broadcast %337 : vector<7x1x32xf32> to vector<7x32x32xf32>
    %340 = arith.subf %338, %339 : vector<7x32x32xf32>
    %341 = arith.mulf %333, %333 : vector<7x32x32xf32>
    %342 = arith.mulf %340, %340 : vector<7x32x32xf32>
    %343 = arith.addf %341, %342 : vector<7x32x32xf32>
    %cst_99 = arith.constant dense<0x7F800000> : vector<7x32xf32>
    %344 = vector.multi_reduction <minimumf>, %343, %cst_99 [1] : vector<7x32x32xf32> to vector<7x32xf32>
    %345 = math.sqrt %344 : vector<7x32xf32>
    %cst_100 = arith.constant dense<0x7F800000> : vector<7x32xf32>
    %346 = vector.multi_reduction <minimumf>, %343, %cst_100 [2] : vector<7x32x32xf32> to vector<7x32xf32>
    %347 = math.sqrt %346 : vector<7x32xf32>
    %348 = arith.addf %345, %347 : vector<7x32xf32>
    %cst_101 = arith.constant dense<0.000000e+00> : vector<7xf32>
    %349 = vector.multi_reduction <add>, %348, %cst_101 [1] : vector<7x32xf32> to vector<7xf32>
    %350 = vector.shape_cast %349 : vector<7xf32> to vector<7x1xf32>
    %cst_102 = arith.constant dense<0.000000e+00> : vector<1xf32>
    %351 = vector.multi_reduction <add>, %350, %cst_102 [0] : vector<7x1xf32> to vector<1xf32>
    %352 = vector.shape_cast %351 : vector<1xf32> to vector<1x1xf32>
    %cst_103 = arith.constant 0.142857149 : f32
    %353 = vector.broadcast %cst_103 : f32 to vector<1x1xf32>
    %354 = arith.mulf %352, %353 : vector<1x1xf32>
    %c0_104 = arith.constant 0 : index
    %c0_105 = arith.constant 0 : index
    %355 = vector.load %arg21[%c0_104, %c0_105] : memref<1x1xf32, #tpu.memory_space<vmem>>, vector<1x1xf32>
    tpu.vector_store %arg21[%c0_104, %c0_105], %354 {strides = array<i32>} : memref<1x1xf32, #tpu.memory_space<vmem>>, vector<1x1xf32>,
    return
  }
}

</mosaic_0001>

<bundles_post_ra>
// kernel: ae_forward.1
= control target key start
LH: loop header
LB: loop body
LE: loop exit
PB: predicated region body
PF: predicated region fallthrough
CT: control target
= control target key end

     0   :  { %s4239_s0 = inlined_call_operand.vmem [shape: f32[7,6], index: 0, kind: input, shape index: {}]   ;;  %s4240_s1 = inlined_call_operand.vmem [shape: f32[7,16], index: 1, kind: input, shape index: {}]   ;;  %s4241_s2 = inlined_call_operand.vmem [shape: s32[2,3], index: 2, kind: input, shape index: {}]   ;;  %s4242_s3 = inlined_call_operand.vmem [shape: s32[1,3], index: 3, kind: input, shape index: {}]   ;;  %s4243_s4 = inlined_call_operand.vmem [shape: s32[3,2], index: 4, kind: input, shape index: {}]   ;;  %s4244_s5 = inlined_call_operand.vmem [shape: s32[3,1], index: 5, kind: input, shape index: {}]   ;;  %s4245_s6 = inlined_call_operand.vmem [shape: f32[34,34], index: 6, kind: input, shape index: {}]   ;;  %s4246_s7 = inlined_call_operand.hbm [shape: f32[34,34], index: 7, kind: input, shape index: {}]   ;;  %s4247_s8 = inlined_call_operand.vmem [shape: f32[1,34], index: 8, kind: input, shape index: {}]   ;;  %s4248_s9 = inlined_call_operand.vmem [shape: f32[22,16], index: 9, kind: input, shape index: {}]   ;;  %s4249_s10 = inlined_call_operand.vmem [shape: f32[1,16], index: 10, kind: input, shape index: {}]   ;;  %s4250_s11 = inlined_call_operand.vmem [shape: f32[16,16], index: 11, kind: input, shape index: {}]   ;;  %s4251_s12 = inlined_call_operand.vmem [shape: f32[1,16], index: 12, kind: input, shape index: {}]   ;;  %s4252_s13 = inlined_call_operand.vmem [shape: f32[16,16], index: 13, kind: input, shape index: {}]   ;;  %s4253_s14 = inlined_call_operand.vmem [shape: f32[1,16], index: 14, kind: input, shape index: {}]   ;;  %s4254_s15 = inlined_call_operand.vmem [shape: f32[22,16], index: 15, kind: input, shape index: {}]   ;;  %s4255_s16 = inlined_call_operand.vmem [shape: f32[1,16], index: 16, kind: input, shape index: {}]   ;;  %s4256_s17 = inlined_call_operand.hbm [shape: f32[16,32], index: 17, kind: input, shape index: {}]   ;;  %s4257_s18 = inlined_call_operand.vmem [shape: f32[1,32], index: 18, kind: input, shape index: {}]   ;;  %s4258_s19 = inlined_call_operand.hbm [shape: f32[32,46], index: 19, kind: input, shape index: {}]   ;;  %s4259_s20 = inlined_call_operand.vmem [shape: f32[1,46], index: 20, kind: input, shape index: {}]   ;;  %s4260_s21 = inlined_call_operand.hbm [shape: f32[1,1], index: 21, kind: output, shape index: {}]  }
   0x1   :  { %4262 = sst [smem:[#allocation12_spill]] %s4239_s0 }
   0x2   :  { %4263 = sst [smem:[#allocation13_spill]] %s4240_s1 }
   0x3   :  { %4264 = sst [smem:[#allocation14_spill]] %s4241_s2 }
   0x4   :  { %4265 = sst [smem:[#allocation15_spill]] %s4242_s3 }
   0x5   :  { %4266 = sst [smem:[#allocation16_spill]] %s4243_s4 }
   0x6   :  { %4267 = sst [smem:[#allocation17_spill]] %s4244_s5 }
   0x7   :  { %26 = vsyncpa [#allocation3], 0 }
   0x8   :  { %27 = vsyncpa [#allocation6], 0 }
   0x9   :  { %28 = vsyncpa [#allocation4], 0  ;;  %s78_s26 = sshll.u32 %s4256_s17, 4  ;;  %s2775_s27 = smov [#allocation5]   ;;  %s79_s26 = int_to_ptr.hbm [resolvable:$true] %s78_s26 }
   0xa   :  { %s80_s3 = sshll.u32 %s2775_s27, 4  ;;  %s47_s0 = sshll.u32 %s4246_s7, 4  ;;  %s81_s3 = int_to_ptr.vmem [resolvable:$true] %s80_s3  ;;  %s48_s0 = int_to_ptr.hbm [resolvable:$true] %s47_s0 }
   0xb   :  { %s2776_s4 = smov 128   ;;  %s2777_s30 = smov 8  }
   0xc   :  { %86 = dma.hbm_to_vmem [thread:$0]  %s79_s26, 256, %s81_s3, [#allocation6], %s2776_s4, %s2776_s4, %s2777_s30  }
   0xd   :  { %s2778_s5 = smov [#allocation2]   ;;  %s93_s24 = sshll.u32 %s4258_s19, 4  ;;  %s94_s24 = int_to_ptr.hbm [resolvable:$true] %s93_s24 }
   0xe   :  { %s49_s22 = sshll.u32 %s2778_s5, 4  ;;  %s2779_s17 = smov [#allocation7]   ;;  %s50_s22 = int_to_ptr.vmem [resolvable:$true] %s49_s22 }
   0xf   :  { %55 = dma.hbm_to_vmem [thread:$0]  %s48_s0, 640, %s50_s22, [#allocation3], %s2776_s4, %s2776_s4, %s2777_s30  }
  0x10   :  { %s95_s2 = sshll.u32 %s2779_s17, 4  ;;  %s96_s2 = int_to_ptr.vmem [resolvable:$true] %s95_s2 }
  0x11   :  { %101 = dma.hbm_to_vmem [thread:$0]  %s94_s24, 512, %s96_s2, [#allocation6], %s2776_s4, %s2776_s4, %s2777_s30  }
  0x12   :  { %2769 = dma.done.wait [#allocation3], 640  }
  0x13   :  { %2770 = vsyncadd [#allocation3], 4294966656 }
  0x14   :  { %2771 = dma.done.wait [#allocation6], 768  }
  0x15   :  { %2772 = vsyncadd [#allocation6], 4294966528  ;;  %vm174_vm0 = vcmask 1045504   ;;  %s4268_s26 = sld [smem:[#allocation13_spill]]  ;;  %v118_v1 = vld [vmem:[%s4248_s9 + $0x10] sm:$0x3f]  ;;  %v151_v18 = vlaneseq }
  0x16   :  { %v117_v2 = vld [vmem:[%s4248_s9 + $0x8] sm:$0xff]  ;;  %s2780_s29 = smov 6   ;;  %2425 = vmatpush.msk.msra.mxu0 %vm174_vm0, %v118_v1  ;;  %v116_v3 = vld [vmem:[%s4248_s9] sm:$0xff]  ;;  %s4269_s23 = sld [smem:[#allocation12_spill]]  ;;  %vm165_vm1 = vcmask 48128   ;;  %vm170_vm2 = vcmask 179200  }
  0x17   :  { %v121_v7 = vld [vmem:[%s4250_s11 + $0x8] sm:$0xff]  ;;  %v120_v8 = vld [vmem:[%s4250_s11] sm:$0xff]  ;;  %vm202_vm3 = vcmask 130048   ;;  %s4270_s28 = sld [smem:[#allocation14_spill]]  ;;  %v2781_v16 = vmov 1   ;;  %v2782_v17 = vmov 0  }
  0x18   :  { %192 = vmatpush.msra.mxu0 %v117_v2  ;;  %220 = vmatpush.msra.mxu1 %v121_v7  ;;  %v2587_v9 = vld [vmem:[%s4249_s10] ss:$0 sm:$0xff]  ;;  %v124_v13 = vld [vmem:[%s4252_s13 + $0x8] sm:$0xff]  ;;  %s4271_s4 = sld [smem:[#allocation17_spill]]  ;;  %v2983_v21 = vshrl.u32 %v151_v18, 7  ;;  %v2783_v23 = vmov 0.0  }
  0x19   :  { %247 = vmatpush.msra.mxu2 %v124_v13  ;;  %v123_v14 = vld [vmem:[%s4252_s13] sm:$0xff]  ;;  %2505 = vset.pattern.permute.xlu1 %v2781_v16  ;;  %s4272_s22 = sld [smem:[#allocation15_spill]]  ;;  %v2995_v33 = vand.u32 127, %v151_v18  ;;  %vm272_vm9 = vcmask 1046528   ;;  %vm268_vm10 = vcmask 56320   ;;  %s2784_s17 = smov 16  }
  0x1a   :  { %193 = vmatpush.msra.mxu0 %v116_v3  ;;  %221 = vmatpush.msra.mxu1 %v120_v8  ;;  %v2588_v26 = vld [vmem:[%s4251_s12] ss:$0 sm:$0xff]  ;;  %s2786_s9 = smov 28   ;;  %s4273_s25 = sld [smem:[#allocation16_spill]]  ;;  %vm302_vm12 = vcmask 14336   ;;  %vm393_vm13 = vcmask 1040384  }
  0x1b   :  { %v2927_v0 = vld [vmem:[%s4268_s26] sm:$0x7f]  ;;  %248 = vmatpush.msra.mxu2 %v123_v14  ;;  %2504 = vset.pattern.permute.xlu0 %v2782_v17  ;;  %v2787_v51 = vmov 2   ;;  %s2788_s27 = smov 127   ;;  %vm389_vm14 = vcmask 7168   ;;  %vm312_vm15 = vcmask 1041408  }
  0x1c   :  { %162 = vrot.lane.b32.xlu0 %v2927_v0, %s2780_s29  ;;  %v2944_v4 = vld [vmem:[%s4269_s23] sm:$0x7f]  ;;  %2507 = vset.pattern.permute.xlu2 %v2781_v16  ;;  %v3070_v13 = vld [vmem:[%s4245_s6 + $0x10] sm:$0xff]  ;;  %v127_v14 = vld [vmem:[%s4254_s15 + $0x8] sm:$0xff]  ;;  %s2790_s26 = smov 1   ;;  %s2791_s3 = smov 105  }
  0x1d   :  { %v2967_v15 = vld [vmem:[%s4270_s28] sm:$0x3]  ;;  %s2792_s28 = smov 2   ;;  %s2414_s1 = sshll.u32 %s4260_s21, 4  ;;  %s2415_s1 = int_to_ptr.hbm [resolvable:$true] %s2414_s1 }
  0x1e   :  { %262 = vperm.xlu1 %2505, %v2967_v15   ;;  %v2975_v19 = vld [vmem:[%s4271_s4] sm:$0x7] }
  0x1f   :  { %v2980_v20 = vld [vmem:[%s4272_s22] sm:$0x1]  ;;  %v377_v22 = vperm.slane %v2975_v19, 2 }
  0x20   :  { %347 = vperm.xlu2 %2507, %v2980_v20   ;;  %v2589_v40 = vld [vmem:[%s4253_s14] ss:$0 sm:$0xff]  ;;  %s2785_s14 = smov 22  }
  0x21   :  { %vm378_vm4 = vcmp.eq.s32.totalorder %v2983_v21, %v377_v22  ;;  %v3019_v46 = vld [vmem:[%s4273_s25] sm:$0x7] }
  0x22   :  { %v2440_v24 = vsel %vm378_vm4, 1.0, %v2783_v23  ;;  %v298_v47 = vperm.slane %v3019_v46, 2  ;;  %v2590_v49 = vld [vmem:[%s4272_s22] ss:$0 sm:$0xff] }
  0x23   :  { %v382_v25 = vsub.f32 1.0, %v2440_v24  ;;  %v433_v52 = vsel %vm393_vm13, %v2980_v20, %v2590_v49  ;;  %v126_v16 = vld [vmem:[%s4254_s15] sm:$0xff] }
  0x24   :  { %256 = vperm.xlu0 %2504, %v2967_v15   ;;  %vm299_vm11 = vcmp.eq.s32.totalorder %v2983_v21, %v298_v47  ;;  %v3092_v22 = vld [vmem:[%s4245_s6] sm:$0xff] }
  0x25   :  { %v2433_v48 = vsel %vm299_vm11, 1.0, %v2783_v23  ;;  %vm154_vm11 = vcmp.le.s32.totalorder %v2995_v33, 4 }
  0x26   :  { %2506 = vset.pattern.permute.xlu1 %v2782_v17  ;;  %v303_v50 = vsel %vm302_vm12, %v2433_v48, 0.0 }
  0x27   :  { %340 = vperm.xlu1 %2506, %v2980_v20  }
  0x28   :  { %2511 = vset.pattern.permute.xlu2 %v2782_v17 }
  0x2c   :  { %419 = vrot.lane.b32.xlu0 %v2944_v4, %s2784_s17 }
  0x2f   :  { %385 = vperm.xlu1 %2506, %v382_v25   ;;  %v146_v25 = vld [vmem:[#allocation2 + $0x18] sm:$0xff] }
  0x34   :  { %425 = vrot.lane.b32.xlu0 %v2944_v4, %s2786_s9 }
  0x37   :  { %422 = vrot.lane.b32.xlu1 %v2944_v4, %s2785_s14 }
  0x38   :  { %2508 = vset.pattern.permute.xlu1 %v2787_v51 }
  0x3c   :  { %434 = vrot.lane.b32.xlu0 %v2590_v49, %s2788_s27  ;;  %v437_v49 = vrot.slane %v2975_v19, 1 }
  0x3f   :  { %442 = vperm.xlu1 %2508, %v433_v52   ;;  %v137_v52 = vld [vmem:[%s4259_s20] sm:$0x1] }
  0x47   :  { %2509 = vset.pattern.permute.xlu1 %v2782_v17  ;;  %v3082_v17 = vld [vmem:[%s4245_s6 + $0x8] sm:$0xff] }
  0x49   :  { %304 = vadd.xlane.f32.xlu2 %v303_v50  ;;  %v691_v50 = vrot.slane %v2967_v15, 6 }
  0x7a   :  { %v348_v31 = vpop.permute.xlu2 %347 }
  0x7b   :  { %v349_v35 = vperm.slane %v348_v31, 0  ;;  %v3104_v31 = vld [vmem:[#allocation5] sm:$0xff] }
  0x7d   :  { %vm350_vm8 = vcmp.eq.s32.totalorder %v2995_v33, %v349_v35 }
  0x7e   :  { %v2437_v41 = vsel %vm350_vm8, 1.0, %v2783_v23  ;;  %vm153_vm8 = vcmp.ge.s32.totalorder %v2995_v33, 2 }
  0x8e   :  { %v163_v5 = vpop.permute.xlu0 %162 }
  0x8f   :  { %v166_v6 = vsel %vm165_vm1, %v2944_v4, %v163_v5  ;;  %vm308_vm1 = vcmask 15360  }
  0x90   :  { %2426 = vmatmul.msk.f32.vlgmr.msra.gmra.mxu0 %vm170_vm2, %v166_v6  ;;  %v263_v30 = vpop.permute.xlu1 %262 }
  0x91   :  { %vm264_vm5 = vcmp.eq.s32.totalorder %v2995_v33, %v263_v30  ;;  %v3101_v30 = vld [vmem:[#allocation5 + $0x8] sm:$0xff] }
  0x92   :  { %v2430_v37 = vsel %vm264_vm5, 1.0, %v2783_v23  ;;  %vm430_vm5 = vcmask 228352  }
  0x96   :  { %v257_v36 = vpop.permute.xlu0 %256 }
  0x97   :  { %vm258_vm6 = vcmp.eq.s32.totalorder %v2995_v33, %v257_v36 }
  0x98   :  { %v2429_v38 = vsel %vm258_vm6, 1.0, %v2783_v23 }
  0x99   :  { %v341_v32 = vpop.permute.xlu1 %340  ;;  %v267_v42 = vadd.f32 %v2430_v37, %v2429_v38  ;;  %v135_v38 = vld [vmem:[#allocation7 + $0x10] sm:$0xff] }
  0x9a   :  { %v342_v34 = vperm.slane %v341_v32, 0  ;;  %v136_v32 = vld [vmem:[#allocation7 + $0x18] sm:$0xff] }
  0x9c   :  { %vm343_vm7 = vcmp.eq.s32.totalorder %v2995_v33, %v342_v34  ;;  %v129_v34 = vld [vmem:[%s4255_s16] sm:$0x1] }
  0x9d   :  { %v2436_v39 = vsel %vm343_vm7, 1.0, %v2783_v23  ;;  %vm611_vm7 = vcmask 277504  }
  0x9e   :  { %v353_v44 = vadd.f32 %v2437_v41, %v2436_v39  ;;  %v420_v55 = vpop.permute.xlu0 %419  ;;  %v134_v39 = vld [vmem:[#allocation7 + $0x8] sm:$0xff]  ;;  %v132_v41 = vld [vmem:[%s4257_s18] sm:$0x1] }
  0xa1   :  { %v386_v59 = vpop.permute.xlu1 %385 }
  0xa6   :  { %v426_v56 = vpop.permute.xlu0 %425 }
  0xa9   :  { %v423_v61 = vpop.permute.xlu1 %422 }
  0xae   :  { %v435_v57 = vpop.permute.xlu0 %434 }
  0xaf   :  { %v436_v58 = vsel %vm393_vm13, %v2980_v20, %v435_v57 }
  0xb0   :  { %448 = vperm.xlu1 %2509, %v436_v58  }
  0xb1   :  { %v443_v4 = vpop.permute.xlu1 %442 }
  0xb2   :  { %vm444_vm4 = vcmp.eq.s32.totalorder %v2995_v33, %v443_v4 }
  0xb3   :  { %v2443_v8 = vsel %vm444_vm4, 1.0, %v2783_v23  ;;  %vm155_vm4 = vmand %vm153_vm8, %vm154_vm11  ;;  %vm1005_vm11 = vcmask 64512  }
  0xb8   :  { %2510 = vset.pattern.permute.xlu1 %v2787_v51  ;;  %v692_v51 = vsel %vm312_vm15, %v2967_v15, %v691_v50 }
  0xbc   :  { %v305_v60 = vpop.xlane.xlu2 %304 }
  0xbd   :  { %v306_v62 = vsub.f32 1.0, %v305_v60 }
  0xbf   :  { %v307_v63 = vmul.f32 %v306_v62, %v2927_v0  ;;  %v3054_v0 = vld [vmem:[%s4245_s6 + $0x20] sm:$0x3] }
 0x10d   :  { %v195_v10 = vpop.f32.mrf.mxu0 }
 0x10e   :  { %v196_v11 = vadd.f32 %v2587_v9, %v195_v10 }
 0x110   :  { %v198_v12 = vmax.f32 %v196_v11, 0.0  ;;  %v3061_v11 = vld [vmem:[%s4245_s6 + $0x18] sm:$0xff] }
 0x112   :  { %2427 = vmatmul.msk.f32.vlgmr.msra.gmra.mxu1 %vm202_vm3, %v198_v12  ;;  %v128_v12 = vld [vmem:[%s4254_s15 + $0x10] sm:$0x3f] }
 0x122   :  { %v449_v18 = vpop.permute.xlu1 %448 }
 0x123   :  { %vm450_vm6 = vcmp.eq.s32.totalorder %v2995_v33, %v449_v18 }
 0x124   :  { %v2444_v20 = vsel %vm450_vm6, 1.0, %v2783_v23  ;;  %vm716_vm6 = vcmask 30720  }
 0x18f   :  { %v223_v27 = vpop.f32.mrf.mxu1 }
 0x190   :  { %v224_v28 = vadd.f32 %v2588_v26, %v223_v27  ;;  %v145_v26 = vld [vmem:[#allocation2 + $0x10] sm:$0xff]  ;;  %v144_v27 = vld [vmem:[#allocation2 + $0x8] sm:$0xff] }
 0x192   :  { %v226_v29 = vmax.f32 %v224_v28, 0.0  ;;  %v143_v28 = vld [vmem:[#allocation2] sm:$0xff] }
 0x194   :  { %2428 = vmatmul.msk.f32.vlgmr.msra.gmra.mxu2 %vm202_vm3, %v226_v29 }
 0x217   :  { %v250_v43 = vpop.f32.mrf.mxu2 }
 0x218   :  { %v251_v45 = vadd.f32 %v2589_v40, %v250_v43  ;;  %v133_v40 = vld [vmem:[#allocation7] sm:$0xff] }
 0x21a   :  { %2431 = vmatpush.msk.msra.mxu3 %vm272_vm9, %v251_v45  ;;  %2438 = vmatpush.msk.msrb.mxu1 %vm272_vm9, %v251_v45  ;;  %v2789_v45 = vmov 1.0  }
 0x21b   :  { %2432 = vmatmul.msk.f32.vlgmr.msra.gmra.mxu3 %vm268_vm10, %v267_v42  ;;  %2439 = vmatmul.msk.f32.vlgmr.msrb.gmra.mxu1 %vm268_vm10, %v353_v44  ;;  %v156_v47 = vsel %vm155_vm4, 0.5, %v2789_v45 }
 0x21c   :  { %2450 = vmatpush.msk.msra.mxu1 %vm174_vm0, %v128_v12  ;;  %591 = vrot.lane.b32.xlu1 %v156_v47, %s2784_s17 }
 0x21e   :  { %529 = vmatpush.msra.mxu1 %v127_v14 }
 0x220   :  { %530 = vmatpush.msra.mxu1 %v126_v16 }
 0x224   :  { %438 = vrot.lane.b32.xlu1 %v437_v49, %s2790_s26 }
 0x22c   :  { %701 = vperm.xlu1 %2510, %v692_v51  }
 0x234   :  { %693 = vrot.lane.b32.xlu1 %v691_v50, %s2788_s27  ;;  %s2793_s27 = smov 12  }
 0x28e   :  { %v3130_v57 = vpop.permute.xlu1 %591 }
 0x298   :  { %v374_v53 = vpop.f32.mrf.mxu1 }
 0x299   :  { %2441 = vmatpush.msk.msrb.mxu2 %vm393_vm13, %v374_v53 }
 0x29a   :  { %2442 = vmatmul.msk.f32.vlgmr.msrb.gmra.mxu2 %vm389_vm14, %v2440_v24  ;;  %v147_v24 = vld [vmem:[#allocation2 + $0x20] sm:$0x3] }
 0x29b   :  { %2456 = vmatpush.msk.msrb.mxu1 %vm312_vm15, %v147_v24  ;;  %553 = vmatpush.msra.mxu2 %v3101_v30 }
 0x29d   :  { %652 = vmatpush.msrb.mxu1 %v146_v25  ;;  %554 = vmatpush.msra.mxu2 %v3104_v31 }
 0x29e   :  { %v293_v54 = vpop.f32.mrf.mxu3 }
 0x29f   :  { %2434 = vmatpush.msk.msrb.mxu3 %vm312_vm15, %v293_v54  ;;  %653 = vmatpush.msrb.mxu1 %v145_v26 }
 0x2a0   :  { %2435 = vmatmul.msk.f32.vlgmr.msrb.gmra.mxu3 %vm308_vm1, %v2433_v48  ;;  %v157_v48 = vsel %vm155_vm4, 0.5, %v2783_v23  ;;  %vm1010_vm4 = vcmask 195584  }
 0x2a1   :  { %654 = vmatpush.msrb.mxu1 %v144_v27  ;;  %598 = vrot.lane.b32.xlu2 %v157_v48, %s2784_s17 }
 0x2a3   :  { %655 = vmatpush.msrb.mxu1 %v143_v28 }
 0x2fb   :  { %v3134_v62 = vpop.permute.xlu2 %598 }
 0x31d   :  { %v414_v3 = vpop.f32.mrf.mxu2 }
 0x323   :  { %v333_v1 = vpop.f32.mrf.mxu3 }
 0x324   :  { %v336_v2 = vadd.f32 %v333_v1, %v307_v63 }
 0x326   :  { %v388_v5 = vmul.f32 %v386_v59, %v336_v2  ;;  %v439_v2 = vpop.permute.xlu1 %438 }
 0x328   :  { %v417_v6 = vadd.f32 %v414_v3, %v388_v5 }
 0x32a   :  { %v428_v7 = vsel %vm202_vm3, %v417_v6, %v420_v55  ;;  %v440_v6 = vsel %vm389_vm14, %v2975_v19, %v439_v2 }
 0x32b   :  { %v429_v9 = vsel %vm170_vm2, %v428_v7, %v423_v61  ;;  %v453_v7 = vperm.slane %v440_v6, 0 }
 0x32c   :  { %v3044_v10 = vsel %vm430_vm5, %v429_v9, %v426_v56  ;;  %v696_v56 = vrot.slane %v3019_v46, 1 }
 0x32d   :  { %2446 = vmatpush.msk.msrb.mxu0 %vm272_vm9, %v3044_v10  ;;  %2448 = vmatpush.msk.msra.mxu3 %vm272_vm9, %v3044_v10 }
 0x32e   :  { %2447 = vmatmul.msk.f32.vlgmr.msrb.gmra.mxu0 %vm268_vm10, %v2443_v8  ;;  %2449 = vmatmul.msk.f32.vlgmr.msra.gmra.mxu3 %vm268_vm10, %v2444_v20  ;;  %v702_v3 = vpop.permute.xlu1 %701  ;;  %v2591_v20 = vld [vmem:[%s4247_s8] ss:$0 sm:$0xff] }
 0x32f   :  { %2454 = vmatpush.msk.msrb.mxu3 %vm312_vm15, %v3054_v0  ;;  %576 = vmatpush.msra.mxu0 %v136_v32 }
 0x330   :  { %697 = vrot.lane.b32.xlu1 %v696_v56, %s2792_s28 }
 0x331   :  { %629 = vmatpush.msrb.mxu3 %v3061_v11  ;;  %577 = vmatpush.msra.mxu0 %v135_v38 }
 0x333   :  { %630 = vmatpush.msrb.mxu3 %v3070_v13  ;;  %578 = vmatpush.msra.mxu0 %v134_v39 }
 0x335   :  { %631 = vmatpush.msrb.mxu3 %v3082_v17  ;;  %579 = vmatpush.msra.mxu0 %v133_v40 }
 0x336   :  { %v694_v4 = vpop.permute.xlu1 %693 }
 0x337   :  { %632 = vmatpush.msrb.mxu3 %v3092_v22  ;;  %v695_v5 = vsel %vm312_vm15, %v2967_v15, %v694_v4 }
 0x338   :  { %707 = vperm.xlu2 %2511, %v695_v5  }
 0x339   :  { %2467 = vmatpush.msk.msra.mxu3 %vm174_vm0, %v128_v12  ;;  %vm560_vm0 = vcmask 261120  }
 0x33b   :  { %789 = vmatpush.msra.mxu3 %v127_v14 }
 0x33d   :  { %790 = vmatpush.msra.mxu3 %v126_v16 }
 0x3a2   :  { %v698_v12 = vpop.permute.xlu1 %697 }
 0x3a3   :  { %v699_v14 = vsel %vm308_vm1, %v3019_v46, %v698_v12 }
 0x3a4   :  { %v712_v16 = vperm.slane %v699_v14, 0 }
 0x3a6   :  { %vm713_vm8 = vcmp.eq.s32.totalorder %v2983_v21, %v712_v16 }
 0x3a7   :  { %v3150_v15 = vsel %vm713_vm8, 1.0, %v2783_v23 }
 0x3a8   :  { %v717_v19 = vsel %vm716_vm6, %v3150_v15, 0.0 }
 0x3a9   :  { %718 = vadd.xlane.f32.xlu2 %v717_v19 }
 0x3ab   :  { %v483_v29 = vpop.f32.mrf.mxu0 }
 0x3ac   :  { %2451 = vmatmul.msk.f32.vlgmr.msra.gmra.mxu1 %vm170_vm2, %v483_v29  ;;  %2455 = vmatmul.msk.f32.vlgmr.msrb.gmra.mxu3 %vm611_vm7, %v483_v29 }
 0x3ad   :  { %2473 = vmatpush.msk.msrb.mxu3 %vm312_vm15, %v147_v24  ;;  %841 = vmatpush.msra.mxu1 %v136_v32 }
 0x3af   :  { %899 = vmatpush.msrb.mxu3 %v146_v25  ;;  %842 = vmatpush.msra.mxu1 %v135_v38 }
 0x3b1   :  { %900 = vmatpush.msrb.mxu3 %v145_v26  ;;  %843 = vmatpush.msra.mxu1 %v134_v39  ;;  %v506_v18 = vpop.f32.mrf.mxu3 }
 0x3b3   :  { %901 = vmatpush.msrb.mxu3 %v144_v27  ;;  %844 = vmatpush.msra.mxu1 %v133_v40 }
 0x3b4   :  { %2457 = vmatmul.msk.f32.vlgmr.msrb.gmra.mxu1 %vm611_vm7, %v483_v29 }
 0x3b5   :  { %902 = vmatpush.msrb.mxu3 %v143_v28 }
 0x429   :  { %v532_v35 = vpop.f32.mrf.mxu1 }
 0x42a   :  { %v533_v36 = vadd.f32 %v532_v35, %v129_v34 }
 0x42c   :  { %v535_v37 = vmax.f32 %v533_v36, 0.0  ;;  %v708_v36 = vpop.permute.xlu2 %707 }
 0x42d   :  { %vm709_vm14 = vcmp.eq.s32.totalorder %v2995_v33, %v708_v36 }
 0x42e   :  { %2452 = vmatmul.msk.f32.vlgmr.msra.gmra.mxu2 %vm202_vm3, %v535_v37 }
 0x42f   :  { %v634_v24 = vpop.f32.mrf.mxu3 }
 0x430   :  { %v635_v25 = vadd.f32 %v2591_v20, %v634_v24  ;;  %v2798_v24 = vmov 29  }
 0x431   :  { %v657_v29 = vpop.f32.mrf.mxu1 }
 0x434   :  { %v719_v2 = vpop.xlane.xlu2 %718 }
 0x4b1   :  { %v556_v42 = vpop.f32.mrf.mxu2 }
 0x4b2   :  { %v557_v43 = vadd.f32 %v556_v42, %v132_v41  ;;  %v2461_v41 = vsel %vm709_vm14, 1.0, %v2783_v23  ;;  %v2594_v42 = vld [vmem:[%s4259_s20] ss:$0 sm:$0xff]  ;;  %s2801_s20 = smov [#allocation8]  }
 0x4b4   :  { %v559_v44 = vmax.f32 %v557_v43, 0.0 }
 0x4b6   :  { %2453 = vmatmul.msk.f32.vlgmr.msra.gmra.mxu0 %vm560_vm0, %v559_v44 }
 0x533   :  { %v581_v53 = vpop.f32.mrf.mxu0 }
 0x534   :  { %v582_v54 = vadd.f32 %v581_v53, %v137_v52 }
 0x536   :  { %v585_v55 = vrot.slane %v582_v54, 7 }
 0x538   :  { %586 = vrot.lane.b32.xlu0 %v585_v55, %s2791_s3 }
 0x5aa   :  { %v587_v58 = vpop.permute.xlu0 %586 }
 0x5ab   :  { %v589_v59 = vsel %vm393_vm13, %v582_v54, %v587_v58  ;;  %vm454_vm13 = vcmp.eq.s32.totalorder %v2983_v21, %v453_v7 }
 0x5ac   :  { %v594_v60 = vmul.f32 %v3130_v57, %v589_v59  ;;  %v2445_v8 = vsel %vm454_vm13, 1.0, %v2783_v23  ;;  %v606_v26 = vsel %vm202_vm3, %v589_v59, %v506_v18 }
 0x5ad   :  { %v457_v9 = vsel %vm302_vm12, %v2445_v8, 0.0  ;;  %vm703_vm12 = vcmp.eq.s32.totalorder %v2995_v33, %v702_v3  ;;  %v909_v3 = vsub.f32 1.0, %v719_v2 }
 0x5ae   :  { %2595 = vtanh.f32 %v594_v60  ;;  %v2460_v39 = vsel %vm703_vm12, 1.0, %v2783_v23 }
 0x5b4   :  { %v2596_v61 = vpop.eup %2595 }
 0x5b5   :  { %v596_v63 = vmul.f32 %v2596_v61, %v3130_v57 }
 0x5b7   :  { %v601_v1 = vadd.f32 %v3134_v62, %v596_v63 }
 0x5b9   :  { %603 = vrot.lane.b32.xlu0 %v601_v1, %s2793_s27  ;;  %v2796_v1 = vmov 31  }
 0x5ba   :  { %2512 = vset.pattern.permute.xlu2 %v2796_v1 }
 0x5e3   :  { %458 = vadd.xlane.f32.xlu0 %v457_v9 }
 0x62b   :  { %v604_v46 = vpop.permute.xlu0 %603 }
 0x62c   :  { %v607_v27 = vsel %vm430_vm5, %v606_v26, %v604_v46 }
 0x62d   :  { %v660_v28 = vmul.f32 %v635_v25, %v607_v27 }
 0x62f   :  { %v661_v32 = vadd.f32 %v660_v28, %v657_v29 }
 0x631   :  { %2458 = vmatpush.msk.msrb.mxu2 %vm312_vm15, %v661_v32 }
 0x632   :  { %2459 = vmatmul.msk.f32.vlgmr.msrb.gmra.mxu2 %vm308_vm1, %v2445_v8 }
 0x656   :  { %v459_v34 = vpop.xlane.xlu0 %458 }
 0x657   :  { %v662_v35 = vsub.f32 1.0, %v459_v34 }
 0x659   :  { %v663_v37 = vmul.f32 %v662_v35, %v3044_v10  ;;  %v2592_v10 = vld [vmem:[%s4255_s16] ss:$0 sm:$0xff]  ;;  %s2799_s16 = smov 125  }
 0x6b5   :  { %v687_v38 = vpop.f32.mrf.mxu2 }
 0x6b6   :  { %v690_v40 = vadd.f32 %v687_v38, %v663_v37 }
 0x6b8   :  { %2463 = vmatpush.msk.msrb.mxu0 %vm272_vm9, %v690_v40  ;;  %2465 = vmatpush.msk.msra.mxu2 %vm272_vm9, %v690_v40  ;;  %v910_v4 = vmul.f32 %v909_v3, %v690_v40 }
 0x6b9   :  { %2464 = vmatmul.msk.f32.vlgmr.msrb.gmra.mxu0 %vm268_vm10, %v2460_v39  ;;  %2466 = vmatmul.msk.f32.vlgmr.msra.gmra.mxu2 %vm268_vm10, %v2461_v41  ;;  %vm911_vm10 = vcmask 31744  }
 0x6ba   :  { %2471 = vmatpush.msk.msrb.mxu2 %vm312_vm15, %v3054_v0  ;;  %816 = vmatpush.msra.mxu0 %v3101_v30 }
 0x6bc   :  { %879 = vmatpush.msrb.mxu2 %v3061_v11  ;;  %817 = vmatpush.msra.mxu0 %v3104_v31 }
 0x6be   :  { %880 = vmatpush.msrb.mxu2 %v3070_v13  ;;  %v2593_v13 = vld [vmem:[%s4257_s18] ss:$0 sm:$0xff]  ;;  %s2800_s18 = smov 24  }
 0x6c0   :  { %881 = vmatpush.msrb.mxu2 %v3082_v17 }
 0x6c2   :  { %882 = vmatpush.msrb.mxu2 %v3092_v22 }
 0x736   :  { %v743_v23 = vpop.f32.mrf.mxu0 }
 0x737   :  { %2468 = vmatmul.msk.f32.vlgmr.msra.gmra.mxu3 %vm170_vm2, %v743_v23  ;;  %2472 = vmatmul.msk.f32.vlgmr.msrb.gmra.mxu2 %vm611_vm7, %v743_v23  ;;  %vm915_vm2 = vcmask 1043456  }
 0x73c   :  { %v766_v53 = vpop.f32.mrf.mxu2 }
 0x73f   :  { %2474 = vmatmul.msk.f32.vlgmr.msrb.gmra.mxu3 %vm611_vm7, %v743_v23 }
 0x7ba   :  { %v792_v0 = vpop.f32.mrf.mxu3  ;;  %v884_v54 = vpop.f32.mrf.mxu2 }
 0x7bb   :  { %v793_v11 = vadd.f32 %v2592_v10, %v792_v0  ;;  %v885_v55 = vadd.f32 %v2591_v20, %v884_v54  ;;  %v2797_v20 = vmov 33  }
 0x7bd   :  { %v795_v30 = vmax.f32 %v793_v11, 0.0 }
 0x7bf   :  { %2469 = vmatmul.msk.f32.vlgmr.msra.gmra.mxu0 %vm202_vm3, %v795_v30 }
 0x7c2   :  { %v904_v61 = vpop.f32.mrf.mxu3 }
 0x83c   :  { %v819_v17 = vpop.f32.mrf.mxu0 }
 0x83d   :  { %v820_v22 = vadd.f32 %v2593_v13, %v819_v17 }
 0x83f   :  { %v822_v31 = vmax.f32 %v820_v22, 0.0 }
 0x841   :  { %2470 = vmatmul.msk.f32.vlgmr.msra.gmra.mxu1 %vm560_vm0, %v822_v31 }
 0x8be   :  { %v846_v43 = vpop.f32.mrf.mxu1 }
 0x8bf   :  { %v847_v44 = vadd.f32 %v2594_v42, %v846_v43 }
 0x8c1   :  { %v850_v45 = vrot.slane %v847_v44, 6 }
 0x8c3   :  { %851 = vrot.lane.b32.xlu1 %v850_v45, %s2791_s3 }
 0x935   :  { %v852_v47 = vpop.permute.xlu1 %851 }
 0x936   :  { %v854_v48 = vsel %vm312_vm15, %v847_v44, %v852_v47 }
 0x937   :  { %v855_v49 = vmul.f32 %v854_v48, %v3130_v57  ;;  %v863_v56 = vsel %vm202_vm3, %v854_v48, %v766_v53  ;;  %v158_v53 = vcvt.s32.f32 %v2995_v33 }
 0x939   :  { %2597 = vtanh.f32 %v855_v49  ;;  %v159_v54 = vmul.f32 0.14285715, %v158_v53 }
 0x93f   :  { %v2598_v50 = vpop.eup %2597 }
 0x940   :  { %v857_v51 = vmul.f32 %v2598_v50, %v3130_v57  ;;  %v2794_v57 = vmov 28  }
 0x941   :  { %2514 = vset.pattern.permute.xlu0 %v2794_v57 }
 0x942   :  { %v858_v52 = vadd.f32 %v857_v51, %v3134_v62  ;;  %v2795_v62 = vmov 32  }
 0x943   :  { %2513 = vset.pattern.permute.xlu1 %v2795_v62 }
 0x944   :  { %860 = vrot.lane.b32.xlu1 %v858_v52, %s2793_s27 }
 0x9b6   :  { %v861_v58 = vpop.permute.xlu1 %860 }
 0x9b7   :  { %v864_v59 = vsel %vm430_vm5, %v863_v56, %v861_v58  ;;  %v160_v56 = vsub.f32 1.0, %v159_v54 }
 0x9b8   :  { %v907_v60 = vmul.f32 %v885_v55, %v864_v59 }
 0x9ba   :  { %v908_v63 = vadd.f32 %v907_v60, %v904_v61 }
 0x9bc   :  { %2475 = vmatpush.msk.msrb.mxu0 %vm915_vm2, %v908_v63 }
 0x9bd   :  { %2476 = vmatmul.msk.f32.vlgmr.msrb.gmra.mxu0 %vm911_vm10, %v3150_v15 }
 0xa3a   :  { %v936_v5 = vpop.f32.mrf.mxu0 }
 0xa3b   :  { %v939_v6 = vadd.f32 %v936_v5, %v910_v4 }
 0xa3d   :  { %v941_v7 = vrot.slane %v939_v6, 1 }
 0xa3f   :  { %942 = vrot.lane.b32.xlu1 %v941_v7, %s2780_s29 }
 0xab1   :  { %v3202_v8 = vpop.permute.xlu1 %942 }
 0xab2   :  { %1102 = vperm.xlu0 %2514, %v3202_v8   ;;  %1026 = vperm.xlu1 %2513, %v3202_v8   ;;  %v3208_v9 = vsel %vm272_vm9, %v939_v6, %v3202_v8  ;;  %v1068_v12 = vmul.f32 %v3202_v8, %v3202_v8  ;;  %v947_v23 = vmul.f32 0.5, %v3202_v8 }
 0xab3   :  { %966 = vperm.xlu2 %2512, %v3202_v8   ;;  %v1067_v14 = vmul.f32 %v3208_v9, %v3208_v9  ;;  %v946_v27 = vmul.f32 0.5, %v3208_v9 }
 0xab4   :  { %v1070_v16 = vsub.f32 1.0, %v1068_v12 }
 0xab5   :  { %v1069_v15 = vsub.f32 1.0, %v1067_v14 }
 0xab6   :  { %v1072_v19 = vmax.f32 %v1070_v16, 0.0 }
 0xab7   :  { %v1071_v18 = vmax.f32 %v1069_v15, 0.0 }
 0xab8   :  { %2599 = vrsqrt.f32 %v1072_v19  ;;  %vm1092_vm15 = vcmp.eq.f32.partialorder %v1072_v19, inf  ;;  %v1095_v10 = vand.u32 2147483648, %v1072_v19  ;;  %vm1094_vm1 = vcmp.eq.f32.partialorder %v1072_v19, 0.0 }
 0xab9   :  { %2601 = vrsqrt.f32 %v1071_v18  ;;  %vm1080_vm5 = vcmp.eq.f32.partialorder %v1071_v18, inf  ;;  %v1083_v13 = vand.u32 2147483648, %v1071_v18  ;;  %vm1082_vm7 = vcmp.eq.f32.partialorder %v1071_v18, 0.0 }
 0xaba   :  { %2521 = vset.pattern.permute.xlu0 %v2797_v20  ;;  %2516 = vset.pattern.permute.xlu1 %v2797_v20 }
 0xabb   :  { %2515 = vset.pattern.permute.xlu2 %v2798_v24  ;;  %1130 = vperm.xlu0 %2521, %v3208_v9  }
 0xabc   :  { %1134 = vperm.xlu1 %2516, %v3202_v8   ;;  %1124 = vperm.xlu2 %2515, %v3202_v8  }
 0xabe   :  { %v2600_v25 = vpop.eup %2599 }
 0xabf   :  { %v2602_v26 = vpop.eup %2601  ;;  %v1086_v46 = vmul.f32 %v2600_v25, %v1072_v19 }
 0xac0   :  { %v1074_v29 = vmul.f32 %v2602_v26, %v1071_v18 }
 0xac1   :  { %v1087_v28 = vmul.f32 %v2600_v25, %v1086_v46  ;;  %v3262_v46 = vadd.s32 24, %v2983_v21 }
 0xac2   :  { %v1075_v34 = vmul.f32 %v2602_v26, %v1074_v29 }
 0xac3   :  { %950 = vrot.lane.b32.xlu0 %v946_v27, %s2799_s16  ;;  %v1088_v32 = vmul.f32 0.5, %v1087_v28  ;;  %v3265_v27 = vadd.s32 8, %v2983_v21 }
 0xac4   :  { %2517 = vset.pattern.permute.xlu1 %v2796_v1  ;;  %2518 = vset.pattern.permute.xlu2 %v2795_v62  ;;  %v1076_v36 = vmul.f32 0.5, %v1075_v34 }
 0xac5   :  { %962 = vperm.xlu1 %2517, %v3208_v9   ;;  %1022 = vperm.xlu2 %2518, %v3208_v9   ;;  %v1089_v35 = vsub.f32 1.5, %v1088_v32 }
 0xac6   :  { %2525 = vset.pattern.permute.xlu0 %v2794_v57  ;;  %v1077_v38 = vsub.f32 1.5, %v1076_v36 }
 0xac7   :  { %v1090_v37 = vmul.f32 %v2600_v25, %v1089_v35 }
 0xac8   :  { %v1078_v40 = vmul.f32 %v2602_v26, %v1077_v38 }
 0xac9   :  { %v1091_v39 = vmul.f32 %v1090_v37, %v1072_v19 }
 0xaca   :  { %v1079_v11 = vmul.f32 %v1078_v40, %v1071_v18 }
 0xacb   :  { %v1093_v41 = vsel %vm1092_vm15, %v1072_v19, %v1091_v39 }
 0xacc   :  { %v1096_v0 = vsel %vm1094_vm1, %v1095_v10, %v1093_v41  ;;  %v1081_v30 = vsel %vm1080_vm5, %v1071_v18, %v1079_v11 }
 0xacd   :  { %2520 = vset.pattern.permute.xlu1 %v2798_v24  ;;  %2519 = vset.pattern.permute.xlu2 %v2794_v57  ;;  %v1084_v17 = vsel %vm1082_vm7, %v1083_v13, %v1081_v30 }
 0xace   :  { %1120 = vperm.xlu1 %2520, %v3208_v9   ;;  %1098 = vperm.xlu2 %2519, %v3208_v9  }
 0xad6   :  { %952 = vrot.lane.b32.xlu1 %v947_v23, %s2799_s16  ;;  %2522 = vset.pattern.permute.xlu2 %v2797_v20 }
 0xad7   :  { %1114 = vperm.xlu2 %2522, %v1096_v0   ;;  %2523 = vset.pattern.permute.xlu1 %v2797_v20 }
 0xade   :  { %1109 = vperm.xlu1 %2523, %v1084_v17  }
 0xadf   :  { %2531 = vset.pattern.permute.xlu2 %v2798_v24 }
 0xae6   :  { %2524 = vset.pattern.permute.xlu1 %v2794_v57 }
 0xb0d   :  { %v967_v58 = vpop.permute.xlu2 %966 }
 0xb0e   :  { %v970_v59 = vmul.f32 %v967_v58, %v159_v54  ;;  %v994_v60 = vmul.f32 %v967_v58, %v160_v56 }
 0xb24   :  { %v3230_v22 = vpop.permute.xlu0 %1102  ;;  %v1027_v31 = vpop.permute.xlu1 %1026 }
 0xb25   :  { %v1030_v2 = vmul.f32 %v1027_v31, %v159_v54  ;;  %v1042_v3 = vmul.f32 %v1027_v31, %v160_v56 }
 0xb2d   :  { %v3232_v42 = vpop.permute.xlu0 %1130 }
 0xb2e   :  { %v3234_v43 = vpop.permute.xlu1 %1134 }
 0xb35   :  { %v951_v44 = vpop.permute.xlu0 %950 }
 0xb36   :  { %v958_v45 = vadd.f32 %v951_v44, %v3208_v9  ;;  %v956_v52 = vsub.f32 %v3208_v9, %v951_v44 }
 0xb37   :  { %v3237_v47 = vpop.permute.xlu1 %962 }
 0xb38   :  { %1034 = vperm.xlu2 %2531, %v958_v45   ;;  %v993_v9 = vmul.f32 %v3237_v47, %v160_v56  ;;  %v969_v35 = vmul.f32 %v3237_v47, %v159_v54 }
 0xb40   :  { %v3239_v48 = vpop.permute.xlu1 %1120  ;;  %2532 = vset.pattern.permute.xlu2 %v2983_v21 }
 0xb48   :  { %v953_v49 = vpop.permute.xlu1 %952 }
 0xb49   :  { %v957_v50 = vsub.f32 %v3202_v8, %v953_v49  ;;  %v959_v51 = vadd.f32 %v953_v49, %v3202_v8  ;;  %v3256_v8 = vpop.permute.xlu2 %1124 }
 0xb4b   :  { %990 = vperm.xlu0 %2525, %v959_v51   ;;  %978 = vperm.xlu1 %2524, %v957_v50  }
 0xb50   :  { %v3251_v55 = vpop.permute.xlu1 %1109 }
 0xb51   :  { %v1023_v16 = vpop.permute.xlu2 %1022 }
 0xb52   :  { %v1029_v15 = vmul.f32 %v1023_v16, %v159_v54  ;;  %v1041_v19 = vmul.f32 %v1023_v16, %v160_v56 }
 0xb53   :  { %2527 = vset.pattern.permute.xlu0 %v2798_v24  ;;  %2526 = vset.pattern.permute.xlu1 %v2798_v24 }
 0xb54   :  { %1038 = vperm.xlu0 %2527, %v959_v51   ;;  %1018 = vperm.xlu1 %2526, %v957_v50  }
 0xb59   :  { %v1099_v25 = vpop.permute.xlu2 %1098 }
 0xb5c   :  { %2528 = vset.pattern.permute.xlu0 %v2794_v57  ;;  %2529 = vset.pattern.permute.xlu1 %v2794_v57 }
 0xb5d   :  { %973 = vperm.xlu0 %2528, %v956_v52   ;;  %985 = vperm.xlu1 %2529, %v958_v45  }
 0xb61   :  { %v1115_v26 = vpop.permute.xlu2 %1114 }
 0xb65   :  { %2530 = vset.pattern.permute.xlu0 %v2798_v24  ;;  %2533 = vset.pattern.permute.xlu1 %v3265_v27 }
 0xb66   :  { %1014 = vperm.xlu0 %2530, %v956_v52  }
 0xb6e   :  { %2535 = vset.pattern.permute.xlu0 %v3262_v46 }
 0xb92   :  { %v1035_v29 = vpop.permute.xlu2 %1034 }
 0xbbd   :  { %v991_v61 = vpop.permute.xlu0 %990  ;;  %v979_v63 = vpop.permute.xlu1 %978 }
 0xbbe   :  { %v982_v62 = vadd.f32 %v979_v63, %v970_v59  ;;  %v996_v1 = vadd.f32 %v994_v60, %v979_v63 }
 0xbc0   :  { %1001 = vrot.lane.b32.xlu2 %v996_v1, %s2784_s17  ;;  %v1007_v57 = vsel %vm1005_vm11, %v982_v62, %v991_v61  ;;  %v3289_v62 = vadd.s32 16, %v2983_v21 }
 0xbc6   :  { %v1039_v4 = vpop.permute.xlu0 %1038  ;;  %v1019_v5 = vpop.permute.xlu1 %1018 }
 0xbc7   :  { %v1044_v6 = vadd.f32 %v1042_v3, %v1019_v5  ;;  %v1032_v7 = vadd.f32 %v1030_v2, %v1019_v5 }
 0xbc9   :  { %1057 = vrot.lane.b32.xlu1 %v1044_v6, %s2800_s18  ;;  %1049 = vrot.lane.b32.xlu2 %v1032_v7, %s2777_s30 }
 0xbcf   :  { %v974_v12 = vpop.permute.xlu0 %973  ;;  %v986_v28 = vpop.permute.xlu1 %985 }
 0xbd0   :  { %v995_v14 = vadd.f32 %v993_v9, %v974_v12  ;;  %v981_v36 = vadd.f32 %v974_v12, %v969_v35 }
 0xbd2   :  { %999 = vrot.lane.b32.xlu1 %v995_v14, %s2784_s17  ;;  %v1006_v38 = vsel %vm1005_vm11, %v981_v36, %v986_v28 }
 0xbd8   :  { %v1015_v18 = vpop.permute.xlu0 %1014 }
 0xbd9   :  { %v1043_v20 = vadd.f32 %v1041_v19, %v1015_v18  ;;  %v1031_v24 = vadd.f32 %v1029_v15, %v1015_v18 }
 0xbdb   :  { %1055 = vrot.lane.b32.xlu0 %v1043_v20, %s2800_s18  ;;  %1047 = vrot.lane.b32.xlu1 %v1031_v24, %s2777_s30  ;;  %s2412_s30 = sshll.u32 %s2801_s20, 4  ;;  %s2413_s30 = int_to_ptr.vmem [resolvable:$true] %s2412_s30 }
 0xc1a   :  { %v1002_v34 = vpop.permute.xlu2 %1001 }
 0xc1b   :  { %v1009_v11 = vsel %vm202_vm3, %v1007_v57, %v1002_v34 }
 0xc1c   :  { %v1012_v49 = vsel %vm1010_vm4, %v1009_v11, %v979_v63 }
 0xc1d   :  { %v1106_v53 = vsub.f32 %v1012_v49, %v3230_v22 }
 0xc1f   :  { %v1118_v59 = vmul.f32 %v1115_v26, %v1106_v53  ;;  %v1144_v16 = vmul.f32 %v3234_v43, %v1106_v53 }
 0xc23   :  { %v1050_v39 = vpop.permute.xlu2 %1049 }
 0xc24   :  { %v1062_v41 = vsel %vm1005_vm11, %v1019_v5, %v1050_v39 }
 0xc25   :  { %v1064_v30 = vsel %vm202_vm3, %v1062_v41, %v1039_v4 }
 0xc3b   :  { %v1058_v32 = vpop.permute.xlu1 %1057 }
 0xc3c   :  { %v1066_v44 = vsel %vm1010_vm4, %v1064_v30, %v1058_v32 }
 0xc3d   :  { %v1128_v50 = vsub.f32 %v1066_v44, %v3256_v8 }
 0xc3f   :  { %v1138_v56 = vmul.f32 %v3234_v43, %v1128_v50  ;;  %v1146_v6 = vmul.f32 %v1128_v50, %v1115_v26 }
 0xc41   :  { %v1140_v61 = vsub.f32 %v1118_v59, %v1138_v56  ;;  %v1148_v15 = vadd.f32 %v1146_v6, %v1144_v16 }
 0xc43   :  { %v1142_v63 = vadd.f32 %v1140_v61, %v3230_v22 }
 0xc44   :  { %v1000_v37 = vpop.permute.xlu1 %999 }
 0xc45   :  { %v1008_v40 = vsel %vm202_vm3, %v1006_v38, %v1000_v37 }
 0xc46   :  { %v1011_v23 = vsel %vm1010_vm4, %v1008_v40, %v974_v12 }
 0xc47   :  { %v1105_v13 = vsub.f32 %v1011_v23, %v1099_v25 }
 0xc49   :  { %v1117_v51 = vmul.f32 %v3251_v55, %v1105_v13  ;;  %v1143_v2 = vmul.f32 %v3232_v42, %v1105_v13 }
 0xc4d   :  { %v1048_v10 = vpop.permute.xlu1 %1047  ;;  %v1056_v17 = vpop.permute.xlu0 %1055 }
 0xc4e   :  { %v1061_v0 = vsel %vm1005_vm11, %v1015_v18, %v1048_v10 }
 0xc4f   :  { %v1063_v31 = vsel %vm202_vm3, %v1061_v0, %v1035_v29 }
 0xc50   :  { %v1065_v45 = vsel %vm1010_vm4, %v1063_v31, %v1056_v17 }
 0xc51   :  { %v1127_v47 = vsub.f32 %v1065_v45, %v3239_v48 }
 0xc53   :  { %v1137_v52 = vmul.f32 %v3232_v42, %v1127_v47  ;;  %v1145_v57 = vmul.f32 %v1127_v47, %v3251_v55 }
 0xc55   :  { %v1139_v54 = vsub.f32 %v1117_v51, %v1137_v52  ;;  %v1147_v3 = vadd.f32 %v1145_v57, %v1143_v2 }
 0xc57   :  { %v3283_v58 = vadd.f32 %v1139_v54, %v1099_v25  ;;  %v3303_v7 = vadd.f32 %v1147_v3, %v3239_v48  ;;  %v1150_v48 = vadd.f32 %v1148_v15, %v3256_v8 }
 0xc59   :  { %1328 = vst [vmem:[#allocation1] sm:$0xff] %v3283_v58  ;;  %v1151_v60 = vperm.slane %v3283_v58, 0  ;;  %v1201_v55 = vperm.slane %v3283_v58, 2  ;;  %v1176_v42 = vperm.slane %v3283_v58, 1  ;;  %v1226_v18 = vperm.slane %v3283_v58, 3 }
 0xc5a   :  { %v1251_v43 = vperm.slane %v3283_v58, 4  ;;  %v1276_v8 = vperm.slane %v3283_v58, 5  ;;  %v3334_v20 = vperm.slane %v3303_v7, 0  ;;  %v3343_v28 = vperm.slane %v3303_v7, 1 }
 0xc5b   :  { %1174 = vperm.xlu0 %2535, %v1151_v60   ;;  %1162 = vperm.xlu1 %2533, %v1151_v60   ;;  %v3352_v34 = vperm.slane %v3303_v7, 2  ;;  %v3366_v23 = vperm.slane %v3303_v7, 4  ;;  %v3380_v44 = vperm.slane %v3303_v7, 5  ;;  %v1301_v45 = vperm.slane %v3283_v58, 6 }
 0xc5c   :  { %1156 = vperm.xlu2 %2532, %v1151_v60  }
 0xc60   :  { %v1330_v1 = vld [vmem:[#allocation1 + $0x7] ss:$9 sm:$0xff] }
 0xc61   :  { %1331 = vst [vmem:[#allocation1] sm:$0xff] %v1142_v63  ;;  %v1343_v24 = vperm.slane %v1330_v1, 0 }
 0xc63   :  { %2540 = vset.pattern.permute.xlu0 %v2983_v21  ;;  %2536 = vset.pattern.permute.xlu1 %v2983_v21 }
 0xc64   :  { %2534 = vset.pattern.permute.xlu2 %v3289_v62 }
 0xc68   :  { %v3296_v4 = vld [vmem:[#allocation1] ss:$9 sm:$0xff]  ;;  %v3300_v22 = vld [vmem:[#allocation1 + $0x2] ss:$9 sm:$0xff] }
 0xc69   :  { %v3298_v5 = vld [vmem:[#allocation1 + $0x1] ss:$9 sm:$0xff]  ;;  %v3307_v9 = vld [vmem:[#allocation1 + $0x3] ss:$9 sm:$0xff]  ;;  %v1344_v39 = vperm.slane %v3296_v4, 0  ;;  %v1346_v47 = vperm.slane %v3300_v22, 0 }
 0xc6a   :  { %v3309_v12 = vld [vmem:[#allocation1 + $0x4] ss:$9 sm:$0xff]  ;;  %v1345_v10 = vperm.slane %v3298_v5, 0  ;;  %v1347_v56 = vperm.slane %v3307_v9, 0 }
 0xc6b   :  { %v3311_v14 = vld [vmem:[#allocation1 + $0x5] ss:$9 sm:$0xff]  ;;  %1206 = vperm.xlu0 %2540, %v1201_v55   ;;  %1181 = vperm.xlu1 %2536, %v1176_v42   ;;  %v1348_v57 = vperm.slane %v3309_v12, 0 }
 0xc6c   :  { %1562 = vst [vmem:[#allocation1] sm:$0xff] %v3303_v7  ;;  %1168 = vperm.xlu2 %2534, %v1151_v60  }
 0xc73   :  { %v3316_v19 = vld [vmem:[#allocation1 + $0x7] ss:$9 sm:$0xff]  ;;  %2545 = vset.pattern.permute.xlu0 %v3265_v27  ;;  %2538 = vset.pattern.permute.xlu1 %v3289_v62 }
 0xc74   :  { %1565 = vst [vmem:[#allocation1] sm:$0xff] %v1150_v48  ;;  %2537 = vset.pattern.permute.xlu2 %v3265_v27 }
 0xc7b   :  { %1237 = vperm.xlu0 %2545, %v1226_v18   ;;  %1193 = vperm.xlu1 %2538, %v1176_v42  }
 0xc7c   :  { %1187 = vperm.xlu2 %2537, %v1176_v42  }
 0xc83   :  { %2550 = vset.pattern.permute.xlu0 %v3289_v62  ;;  %2541 = vset.pattern.permute.xlu1 %v3265_v27 }
 0xc84   :  { %2539 = vset.pattern.permute.xlu2 %v3262_v46 }
 0xc8b   :  { %1268 = vperm.xlu0 %2550, %v1251_v43   ;;  %1212 = vperm.xlu1 %2541, %v1201_v55  }
 0xc8c   :  { %1199 = vperm.xlu2 %2539, %v1176_v42  }
 0xc93   :  { %2555 = vset.pattern.permute.xlu0 %v3262_v46  ;;  %2543 = vset.pattern.permute.xlu1 %v3262_v46 }
 0xc94   :  { %2542 = vset.pattern.permute.xlu2 %v3289_v62 }
 0xc9b   :  { %1299 = vperm.xlu0 %2555, %v1276_v8   ;;  %1224 = vperm.xlu1 %2543, %v1201_v55  }
 0xc9c   :  { %1218 = vperm.xlu2 %2542, %v1201_v55  }
 0xca3   :  { %2560 = vset.pattern.permute.xlu0 %v2983_v21  ;;  %2546 = vset.pattern.permute.xlu1 %v3289_v62 }
 0xca4   :  { %2544 = vset.pattern.permute.xlu2 %v2983_v21 }
 0xcab   :  { %1390 = vperm.xlu0 %2560, %v3334_v20   ;;  %1243 = vperm.xlu1 %2546, %v1226_v18  }
 0xcac   :  { %1231 = vperm.xlu2 %2544, %v1226_v18  }
 0xcb3   :  { %2565 = vset.pattern.permute.xlu0 %v3265_v27  ;;  %2548 = vset.pattern.permute.xlu1 %v2983_v21 }
 0xcb4   :  { %2547 = vset.pattern.permute.xlu2 %v3262_v46 }
 0xcb6   :  { %v1157_v25 = vpop.permute.xlu2 %1156 }
 0xcb7   :  { %v3340_v26 = vsub.f32 %v1157_v25, %v1343_v24 }
 0xcbb   :  { %1421 = vperm.xlu0 %2565, %v3343_v28   ;;  %1256 = vperm.xlu1 %2548, %v1251_v43  }
 0xcbc   :  { %1249 = vperm.xlu2 %2547, %v1226_v18  }
 0xcc3   :  { %2570 = vset.pattern.permute.xlu0 %v3289_v62  ;;  %2551 = vset.pattern.permute.xlu1 %v3262_v46 }
 0xcc4   :  { %2549 = vset.pattern.permute.xlu2 %v3265_v27 }
 0xcc6   :  { %v1169_v29 = vpop.permute.xlu2 %1168 }
 0xcc7   :  { %v3349_v32 = vsub.f32 %v1169_v29, %v1343_v24 }
 0xccb   :  { %1452 = vperm.xlu0 %2570, %v3352_v34   ;;  %1274 = vperm.xlu1 %2551, %v1251_v43  }
 0xccc   :  { %1262 = vperm.xlu2 %2549, %v1251_v43  }
 0xccd   :  { %v1175_v35 = vpop.permute.xlu0 %1174  ;;  %v1163_v36 = vpop.permute.xlu1 %1162 }
 0xcce   :  { %v3355_v37 = vsub.f32 %v1175_v35, %v1343_v24  ;;  %v3357_v38 = vsub.f32 %v1163_v36, %v1343_v24 }
 0xcd3   :  { %2575 = vset.pattern.permute.xlu0 %v2983_v21  ;;  %2553 = vset.pattern.permute.xlu1 %v3265_v27 }
 0xcd4   :  { %2552 = vset.pattern.permute.xlu2 %v2983_v21 }
 0xcd6   :  { %v1188_v40 = vpop.permute.xlu2 %1187 }
 0xcd7   :  { %v3363_v41 = vsub.f32 %v1188_v40, %v1344_v39 }
 0xcdb   :  { %1490 = vperm.xlu0 %2575, %v3366_v23   ;;  %1287 = vperm.xlu1 %2553, %v1276_v8  }
 0xcdc   :  { %1281 = vperm.xlu2 %2552, %v1276_v8  }
 0xcdd   :  { %v1207_v0 = vpop.permute.xlu0 %1206  ;;  %v1182_v11 = vpop.permute.xlu1 %1181 }
 0xcde   :  { %v3370_v30 = vsub.f32 %v1207_v0, %v1345_v10  ;;  %v3372_v13 = vsub.f32 %v1182_v11, %v1344_v39  ;;  %v1460_v0 = vperm.slane %v3303_v7, 3 }
 0xce3   :  { %2579 = vset.pattern.permute.xlu0 %v3265_v27  ;;  %2556 = vset.pattern.permute.xlu1 %v2983_v21 }
 0xce4   :  { %2554 = vset.pattern.permute.xlu2 %v3289_v62 }
 0xce6   :  { %v1200_v17 = vpop.permute.xlu2 %1199 }
 0xce7   :  { %v3377_v31 = vsub.f32 %v1200_v17, %v1344_v39 }
 0xceb   :  { %1521 = vperm.xlu0 %2579, %v3380_v44   ;;  %1306 = vperm.xlu1 %2556, %v1301_v45  }
 0xcec   :  { %1293 = vperm.xlu2 %2554, %v1276_v8  }
 0xced   :  { %v1238_v49 = vpop.permute.xlu0 %1237  ;;  %v1194_v50 = vpop.permute.xlu1 %1193 }
 0xcee   :  { %v3385_v51 = vsub.f32 %v1238_v49, %v1346_v47  ;;  %v3387_v52 = vsub.f32 %v1194_v50, %v1344_v39  ;;  %v1349_v39 = vperm.slane %v3311_v14, 0  ;;  %v1574_v49 = vld [vmem:[#allocation1 + $0x4] ss:$9 sm:$0xff] }
 0xcef   :  { %v3461_v50 = vperm.slane %v1574_v49, 0 }
 0xcf3   :  { %2584 = vset.pattern.permute.xlu0 %v3262_v46  ;;  %2558 = vset.pattern.permute.xlu1 %v3289_v62 }
 0xcf4   :  { %2557 = vset.pattern.permute.xlu2 %v3265_v27 }
 0xcf6   :  { %v1219_v53 = vpop.permute.xlu2 %1218 }
 0xcf7   :  { %v3392_v54 = vsub.f32 %v1219_v53, %v1345_v10 }
 0xcfb   :  { %1533 = vperm.xlu0 %2584, %v3380_v44   ;;  %1318 = vperm.xlu1 %2558, %v1301_v45  }
 0xcfc   :  { %1312 = vperm.xlu2 %2557, %v1301_v45  }
 0xcfd   :  { %v1269_v58 = vpop.permute.xlu0 %1268  ;;  %v1213_v59 = vpop.permute.xlu1 %1212 }
 0xcfe   :  { %v3396_v60 = vsub.f32 %v1269_v58, %v1347_v56  ;;  %v3398_v61 = vsub.f32 %v1213_v59, %v1345_v10 }
 0xd03   :  { %2561 = vset.pattern.permute.xlu1 %v3265_v27 }
 0xd04   :  { %2559 = vset.pattern.permute.xlu2 %v3262_v46 }
 0xd06   :  { %v1232_v63 = vpop.permute.xlu2 %1231 }
 0xd07   :  { %v3402_v1 = vsub.f32 %v1232_v63, %v1346_v47 }
 0xd0b   :  { %1396 = vperm.xlu1 %2561, %v3334_v20  }
 0xd0c   :  { %1324 = vperm.xlu2 %2559, %v1301_v45  }
 0xd0d   :  { %v1300_v2 = vpop.permute.xlu0 %1299  ;;  %v1225_v3 = vpop.permute.xlu1 %1224 }
 0xd0e   :  { %v1380_v4 = vsub.f32 %v1300_v2, %v1348_v57  ;;  %v3406_v5 = vsub.f32 %v1225_v3, %v1345_v10  ;;  %v1577_v3 = vperm.slane %v3316_v19, 0 }
 0xd10   :  { %v1642_v63 = vmul.f32 %v1380_v4, %v1380_v4  ;;  %v1619_v4 = vmul.f32 %v3340_v26, %v3340_v26 }
 0xd13   :  { %2563 = vset.pattern.permute.xlu1 %v3262_v46 }
 0xd14   :  { %2562 = vset.pattern.permute.xlu2 %v3289_v62 }
 0xd16   :  { %v1250_v22 = vpop.permute.xlu2 %1249 }
 0xd17   :  { %v3410_v6 = vsub.f32 %v1250_v22, %v1346_v47 }
 0xd1b   :  { %1408 = vperm.xlu1 %2563, %v3334_v20  }
 0xd1c   :  { %1402 = vperm.xlu2 %2562, %v3334_v20  }
 0xd1d   :  { %v1244_v55 = vpop.permute.xlu1 %1243  ;;  %v1391_v20 = vpop.permute.xlu0 %1390 }
 0xd1e   :  { %v3414_v42 = vsub.f32 %v1244_v55, %v1346_v47  ;;  %v1591_v55 = vsub.f32 %v1391_v20, %v1577_v3 }
 0xd23   :  { %2566 = vset.pattern.permute.xlu1 %v3289_v62 }
 0xd24   :  { %2564 = vset.pattern.permute.xlu2 %v2983_v21 }
 0xd26   :  { %v1263_v9 = vpop.permute.xlu2 %1262 }
 0xd27   :  { %v3418_v12 = vsub.f32 %v1263_v9, %v1347_v56 }
 0xd2b   :  { %1427 = vperm.xlu1 %2566, %v3343_v28  }
 0xd2c   :  { %1415 = vperm.xlu2 %2564, %v3343_v28  }
 0xd2d   :  { %v1257_v16 = vpop.permute.xlu1 %1256  ;;  %v3438_v29 = vpop.permute.xlu0 %1421 }
 0xd2e   :  { %v3422_v15 = vsub.f32 %v1257_v16, %v1347_v56  ;;  %v1647_v16 = vmul.f32 %v1591_v55, %v1591_v55 }
 0xd33   :  { %2568 = vset.pattern.permute.xlu1 %v2983_v21 }
 0xd34   :  { %2567 = vset.pattern.permute.xlu2 %v3262_v46 }
 0xd36   :  { %v1282_v48 = vpop.permute.xlu2 %1281 }
 0xd37   :  { %v3426_v18 = vsub.f32 %v1282_v48, %v1348_v57 }
 0xd3b   :  { %1440 = vperm.xlu1 %2568, %v3352_v34  }
 0xd3c   :  { %1433 = vperm.xlu2 %2567, %v3343_v28  }
 0xd3d   :  { %v1275_v43 = vpop.permute.xlu1 %1274  ;;  %v3444_v28 = vpop.permute.xlu0 %1452 }
 0xd3e   :  { %v3430_v8 = vsub.f32 %v1275_v43, %v1347_v56 }
 0xd43   :  { %2571 = vset.pattern.permute.xlu1 %v3262_v46 }
 0xd44   :  { %2569 = vset.pattern.permute.xlu2 %v3265_v27 }
 0xd46   :  { %v1294_v24 = vpop.permute.xlu2 %1293 }
 0xd47   :  { %v3434_v25 = vsub.f32 %v1294_v24, %v1348_v57 }
 0xd4b   :  { %1458 = vperm.xlu1 %2571, %v3352_v34  }
 0xd4c   :  { %1446 = vperm.xlu2 %2569, %v3352_v34  }
 0xd4d   :  { %v1288_v35 = vpop.permute.xlu1 %1287  ;;  %v3450_v34 = vpop.permute.xlu0 %1490 }
 0xd4e   :  { %v3440_v36 = vsub.f32 %v1288_v35, %v1348_v57  ;;  %v1621_v35 = vmul.f32 %v3349_v32, %v3349_v32 }
 0xd53   :  { %2573 = vset.pattern.permute.xlu1 %v3265_v27 }
 0xd54   :  { %2572 = vset.pattern.permute.xlu2 %v2983_v21 }
 0xd56   :  { %v1313_v40 = vpop.permute.xlu2 %1312 }
 0xd57   :  { %v3447_v10 = vsub.f32 %v1313_v40, %v1349_v39  ;;  %v1675_v40 = vadd.f32 %v1647_v16, %v1619_v4 }
 0xd5b   :  { %1471 = vperm.xlu1 %2573, %v1460_v0  }
 0xd5c   :  { %1465 = vperm.xlu2 %2572, %v1460_v0  }
 0xd5d   :  { %v1307_v11 = vpop.permute.xlu1 %1306  ;;  %v3456_v45 = vpop.permute.xlu0 %1521 }
 0xd5e   :  { %v3452_v17 = vsub.f32 %v1307_v11, %v1349_v39 }
 0xd63   :  { %1496 = vperm.xlu1 %2573, %v3366_v23  }
 0xd64   :  { %2574 = vset.pattern.permute.xlu2 %v3289_v62 }
 0xd66   :  { %v1325_v47 = vpop.permute.xlu2 %1324 }
 0xd67   :  { %v3458_v14 = vsub.f32 %v1325_v47, %v1349_v39 }
 0xd6b   :  { %2577 = vset.pattern.permute.xlu1 %v3289_v62 }
 0xd6c   :  { %1477 = vperm.xlu2 %2574, %v1460_v0  }
 0xd6d   :  { %v1534_v53 = vpop.permute.xlu0 %1533  ;;  %v1319_v56 = vpop.permute.xlu1 %1318 }
 0xd6e   :  { %v1614_v58 = vsub.f32 %v1534_v53, %v3461_v50  ;;  %v3464_v59 = vsub.f32 %v1319_v56, %v1349_v39  ;;  %v1620_v39 = vmul.f32 %v3357_v38, %v3357_v38  ;;  %v1566_v53 = vld [vmem:[#allocation1] ss:$9 sm:$0xff]  ;;  %v1622_v56 = vmul.f32 %v3355_v37, %v3355_v37 }
 0xd6f   :  { %v1623_v37 = vmul.f32 %v3372_v13, %v3372_v13 }
 0xd70   :  { %v1670_v57 = vmul.f32 %v1614_v58, %v1614_v58 }
 0xd72   :  { %v3466_v2 = vadd.f32 %v1670_v57, %v1642_v63  ;;  %v1535_v57 = vperm.slane %v3303_v7, 6  ;;  %v1624_v7 = vmul.f32 %v3363_v41, %v3363_v41  ;;  %v1568_v41 = vld [vmem:[#allocation1 + $0x1] ss:$9 sm:$0xff] }
 0xd73   :  { %1502 = vperm.xlu1 %2577, %v3366_v23  }
 0xd74   :  { %2576 = vset.pattern.permute.xlu2 %v3262_v46 }
 0xd76   :  { %v1403_v22 = vpop.permute.xlu2 %1402 }
 0xd77   :  { %v1593_v9 = vsub.f32 %v1403_v22, %v1577_v3  ;;  %v3496_v22 = vperm.slane %v1566_v53, 0 }
 0xd79   :  { %v1649_v43 = vmul.f32 %v1593_v9, %v1593_v9 }
 0xd7b   :  { %2580 = vset.pattern.permute.xlu1 %v3262_v46  ;;  %v1677_v11 = vadd.f32 %v1649_v43, %v1621_v35 }
 0xd7c   :  { %1483 = vperm.xlu2 %2576, %v1460_v0   ;;  %v1703_v0 = vsel %vm560_vm0, %v1675_v40, inf }
 0xd7d   :  { %v1397_v48 = vpop.permute.xlu1 %1396  ;;  %v3486_v32 = vsel %vm560_vm0, %v1677_v11, inf  ;;  %v1579_v11 = vperm.slane %v1568_v41, 0 }
 0xd7e   :  { %v1592_v24 = vsub.f32 %v1397_v48, %v1577_v3 }
 0xd80   :  { %v1648_v19 = vmul.f32 %v1592_v24, %v1592_v24 }
 0xd82   :  { %v1676_v20 = vadd.f32 %v1648_v19, %v1620_v39 }
 0xd83   :  { %1508 = vperm.xlu1 %2580, %v3366_v23  }
 0xd84   :  { %2578 = vset.pattern.permute.xlu2 %v2983_v21  ;;  %v3482_v26 = vsel %vm560_vm0, %v1676_v20, inf }
 0xd85   :  { %v1705_v47 = vmin.f32 %v1703_v0, %v3482_v26 }
 0xd86   :  { %v1416_v63 = vpop.permute.xlu2 %1415 }
 0xd87   :  { %v3489_v38 = vmin.f32 %v1705_v47, %v3486_v32  ;;  %v1595_v9 = vsub.f32 %v1416_v63, %v3496_v22  ;;  %v1601_v47 = vsub.f32 %v3444_v28, %v1579_v11 }
 0xd8b   :  { %2582 = vset.pattern.permute.xlu1 %v2983_v21  ;;  %v1596_v21 = vsub.f32 %v3438_v29, %v3496_v22  ;;  %v1625_v29 = vmul.f32 %v3387_v52, %v3387_v52 }
 0xd8c   :  { %1515 = vperm.xlu2 %2578, %v3380_v44  }
 0xd8d   :  { %v1409_v23 = vpop.permute.xlu1 %1408  ;;  %v1652_v16 = vmul.f32 %v1596_v21, %v1596_v21 }
 0xd8e   :  { %v1594_v49 = vsub.f32 %v1409_v23, %v1577_v3  ;;  %v1651_v3 = vmul.f32 %v1595_v9, %v1595_v9  ;;  %v1627_v9 = vmul.f32 %v3370_v30, %v3370_v30 }
 0xd8f   :  { %v1680_v35 = vadd.f32 %v1652_v16, %v1624_v7  ;;  %v1572_v16 = vld [vmem:[#allocation1 + $0x3] ss:$9 sm:$0xff] }
 0xd90   :  { %v1650_v58 = vmul.f32 %v1594_v49, %v1594_v49  ;;  %v1679_v48 = vadd.f32 %v1651_v3, %v1623_v37  ;;  %v1657_v49 = vmul.f32 %v1601_v47, %v1601_v47 }
 0xd92   :  { %v3498_v55 = vadd.f32 %v1650_v58, %v1622_v56  ;;  %v1716_v13 = vsel %vm560_vm0, %v1679_v48, inf  ;;  %v1629_v58 = vmul.f32 %v3392_v54, %v3392_v54  ;;  %v3538_v48 = vperm.slane %v1572_v16, 0 }
 0xd93   :  { %1540 = vperm.xlu1 %2582, %v1535_v57  }
 0xd94   :  { %2581 = vset.pattern.permute.xlu2 %v3289_v62  ;;  %v1685_v3 = vadd.f32 %v1657_v49, %v1629_v58 }
 0xd96   :  { %v3510_v43 = vpop.permute.xlu2 %1433  ;;  %v1732_v7 = vsel %vm560_vm0, %v1685_v3, inf }
 0xd9b   :  { %2585 = vset.pattern.permute.xlu1 %v3289_v62  ;;  %v3517_v62 = vsel %vm560_vm0, %v1680_v35, inf }
 0xd9c   :  { %1527 = vperm.xlu2 %2581, %v3380_v44   ;;  %v1718_v44 = vmin.f32 %v1716_v13, %v3517_v62 }
 0xd9d   :  { %v1428_v4 = vpop.permute.xlu1 %1427 }
 0xd9e   :  { %v1597_v24 = vsub.f32 %v1428_v4, %v3496_v22  ;;  %v1607_v4 = vsub.f32 %v3450_v34, %v3538_v48 }
 0xda0   :  { %v1653_v39 = vmul.f32 %v1597_v24, %v1597_v24  ;;  %v1663_v24 = vmul.f32 %v1607_v4, %v1607_v4  ;;  %v1636_v4 = vmul.f32 %v3418_v12, %v3418_v12 }
 0xda2   :  { %v1681_v19 = vadd.f32 %v1653_v39, %v1625_v29 }
 0xda3   :  { %1552 = vperm.xlu1 %2585, %v1535_v57  }
 0xda4   :  { %2583 = vset.pattern.permute.xlu2 %v3265_v27  ;;  %v1719_v40 = vsel %vm560_vm0, %v1681_v19, inf  ;;  %v1628_v27 = vmul.f32 %v3398_v61, %v3398_v61  ;;  %v1630_v19 = vmul.f32 %v3406_v5, %v3406_v5  ;;  %v1631_v5 = vmul.f32 %v3402_v1, %v3402_v1 }
 0xda5   :  { %1890 = vmin.xlane.f32.xlu0 %v1719_v40  ;;  %v3522_v20 = vmin.f32 %v1718_v44, %v1719_v40 }
 0xda6   :  { %v1447_v52 = vpop.permute.xlu2 %1446 }
 0xda7   :  { %v1600_v23 = vsub.f32 %v1447_v52, %v1579_v11  ;;  %v1570_v52 = vld [vmem:[#allocation1 + $0x2] ss:$9 sm:$0xff] }
 0xda9   :  { %v1656_v53 = vmul.f32 %v1600_v23, %v1600_v23 }
 0xdab   :  { %v1684_v37 = vadd.f32 %v1656_v53, %v1628_v27  ;;  %v1632_v27 = vmul.f32 %v3385_v51, %v3385_v51 }
 0xdac   :  { %1546 = vperm.xlu2 %2583, %v1535_v57  }
 0xdad   :  { %v1441_v56 = vpop.permute.xlu1 %1440  ;;  %1878 = vmin.xlane.f32.xlu0 %v1703_v0  ;;  %v3535_v54 = vsel %vm560_vm0, %v1684_v37, inf }
 0xdae   :  { %v1599_v63 = vsub.f32 %v1441_v56, %v1579_v11 }
 0xdb0   :  { %v1655_v21 = vmul.f32 %v1599_v63, %v1599_v63  ;;  %v1633_v63 = vmul.f32 %v3414_v42, %v3414_v42 }
 0xdb2   :  { %v1683_v28 = vadd.f32 %v1655_v21, %v1627_v9 }
 0xdb4   :  { %2586 = vset.pattern.permute.xlu2 %v3262_v46  ;;  %v1729_v0 = vsel %vm560_vm0, %v1683_v28, inf  ;;  %v1635_v46 = vmul.f32 %v3422_v15, %v3422_v15 }
 0xdb5   :  { %1898 = vmin.xlane.f32.xlu0 %v1732_v7  ;;  %v1731_v61 = vmin.f32 %v1729_v0, %v3535_v54 }
 0xdb6   :  { %v1466_v39 = vpop.permute.xlu2 %1465  ;;  %v1691_v44 = vadd.f32 %v1663_v24, %v1635_v46 }
 0xdb7   :  { %v1733_v30 = vmin.f32 %v1731_v61, %v1732_v7 }
 0xdb8   :  { %v3548_v47 = vsel %vm560_vm0, %v1691_v44, inf }
 0xdbc   :  { %1558 = vperm.xlu2 %2586, %v1535_v57   ;;  %v1580_v57 = vperm.slane %v1570_v52, 0 }
 0xdbd   :  { %v1459_v35 = vpop.permute.xlu1 %1458  ;;  %1882 = vmin.xlane.f32.xlu0 %v3486_v32 }
 0xdbe   :  { %v1602_v29 = vsub.f32 %v1459_v35, %v1579_v11  ;;  %v1603_v11 = vsub.f32 %v1466_v39, %v1580_v57  ;;  %v1634_v35 = vmul.f32 %v3410_v6, %v3410_v6  ;;  %v1640_v6 = vmul.f32 %v3440_v36, %v3440_v36 }
 0xdc0   :  { %v1658_v41 = vmul.f32 %v1602_v29, %v1602_v29  ;;  %v1659_v49 = vmul.f32 %v1603_v11, %v1603_v11 }
 0xdc2   :  { %v1686_v40 = vadd.f32 %v1658_v41, %v1630_v19  ;;  %v1687_v9 = vadd.f32 %v1659_v49, %v1631_v5 }
 0xdc4   :  { %v1734_v34 = vsel %vm560_vm0, %v1686_v40, inf  ;;  %v1742_v28 = vsel %vm560_vm0, %v1687_v9, inf }
 0xdc5   :  { %1910 = vmin.xlane.f32.xlu0 %v3548_v47  ;;  %v3552_v32 = vmin.f32 %v1733_v30, %v1734_v34 }
 0xdc6   :  { %v1478_v15 = vpop.permute.xlu2 %1477 }
 0xdc7   :  { %v1605_v23 = vsub.f32 %v1478_v15, %v1580_v57 }
 0xdc9   :  { %v1661_v56 = vmul.f32 %v1605_v23, %v1605_v23  ;;  %v1598_v23 = vsub.f32 %v3510_v43, %v3496_v22 }
 0xdcb   :  { %v1689_v37 = vadd.f32 %v1661_v56, %v1633_v63  ;;  %v1654_v56 = vmul.f32 %v1598_v23, %v1598_v23 }
 0xdcd   :  { %v1472_v53 = vpop.permute.xlu1 %1471  ;;  %1886 = vmin.xlane.f32.xlu1 %v1716_v13  ;;  %v3567_v51 = vsel %vm560_vm0, %v1689_v37, inf }
 0xdce   :  { %v1604_v58 = vsub.f32 %v1472_v53, %v1580_v57 }
 0xdd0   :  { %v1660_v21 = vmul.f32 %v1604_v58, %v1604_v58 }
 0xdd2   :  { %v1688_v3 = vadd.f32 %v1660_v21, %v1632_v27 }
 0xdd4   :  { %v3562_v16 = vsel %vm560_vm0, %v1688_v3, inf }
 0xdd5   :  { %v1497_v13 = vpop.permute.xlu1 %1496  ;;  %1894 = vmin.xlane.f32.xlu1 %v1729_v0  ;;  %v1744_v1 = vmin.f32 %v1742_v28, %v3562_v16  ;;  %v1612_v0 = vsub.f32 %v3456_v45, %v3461_v50 }
 0xdd6   :  { %v1608_v7 = vsub.f32 %v1497_v13, %v3538_v48  ;;  %v1484_v61 = vpop.permute.xlu2 %1483 }
 0xdd7   :  { %v1606_v42 = vsub.f32 %v1484_v61, %v1580_v57  ;;  %v1746_v30 = vmin.f32 %v1744_v1, %v3567_v51  ;;  %v1668_v41 = vmul.f32 %v1612_v0, %v1612_v0 }
 0xdd8   :  { %v1664_v24 = vmul.f32 %v1608_v7, %v1608_v7 }
 0xdd9   :  { %v1662_v46 = vmul.f32 %v1606_v42, %v1606_v42  ;;  %v1696_v52 = vadd.f32 %v1668_v41, %v1640_v6 }
 0xdda   :  { %v1692_v29 = vadd.f32 %v1664_v24, %v1636_v4 }
 0xddb   :  { %v1690_v39 = vadd.f32 %v1662_v46, %v1634_v35  ;;  %v1769_v57 = vsel %vm560_vm0, %v1696_v52, inf  ;;  %v1708_v35 = vsel %vm560_vm0, %v3498_v55, inf  ;;  %v1643_v46 = vmul.f32 %v3452_v17, %v3452_v17 }
 0xddc   :  { %v1756_v19 = vsel %vm560_vm0, %v1692_v29, inf  ;;  %v1644_v29 = vmul.f32 %v3447_v10, %v3447_v10  ;;  %v1736_v10 = vrot.slane %v3552_v32, 4 }
 0xddd   :  { %1880 = vmin.xlane.f32.xlu1 %v3482_v26  ;;  %v1747_v44 = vsel %vm560_vm0, %v1690_v39, inf  ;;  %v1757_v40 = vmin.f32 %v3548_v47, %v1756_v19  ;;  %v1637_v47 = vmul.f32 %v3396_v60, %v3396_v60  ;;  %v1626_v60 = vmul.f32 %v3377_v31, %v3377_v31 }
 0xdde   :  { %1908 = vmin.xlane.f32.xlu0 %v1747_v44  ;;  %v3580_v12 = vmin.f32 %v1746_v30, %v1747_v44 }
 0xddf   :  { %v1682_v43 = vadd.f32 %v1654_v56, %v1626_v60  ;;  %v1646_v56 = vmul.f32 %v3458_v14, %v3458_v14 }
 0xde1   :  { %v1721_v9 = vsel %vm560_vm0, %v1682_v43, inf }
 0xde5   :  { %1888 = vmin.xlane.f32.xlu2 %v3517_v62  ;;  %v1503_v45 = vpop.permute.xlu1 %1502  ;;  %1902 = vmin.xlane.f32.xlu1 %v1742_v28  ;;  %v1639_v62 = vmul.f32 %v3426_v18, %v3426_v18  ;;  %v1641_v28 = vmul.f32 %v3434_v25, %v3434_v25  ;;  %v1576_v25 = vld [vmem:[#allocation1 + $0x5] ss:$9 sm:$0xff] }
 0xde6   :  { %v1609_v15 = vsub.f32 %v1503_v45, %v3538_v48  ;;  %1920 = vmin.xlane.f32.xlu0 %v1769_v57  ;;  %v1516_v26 = vpop.permute.xlu2 %1515  ;;  %v1583_v30 = vperm.slane %v1576_v25, 0 }
 0xde7   :  { %v1611_v11 = vsub.f32 %v1516_v26, %v3461_v50  ;;  %v1737_v26 = vmin.f32 %v3552_v32, %v1736_v10 }
 0xde8   :  { %v1665_v36 = vmul.f32 %v1609_v15, %v1609_v15 }
 0xde9   :  { %v1667_v49 = vmul.f32 %v1611_v11, %v1611_v11  ;;  %v1738_v60 = vrot.slane %v1737_v26, 2 }
 0xdea   :  { %v1693_v53 = vadd.f32 %v1665_v36, %v1637_v47 }
 0xdeb   :  { %v1695_v5 = vadd.f32 %v1667_v49, %v1639_v62  ;;  %v1645_v49 = vmul.f32 %v3464_v59, %v3464_v59 }
 0xdec   :  { %v1758_v58 = vsel %vm560_vm0, %v1693_v53, inf }
 0xded   :  { %1896 = vmin.xlane.f32.xlu2 %v3535_v54  ;;  %1900 = vmin.xlane.f32.xlu1 %v1734_v34  ;;  %v1759_v27 = vmin.f32 %v1757_v40, %v1758_v58  ;;  %v1768_v63 = vsel %vm560_vm0, %v1695_v5, inf  ;;  %v1638_v54 = vmul.f32 %v3430_v8, %v3430_v8 }
 0xdee   :  { %v1770_v22 = vmin.f32 %v1768_v63, %v1769_v57 }
 0xdf5   :  { %1892 = vmin.xlane.f32.xlu2 %v1721_v9  ;;  %v1509_v18 = vpop.permute.xlu1 %1508  ;;  %1912 = vmin.xlane.f32.xlu1 %v1756_v19  ;;  %v1709_v19 = vmin.f32 %v3489_v38, %v1708_v35  ;;  %v1749_v38 = vrot.slane %v3580_v12, 4 }
 0xdf6   :  { %v1610_v21 = vsub.f32 %v1509_v18, %v3538_v48  ;;  %v1528_v3 = vpop.permute.xlu2 %1527 }
 0xdf7   :  { %v1613_v37 = vsub.f32 %v1528_v3, %v3461_v50  ;;  %v3611_v50 = vsel %vm560_vm0, %v3466_v2, inf  ;;  %v1710_v6 = vrot.slane %v1709_v19, 4  ;;  %v1750_v53 = vmin.f32 %v3580_v12, %v1749_v38 }
 0xdf8   :  { %v1666_v34 = vmul.f32 %v1610_v21, %v1610_v21 }
 0xdf9   :  { %v1669_v31 = vmul.f32 %v1613_v37, %v1613_v37  ;;  %v1711_v45 = vmin.f32 %v1709_v19, %v1710_v6  ;;  %v1751_v18 = vrot.slane %v1750_v53, 2  ;;  %v1739_v37 = vmin.f32 %v1737_v26, %v1738_v60 }
 0xdfa   :  { %v1694_v13 = vadd.f32 %v1666_v34, %v1638_v54 }
 0xdfb   :  { %v1697_v1 = vadd.f32 %v1669_v31, %v1641_v28  ;;  %v1712_v15 = vrot.slane %v1711_v45, 2  ;;  %v1752_v28 = vmin.f32 %v1750_v53, %v1751_v18 }
 0xdfc   :  { %v1760_v7 = vsel %vm560_vm0, %v1694_v13, inf  ;;  %v1740_v13 = vrot.slane %v1739_v37, 1 }
 0xdfd   :  { %1904 = vmin.xlane.f32.xlu2 %v3562_v16  ;;  %1914 = vmin.xlane.f32.xlu1 %v1758_v58  ;;  %v1761_v61 = vmin.f32 %v1759_v27, %v1760_v7  ;;  %v1771_v48 = vsel %vm560_vm0, %v1697_v1, inf  ;;  %v1713_v58 = vmin.f32 %v1711_v45, %v1712_v15 }
 0xdfe   :  { %v1772_v42 = vmin.f32 %v1770_v22, %v1771_v48  ;;  %v3648_v25 = vmin.f32 %v1739_v37, %v1740_v13 }
 0xdff   :  { %v1762_v36 = vrot.slane %v1761_v61, 4  ;;  %v1714_v3 = vrot.slane %v1713_v58, 1 }
 0xe00   :  { %v3614_v8 = vmin.f32 %v1772_v42, %v3611_v50  ;;  %v1753_v42 = vrot.slane %v1752_v28, 1  ;;  %vm1825_vm8 = vcmp.eq.f32.partialorder %v3648_v25, inf  ;;  %vm1827_vm12 = vcmp.eq.f32.partialorder %v3648_v25, 0.0 }
 0xe01   :  { %v1763_v43 = vmin.f32 %v1761_v61, %v1762_v36  ;;  %v3639_v31 = vmin.f32 %v1713_v58, %v1714_v3 }
 0xe03   :  { %v1764_v54 = vrot.slane %v1763_v43, 2  ;;  %2603 = vrsqrt.f32 %v3639_v31  ;;  %vm1801_vm3 = vcmp.eq.f32.partialorder %v3639_v31, inf  ;;  %vm1803_vm13 = vcmp.eq.f32.partialorder %v3639_v31, 0.0 }
 0xe05   :  { %1906 = vmin.xlane.f32.xlu2 %v3567_v51  ;;  %v1541_v4 = vpop.permute.xlu1 %1540  ;;  %1916 = vmin.xlane.f32.xlu1 %v1760_v7  ;;  %v1722_v51 = vmin.f32 %v3522_v20, %v1721_v9  ;;  %v1765_v7 = vmin.f32 %v1763_v43, %v1764_v54 }
 0xe06   :  { %v1615_v24 = vsub.f32 %v1541_v4, %v1583_v30  ;;  %v1547_v16 = vpop.permute.xlu2 %1546 }
 0xe07   :  { %v1616_v0 = vsub.f32 %v1547_v16, %v1583_v30  ;;  %v1723_v52 = vrot.slane %v1722_v51, 4 }
 0xe08   :  { %v1671_v2 = vmul.f32 %v1615_v24, %v1615_v24  ;;  %v3652_v24 = vmin.f32 %v1752_v28, %v1753_v42 }
 0xe09   :  { %v1672_v39 = vmul.f32 %v1616_v0, %v1616_v0  ;;  %v1724_v57 = vmin.f32 %v1722_v51, %v1723_v52 }
 0xe0a   :  { %v1699_v41 = vadd.f32 %v1671_v2, %v1643_v46  ;;  %vm1837_vm14 = vcmp.eq.f32.partialorder %v3652_v24, inf  ;;  %vm1839_vm2 = vcmp.eq.f32.partialorder %v3652_v24, 0.0 }
 0xe0b   :  { %v1700_v44 = vadd.f32 %v1672_v39, %v1644_v29  ;;  %v1725_v11 = vrot.slane %v1724_v57, 2 }
 0xe0c   :  { %v1781_v40 = vsel %vm560_vm0, %v1699_v41, inf }
 0xe0d   :  { %1884 = vmin.xlane.f32.xlu2 %v1708_v35  ;;  %1926 = vmin.xlane.f32.xlu0 %v1781_v40  ;;  %v1782_v55 = vsel %vm560_vm0, %v1700_v44, inf  ;;  %v1726_v32 = vmin.f32 %v1724_v57, %v1725_v11  ;;  %v2604_v35 = vpop.eup %2603 }
 0xe0e   :  { %v1783_v17 = vmin.f32 %v1781_v40, %v1782_v55  ;;  %1928 = vmin.xlane.f32.xlu1 %v1782_v55  ;;  %v1795_v39 = vmul.f32 %v2604_v35, %v3639_v31 }
 0xe0f   :  { %v1727_v14 = vrot.slane %v1726_v32, 1 }
 0xe10   :  { %v1796_v40 = vmul.f32 %v2604_v35, %v1795_v39 }
 0xe11   :  { %v3641_v1 = vmin.f32 %v1726_v32, %v1727_v14 }
 0xe12   :  { %v1797_v57 = vmul.f32 0.5, %v1796_v40 }
 0xe13   :  { %2605 = vrsqrt.f32 %v3641_v1  ;;  %vm1815_vm6 = vcmp.eq.f32.partialorder %v3641_v1, 0.0 }
 0xe14   :  { %2607 = vrsqrt.f32 %v3648_v25 }
 0xe15   :  { %1918 = vmin.xlane.f32.xlu2 %v1768_v63  ;;  %v1553_v20 = vpop.permute.xlu1 %1552  ;;  %2609 = vrsqrt.f32 %v3652_v24 }
 0xe16   :  { %v1617_v47 = vsub.f32 %v1553_v20, %v1583_v30  ;;  %v1559_v23 = vpop.permute.xlu2 %1558 }
 0xe17   :  { %v1618_v62 = vsub.f32 %v1559_v23, %v1583_v30  ;;  %v1766_v30 = vrot.slane %v1765_v7, 1 }
 0xe18   :  { %v1673_v5 = vmul.f32 %v1617_v47, %v1617_v47  ;;  %v3635_v63 = vpop.xlane.xlu0 %1890 }
 0xe19   :  { %v1674_v27 = vmul.f32 %v1618_v62, %v1618_v62  ;;  %v3655_v0 = vmin.f32 %v1765_v7, %v1766_v30  ;;  %v2606_v2 = vpop.eup %2605  ;;  %vm2013_vm15 = vcmp.eq.f32.partialorder %v3635_v63, inf  ;;  %vm2015_vm1 = vcmp.eq.f32.partialorder %v3635_v63, 0.0 }
 0xe1a   :  { %v1701_v22 = vadd.f32 %v1673_v5, %v1645_v49  ;;  %v1807_v19 = vmul.f32 %v2606_v2, %v3641_v1  ;;  %v2608_v51 = vpop.eup %2607  ;;  %v1798_v49 = vsub.f32 1.5, %v1797_v57 }
 0xe1b   :  { %v1702_v9 = vadd.f32 %v1674_v27, %v1646_v56  ;;  %2611 = vrsqrt.f32 %v3655_v0  ;;  %v2610_v41 = vpop.eup %2609  ;;  %v1819_v52 = vmul.f32 %v2608_v51, %v3648_v25  ;;  %vm1849_vm10 = vcmp.eq.f32.partialorder %v3655_v0, inf }
 0xe1c   :  { %v1784_v21 = vsel %vm560_vm0, %v1701_v22, inf  ;;  %2613 = vrsqrt.f32 %v3635_v63  ;;  %v1808_v55 = vmul.f32 %v2606_v2, %v1807_v19  ;;  %v1831_v45 = vmul.f32 %v2610_v41, %v3652_v24 }
 0xe1d   :  { %1922 = vmin.xlane.f32.xlu2 %v1771_v48  ;;  %1930 = vmin.xlane.f32.xlu0 %v1784_v21  ;;  %v1785_v59 = vmin.f32 %v1783_v17, %v1784_v21  ;;  %v1786_v12 = vsel %vm560_vm0, %v1702_v9, inf  ;;  %v1775_v48 = vrot.slane %v3614_v8, 4  ;;  %v1820_v26 = vmul.f32 %v2608_v51, %v1819_v52 }
 0xe1e   :  { %1932 = vmin.xlane.f32.xlu1 %v1786_v12  ;;  %v1809_v20 = vmul.f32 0.5, %v1808_v55  ;;  %v1832_v23 = vmul.f32 %v2610_v41, %v1831_v45  ;;  %v1799_v9 = vmul.f32 %v2604_v35, %v1798_v49  ;;  %vm1813_vm0 = vcmp.eq.f32.partialorder %v3641_v1, inf }
 0xe1f   :  { %v1787_v34 = vmin.f32 %v1785_v59, %v1786_v12  ;;  %v1776_v4 = vmin.f32 %v3614_v8, %v1775_v48  ;;  %v1821_v56 = vmul.f32 0.5, %v1820_v26  ;;  %v1804_v19 = vand.u32 2147483648, %v3639_v31 }
 0xe20   :  { %v3643_v61 = vpop.xlane.xlu0 %1878  ;;  %v1810_v5 = vsub.f32 1.5, %v1809_v20  ;;  %v1833_v32 = vmul.f32 0.5, %v1832_v23  ;;  %v1800_v13 = vmul.f32 %v1799_v9, %v3639_v31  ;;  %v1840_v49 = vand.u32 2147483648, %v3652_v24 }
 0xe21   :  { %v1788_v16 = vrot.slane %v1787_v34, 4  ;;  %v1777_v46 = vrot.slane %v1776_v4, 2  ;;  %2615 = vrsqrt.f32 %v3643_v61  ;;  %v2612_v17 = vpop.eup %2611  ;;  %v1822_v21 = vsub.f32 1.5, %v1821_v56 }
 0xe22   :  { %v1843_v11 = vmul.f32 %v2612_v17, %v3655_v0  ;;  %v3673_v47 = vpop.eup %2613  ;;  %v1811_v18 = vmul.f32 %v2606_v2, %v1810_v5  ;;  %v1802_v39 = vsel %vm1801_vm3, %v3639_v31, %v1800_v13  ;;  %vm1851_vm5 = vcmp.eq.f32.partialorder %v3655_v0, 0.0 }
 0xe23   :  { %v1789_v29 = vmin.f32 %v1787_v34, %v1788_v16  ;;  %v1778_v8 = vmin.f32 %v1776_v4, %v1777_v46  ;;  %v2007_v27 = vmul.f32 %v3673_v47, %v3635_v63  ;;  %v1834_v34 = vsub.f32 1.5, %v1833_v32 }
 0xe24   :  { %v1844_v58 = vmul.f32 %v2612_v17, %v1843_v11  ;;  %v1812_v48 = vmul.f32 %v1811_v18, %v3641_v1  ;;  %v1823_v42 = vmul.f32 %v2608_v51, %v1822_v21  ;;  %vm1941_vm7 = vcmp.eq.f32.partialorder %v3643_v61, inf }
 0xe25   :  { %1924 = vmin.xlane.f32.xlu2 %v3611_v50  ;;  %v1790_v44 = vrot.slane %v1789_v29, 2  ;;  %v1779_v6 = vrot.slane %v1778_v8, 1  ;;  %v2008_v37 = vmul.f32 %v3673_v47, %v2007_v27  ;;  %v1835_v46 = vmul.f32 %v2610_v41, %v1834_v34 }
 0xe26   :  { %v1845_v59 = vmul.f32 0.5, %v1844_v58  ;;  %v1824_v51 = vmul.f32 %v1823_v42, %v3648_v25  ;;  %v1816_v41 = vand.u32 2147483648, %v3641_v1  ;;  %vm1943_vm4 = vcmp.eq.f32.partialorder %v3643_v61, 0.0 }
 0xe27   :  { %v1791_v10 = vmin.f32 %v1789_v29, %v1790_v44  ;;  %v3668_v38 = vmin.f32 %v1778_v8, %v1779_v6  ;;  %v3675_v36 = vpop.eup %2615  ;;  %v2009_v16 = vmul.f32 0.5, %v2008_v37  ;;  %v1814_v8 = vsel %vm1813_vm0, %v3641_v1, %v1812_v48 }
 0xe28   :  { %v3658_v50 = vpop.xlane.xlu0 %1898  ;;  %v1935_v60 = vmul.f32 %v3675_v36, %v3643_v61  ;;  %v1846_v30 = vsub.f32 1.5, %v1845_v59  ;;  %v1836_v31 = vmul.f32 %v1835_v46, %v3652_v24  ;;  %v3729_v11 = vsel %vm1815_vm6, %v1816_v41, %v1814_v8 }
 0xe29   :  { %2617 = vrsqrt.f32 %v3658_v50  ;;  %v1792_v62 = vrot.slane %v1791_v10, 1  ;;  %v2010_v52 = vsub.f32 1.5, %v2009_v16  ;;  %v1826_v1 = vsel %vm1825_vm8, %v3648_v25, %v1824_v51 }
 0xe2a   :  { %2619 = vrsqrt.f32 %v3668_v38  ;;  %v1936_v14 = vmul.f32 %v3675_v36, %v1935_v60  ;;  %v1847_v6 = vmul.f32 %v2612_v17, %v1846_v30  ;;  %v1828_v17 = vand.u32 2147483648, %v3648_v25 }
 0xe2b   :  { %v3685_v22 = vmin.f32 %v1791_v10, %v1792_v62  ;;  %v3723_v10 = vsel %vm1803_vm13, %v1804_v19, %v1802_v39  ;;  %v2011_v58 = vmul.f32 %v3673_v47, %v2010_v52  ;;  %v1838_v32 = vsel %vm1837_vm14, %v3652_v24, %v1836_v31 }
 0xe2c   :  { %v1937_v35 = vmul.f32 0.5, %v1936_v14  ;;  %v1848_v5 = vmul.f32 %v1847_v6, %v3655_v0  ;;  %v3751_v18 = vsel %vm1827_vm12, %v1828_v17, %v1826_v1  ;;  %v1852_v30 = vand.u32 2147483648, %v3655_v0 }
 0xe2d   :  { %v2012_v14 = vmul.f32 %v2011_v58, %v3635_v63  ;;  %vm2061_vm11 = vcmp.eq.f32.partialorder %v3658_v50, inf  ;;  %v1944_v6 = vand.u32 2147483648, %v3643_v61  ;;  %vm2063_vm3 = vcmp.eq.f32.partialorder %v3658_v50, 0.0 }
 0xe2e   :  { %v1938_v45 = vsub.f32 1.5, %v1937_v35  ;;  %v1850_v59 = vsel %vm1849_vm10, %v3655_v0, %v1848_v5  ;;  %v2016_v35 = vand.u32 2147483648, %v3635_v63 }
 0xe2f   :  { %v3677_v53 = vpop.eup %2617  ;;  %v3780_v46 = vsel %vm1851_vm5, %v1852_v30, %v1850_v59  ;;  %v3834_v59 = vadd.s32 4294967288, %v2995_v33 }
 0xe30   :  { %v3670_v15 = vpop.xlane.xlu0 %1882  ;;  %v2055_v43 = vmul.f32 %v3677_v53, %v3658_v50  ;;  %v3691_v12 = vpop.eup %2619  ;;  %v1939_v27 = vmul.f32 %v3675_v36, %v1938_v45  ;;  %v3757_v36 = vadd.s32 4294967280, %v2995_v33 }
 0xe31   :  { %2621 = vrsqrt.f32 %v3670_v15  ;;  %v1855_v4 = vmul.f32 %v3691_v12, %v3668_v38  ;;  %vm1965_vm0 = vcmp.eq.f32.partialorder %v3670_v15, inf  ;;  %vm1967_vm13 = vcmp.eq.f32.partialorder %v3670_v15, 0.0 }
 0xe32   :  { %v2056_v28 = vmul.f32 %v3677_v53, %v2055_v43  ;;  %2623 = vrsqrt.f32 %v3685_v22  ;;  %v1940_v34 = vmul.f32 %v1939_v27, %v3643_v61  ;;  %v1968_v27 = vand.u32 2147483648, %v3670_v15 }
 0xe33   :  { %v1856_v55 = vmul.f32 %v3691_v12, %v1855_v4 }
 0xe34   :  { %v2057_v2 = vmul.f32 0.5, %v2056_v28  ;;  %v1942_v39 = vsel %vm1941_vm7, %v3643_v61, %v1940_v34 }
 0xe35   :  { %v1857_v56 = vmul.f32 0.5, %v1856_v55 }
 0xe36   :  { %v2058_v20 = vsub.f32 1.5, %v2057_v2 }
 0xe37   :  { %v3700_v7 = vpop.eup %2621  ;;  %v1858_v37 = vsub.f32 1.5, %v1857_v56 }
 0xe38   :  { %v3695_v54 = vpop.xlane.xlu0 %1910  ;;  %v1959_v29 = vmul.f32 %v3700_v7, %v3670_v15  ;;  %v3716_v44 = vpop.eup %2623  ;;  %v2059_v25 = vmul.f32 %v3677_v53, %v2058_v20  ;;  %v3761_v53 = vsel %vm1839_vm2, %v1840_v49, %v1838_v32 }
 0xe39   :  { %2625 = vrsqrt.f32 %v3695_v54  ;;  %v1867_v62 = vmul.f32 %v3716_v44, %v3685_v22  ;;  %v3783_v2 = vmul.f32 %v3691_v12, %v1858_v37  ;;  %v2064_v12 = vand.u32 2147483648, %v3658_v50 }
 0xe3a   :  { %v1960_v26 = vmul.f32 %v3700_v7, %v1959_v29  ;;  %v2060_v28 = vmul.f32 %v2059_v25, %v3658_v50  ;;  %v2014_v29 = vsel %vm2013_vm15, %v3635_v63, %v2012_v14  ;;  %vm2133_vm6 = vcmp.eq.f32.partialorder %v3695_v54, inf }
 0xe3b   :  { %v1868_v47 = vmul.f32 %v3716_v44, %v1867_v62  ;;  %v3797_v45 = vsel %vm2015_vm1, %v2016_v35, %v2014_v29  ;;  %vm2135_vm8 = vcmp.eq.f32.partialorder %v3695_v54, 0.0  ;;  %vm2301_vm15 = vcmask 130112  }
 0xe3c   :  { %v1961_v43 = vmul.f32 0.5, %v1960_v26  ;;  %v2062_v0 = vsel %vm2061_vm11, %v3658_v50, %v2060_v28  ;;  %v3806_v26 = vsel %vm1943_vm4, %v1944_v6, %v1942_v39  ;;  %v2314_v61 = vperm.slane %v3797_v45, %v3757_v36 }
 0xe3d   :  { %v1869_v4 = vmul.f32 0.5, %v1868_v47  ;;  %v3808_v1 = vsel %vm2063_vm3, %v2064_v12, %v2062_v0  ;;  %v2298_v58 = vperm.slane %v3806_v26, %v2995_v33  ;;  %vm2305_vm4 = vcmask 195712  }
 0xe3e   :  { %v1962_v13 = vsub.f32 1.5, %v1961_v43  ;;  %v2321_v25 = vperm.slane %v3808_v1, %v3757_v36 }
 0xe3f   :  { %v3726_v57 = vpop.eup %2625  ;;  %v1870_v52 = vsub.f32 1.5, %v1869_v4 }
 0xe40   :  { %v3689_v3 = vpop.xlane.xlu1 %1886  ;;  %v2127_v60 = vmul.f32 %v3726_v57, %v3695_v54  ;;  %v1963_v8 = vmul.f32 %v3700_v7, %v1962_v13 }
 0xe41   :  { %2627 = vrsqrt.f32 %v3689_v3  ;;  %v1871_v5 = vmul.f32 %v3716_v44, %v1870_v52  ;;  %v2136_v44 = vand.u32 2147483648, %v3695_v54  ;;  %vm1989_vm12 = vcmp.eq.f32.partialorder %v3689_v3, inf }
 0xe42   :  { %v2128_v24 = vmul.f32 %v3726_v57, %v2127_v60  ;;  %v1964_v63 = vmul.f32 %v1963_v8, %v3670_v15  ;;  %vm1991_vm14 = vcmp.eq.f32.partialorder %v3689_v3, 0.0 }
 0xe44   :  { %v2129_v19 = vmul.f32 0.5, %v2128_v24 }
 0xe46   :  { %v2130_v17 = vsub.f32 1.5, %v2129_v19 }
 0xe47   :  { %v3732_v23 = vpop.eup %2627 }
 0xe48   :  { %v3718_v40 = vpop.xlane.xlu1 %1894  ;;  %v1983_v9 = vmul.f32 %v3732_v23, %v3689_v3  ;;  %v2131_v43 = vmul.f32 %v3726_v57, %v2130_v17  ;;  %v3840_v57 = vmul.f32 %v1871_v5, %v3685_v22 }
 0xe49   :  { %2629 = vrsqrt.f32 %v3718_v40  ;;  %vm2037_vm1 = vcmp.eq.f32.partialorder %v3718_v40, inf  ;;  %vm2039_vm5 = vcmp.eq.f32.partialorder %v3718_v40, 0.0 }
 0xe4a   :  { %v1984_v48 = vmul.f32 %v3732_v23, %v1983_v9  ;;  %v1966_v9 = vsel %vm1965_vm0, %v3670_v15, %v1964_v63  ;;  %v2132_v35 = vmul.f32 %v2131_v43, %v3695_v54 }
 0xe4b   :  { %v3854_v4 = vsel %vm1967_vm13, %v1968_v27, %v1966_v9  ;;  %v3884_v27 = vadd.s32 4294967272, %v2995_v33 }
 0xe4c   :  { %v1985_v51 = vmul.f32 0.5, %v1984_v48  ;;  %v2304_v52 = vperm.slane %v3854_v4, %v3757_v36  ;;  %v2134_v17 = vsel %vm2133_vm6, %v3695_v54, %v2132_v35 }
 0xe4e   :  { %v1986_v62 = vsub.f32 1.5, %v1985_v51 }
 0xe4f   :  { %v3776_v16 = vpop.eup %2629 }
 0xe50   :  { %v3759_v21 = vpop.xlane.xlu1 %1880  ;;  %v2031_v55 = vmul.f32 %v3776_v16, %v3718_v40  ;;  %v1987_v47 = vmul.f32 %v3732_v23, %v1986_v62 }
 0xe51   :  { %2631 = vrsqrt.f32 %v3759_v21  ;;  %v3770_v42 = vpop.xlane.xlu0 %1908  ;;  %vm1953_vm2 = vcmp.eq.f32.partialorder %v3759_v21, inf  ;;  %v1956_v51 = vand.u32 2147483648, %v3759_v21  ;;  %vm1955_vm10 = vcmp.eq.f32.partialorder %v3759_v21, 0.0 }
 0xe52   :  { %2633 = vrsqrt.f32 %v3770_v42  ;;  %v2032_v50 = vmul.f32 %v3776_v16, %v2031_v55  ;;  %v1988_v39 = vmul.f32 %v1987_v47, %v3689_v3  ;;  %vm2121_vm3 = vcmp.eq.f32.partialorder %v3770_v42, inf }
 0xe53   :  { %vm2123_vm13 = vcmp.eq.f32.partialorder %v3770_v42, 0.0 }
 0xe54   :  { %v2033_v34 = vmul.f32 0.5, %v2032_v50  ;;  %v1990_v63 = vsel %vm1989_vm12, %v3689_v3, %v1988_v39 }
 0xe56   :  { %v2034_v8 = vsub.f32 1.5, %v2033_v34 }
 0xe57   :  { %v2632_v41 = vpop.eup %2631 }
 0xe58   :  { %v1947_v7 = vmul.f32 %v2632_v41, %v3759_v21  ;;  %v3802_v31 = vpop.xlane.xlu2 %1888  ;;  %v3804_v20 = vpop.xlane.xlu1 %1902  ;;  %v2035_v50 = vmul.f32 %v3776_v16, %v2034_v8 }
 0xe59   :  { %2635 = vrsqrt.f32 %v3802_v31  ;;  %v3818_v56 = vpop.eup %2633  ;;  %v3824_v32 = vpop.xlane.xlu0 %1920  ;;  %vm2001_vm7 = vcmp.eq.f32.partialorder %v3802_v31, inf  ;;  %vm2003_vm11 = vcmp.eq.f32.partialorder %v3802_v31, 0.0  ;;  %vm2085_vm0 = vcmp.eq.f32.partialorder %v3804_v20, inf }
 0xe5a   :  { %v1948_v49 = vmul.f32 %v2632_v41, %v1947_v7  ;;  %2637 = vrsqrt.f32 %v3804_v20  ;;  %v2115_v24 = vmul.f32 %v3818_v56, %v3770_v42 }
 0xe5b   :  { %2639 = vrsqrt.f32 %v3824_v32 }
 0xe5c   :  { %v1949_v60 = vmul.f32 0.5, %v1948_v49  ;;  %v2116_v15 = vmul.f32 %v3818_v56, %v2115_v24  ;;  %v3898_v24 = vsel %vm2135_vm8, %v2136_v44, %v2134_v17  ;;  %v2004_v44 = vand.u32 2147483648, %v3802_v31 }
 0xe5d   :  { %v2332_v8 = vperm.slane %v3898_v24, %v2995_v33  ;;  %vm2087_vm8 = vcmp.eq.f32.partialorder %v3804_v20, 0.0 }
 0xe5e   :  { %v1950_v37 = vsub.f32 1.5, %v1949_v60  ;;  %v2117_v5 = vmul.f32 0.5, %v2116_v15 }
 0xe5f   :  { %v2636_v14 = vpop.eup %2635 }
 0xe60   :  { %v3842_v28 = vpop.eup %2637  ;;  %v1951_v23 = vmul.f32 %v2632_v41, %v1950_v37  ;;  %v1995_v13 = vmul.f32 %v2636_v14, %v3802_v31  ;;  %v3848_v48 = vpop.xlane.xlu2 %1896  ;;  %v1992_v41 = vand.u32 2147483648, %v3689_v3  ;;  %v2118_v54 = vsub.f32 1.5, %v2117_v5 }
 0xe61   :  { %v3850_v30 = vpop.xlane.xlu1 %1900  ;;  %v2079_v29 = vmul.f32 %v3842_v28, %v3804_v20  ;;  %2641 = vrsqrt.f32 %v3848_v48  ;;  %v3869_v55 = vpop.eup %2639  ;;  %vm2049_vm6 = vcmp.eq.f32.partialorder %v3848_v48, inf  ;;  %vm2051_vm12 = vcmp.eq.f32.partialorder %v3848_v48, 0.0 }
 0xe62   :  { %v1952_v19 = vmul.f32 %v1951_v23, %v3759_v21  ;;  %v1996_v0 = vmul.f32 %v2636_v14, %v1995_v13  ;;  %2643 = vrsqrt.f32 %v3850_v30  ;;  %v2187_v43 = vmul.f32 %v3869_v55, %v3824_v32 }
 0xe63   :  { %v2080_v26 = vmul.f32 %v3842_v28, %v2079_v29  ;;  %v2036_v29 = vmul.f32 %v2035_v50, %v3718_v40 }
 0xe64   :  { %v1954_v6 = vsel %vm1953_vm2, %v3759_v21, %v1952_v19  ;;  %v1997_v12 = vmul.f32 0.5, %v1996_v0  ;;  %v2188_v39 = vmul.f32 %v3869_v55, %v2187_v43  ;;  %vm2073_vm2 = vcmp.eq.f32.partialorder %v3850_v30, inf }
 0xe65   :  { %v1957_v7 = vsel %vm1955_vm10, %v1956_v51, %v1954_v6  ;;  %v2081_v23 = vmul.f32 0.5, %v2080_v26  ;;  %v2040_v51 = vand.u32 2147483648, %v3718_v40  ;;  %v2038_v17 = vsel %vm2037_vm1, %v3718_v40, %v2036_v29 }
 0xe66   :  { %v2300_v21 = vperm.slane %v1957_v7, %v3834_v59  ;;  %v1998_v62 = vsub.f32 1.5, %v1997_v12  ;;  %v2052_v29 = vand.u32 2147483648, %v3848_v48  ;;  %vm2075_vm10 = vcmp.eq.f32.partialorder %v3850_v30, 0.0 }
 0xe67   :  { %v2642_v49 = vpop.eup %2641  ;;  %v2082_v15 = vsub.f32 1.5, %v2081_v23  ;;  %v2041_v23 = vsel %vm2039_vm5, %v2040_v51, %v2038_v17  ;;  %v2196_v17 = vand.u32 2147483648, %v3824_v32  ;;  %vm2309_vm5 = vcmask 261312  }
 0xe68   :  { %v1999_v60 = vmul.f32 %v2636_v14, %v1998_v62  ;;  %v2043_v9 = vmul.f32 %v2642_v49, %v3848_v48  ;;  %v3889_v47 = vpop.xlane.xlu2 %1892  ;;  %v3894_v34 = vsel %vm2301_vm15, %v2300_v21, %v2298_v58  ;;  %v2644_v16 = vpop.eup %2643  ;;  %v1993_v14 = vsel %vm1991_vm14, %v1992_v41, %v1990_v63 }
 0xe69   :  { %v3891_v37 = vpop.xlane.xlu1 %1912  ;;  %2645 = vrsqrt.f32 %v3889_v47  ;;  %v2067_v58 = vmul.f32 %v2644_v16, %v3850_v30  ;;  %v2311_v26 = vperm.slane %v1993_v14, %v2995_v33  ;;  %v2119_v63 = vmul.f32 %v3818_v56, %v2118_v54 }
 0xe6a   :  { %v2000_v13 = vmul.f32 %v1999_v60, %v3802_v31  ;;  %v2044_v35 = vmul.f32 %v2642_v49, %v2043_v9  ;;  %2647 = vrsqrt.f32 %v3891_v37  ;;  %v2124_v21 = vand.u32 2147483648, %v3770_v42 }
 0xe6b   :  { %v2068_v0 = vmul.f32 %v2644_v16, %v2067_v58  ;;  %v2083_v14 = vmul.f32 %v3842_v28, %v2082_v15  ;;  %v2120_v58 = vmul.f32 %v2119_v63, %v3770_v42  ;;  %vm2193_vm14 = vcmp.eq.f32.partialorder %v3824_v32, inf }
 0xe6c   :  { %v2002_v3 = vsel %vm2001_vm7, %v3802_v31, %v2000_v13  ;;  %v2045_v19 = vmul.f32 0.5, %v2044_v35  ;;  %v2189_v31 = vmul.f32 0.5, %v2188_v39  ;;  %vm2025_vm1 = vcmp.eq.f32.partialorder %v3889_v47, inf }
 0xe6d   :  { %v2005_v41 = vsel %vm2003_vm11, %v2004_v44, %v2002_v3  ;;  %v2069_v12 = vmul.f32 0.5, %v2068_v0  ;;  %v2084_v3 = vmul.f32 %v2083_v14, %v3804_v20  ;;  %v2088_v0 = vand.u32 2147483648, %v3804_v20 }
 0xe6e   :  { %v2046_v6 = vsub.f32 1.5, %v2045_v19  ;;  %v2312_v9 = vperm.slane %v2005_v41, %v3834_v59  ;;  %v2190_v28 = vsub.f32 1.5, %v2189_v31  ;;  %vm2027_vm7 = vcmp.eq.f32.partialorder %v3889_v47, 0.0 }
 0xe6f   :  { %v2646_v7 = vpop.eup %2645  ;;  %v2070_v56 = vsub.f32 1.5, %v2069_v12  ;;  %v2318_v12 = vperm.slane %v2041_v23, %v2995_v33  ;;  %v2086_v45 = vsel %vm2085_vm0, %v3804_v20, %v2084_v3  ;;  %vm2145_vm11 = vcmp.eq.f32.partialorder %v3891_v37, inf }
 0xe70   :  { %v2047_v62 = vmul.f32 %v2642_v49, %v2046_v6  ;;  %v2019_v50 = vmul.f32 %v2646_v7, %v3889_v47  ;;  %v3925_v5 = vpop.xlane.xlu2 %1904  ;;  %v2648_v43 = vpop.eup %2647  ;;  %v2313_v19 = vsel %vm2301_vm15, %v2312_v9, %v2311_v26  ;;  %v2191_v26 = vmul.f32 %v3869_v55, %v2190_v28 }
 0xe71   :  { %v3927_v60 = vpop.xlane.xlu1 %1914  ;;  %2649 = vrsqrt.f32 %v3925_v5  ;;  %v2139_v35 = vmul.f32 %v2648_v43, %v3891_v37  ;;  %v2071_v39 = vmul.f32 %v2644_v16, %v2070_v56  ;;  %v2122_v16 = vsel %vm2121_vm3, %v3770_v42, %v2120_v58 }
 0xe72   :  { %v2048_v49 = vmul.f32 %v2047_v62, %v3848_v48  ;;  %v2020_v13 = vmul.f32 %v2646_v7, %v2019_v50  ;;  %2651 = vrsqrt.f32 %v3927_v60  ;;  %vm2147_vm3 = vcmp.eq.f32.partialorder %v3891_v37, 0.0 }
 0xe73   :  { %v2140_v44 = vmul.f32 %v2648_v43, %v2139_v35  ;;  %v2072_v14 = vmul.f32 %v2071_v39, %v3850_v30  ;;  %vm2097_vm0 = vcmp.eq.f32.partialorder %v3925_v5, inf }
 0xe74   :  { %v2050_v40 = vsel %vm2049_vm6, %v3848_v48, %v2048_v49  ;;  %v2021_v54 = vmul.f32 0.5, %v2020_v13  ;;  %v3954_v48 = vsel %vm2305_vm4, %v2314_v61, %v2313_v19  ;;  %v3975_v49 = vsel %vm2123_vm13, %v2124_v21, %v2122_v16 }
 0xe75   :  { %v2053_v51 = vsel %vm2051_vm12, %v2052_v29, %v2050_v40  ;;  %v2141_v41 = vmul.f32 0.5, %v2140_v44  ;;  %v2192_v13 = vmul.f32 %v2191_v26, %v3824_v32  ;;  %v3984_v29 = vsel %vm2087_vm8, %v2088_v0, %v2086_v45 }
 0xe76   :  { %v2022_v15 = vsub.f32 1.5, %v2021_v54  ;;  %v2319_v61 = vperm.slane %v2053_v51, %v3834_v59  ;;  %v2028_v21 = vand.u32 2147483648, %v3889_v47  ;;  %v2074_v40 = vsel %vm2073_vm2, %v3850_v30, %v2072_v14 }
 0xe77   :  { %v2650_v6 = vpop.eup %2649  ;;  %v2076_v19 = vand.u32 2147483648, %v3850_v30  ;;  %v2330_v20 = vperm.slane %v3975_v49, %v3884_v27  ;;  %v2325_v0 = vperm.slane %v3984_v29, %v2995_v33  ;;  %v4000_v51 = vsel %vm2193_vm14, %v3824_v32, %v2192_v13 }
 0xe78   :  { %v2023_v63 = vmul.f32 %v2646_v7, %v2022_v15  ;;  %v2091_v31 = vmul.f32 %v2650_v6, %v3925_v5  ;;  %v3961_v62 = vpop.xlane.xlu2 %1906  ;;  %v2652_v9 = vpop.eup %2651  ;;  %v2142_v7 = vsub.f32 1.5, %v2141_v41  ;;  %v2320_v28 = vsel %vm2301_vm15, %v2319_v61, %v2318_v12 }
 0xe79   :  { %v3963_v50 = vpop.xlane.xlu1 %1916  ;;  %2653 = vrsqrt.f32 %v3961_v62  ;;  %v2151_v23 = vmul.f32 %v2652_v9, %v3927_v60  ;;  %v2077_v16 = vsel %vm2075_vm10, %v2076_v19, %v2074_v40  ;;  %v2148_v45 = vand.u32 2147483648, %v3891_v37 }
 0xe7a   :  { %v2024_v55 = vmul.f32 %v2023_v63, %v3889_v47  ;;  %v2092_v56 = vmul.f32 %v2650_v6, %v2091_v31  ;;  %2655 = vrsqrt.f32 %v3963_v50  ;;  %v2143_v54 = vmul.f32 %v2648_v43, %v2142_v7 }
 0xe7b   :  { %v2152_v58 = vmul.f32 %v2652_v9, %v2151_v23  ;;  %v4024_v30 = vsel %vm2305_vm4, %v2304_v52, %v3894_v34  ;;  %vm2099_vm13 = vcmp.eq.f32.partialorder %v3925_v5, 0.0  ;;  %v2322_v4 = vsel %vm2305_vm4, %v2321_v25, %v2320_v28 }
 0xe7c   :  { %v2093_v35 = vmul.f32 0.5, %v2092_v56  ;;  %v2026_v42 = vsel %vm2025_vm1, %v3889_v47, %v2024_v55  ;;  %v2144_v31 = vmul.f32 %v2143_v54, %v3891_v37  ;;  %v2100_v56 = vand.u32 2147483648, %v3925_v5 }
 0xe7d   :  { %v2153_v3 = vmul.f32 0.5, %v2152_v58  ;;  %v2029_v43 = vsel %vm2027_vm7, %v2028_v21, %v2026_v42  ;;  %vm2157_vm6 = vcmp.eq.f32.partialorder %v3927_v60, inf  ;;  %v2160_v40 = vand.u32 2147483648, %v3927_v60 }
 0xe7e   :  { %v2094_v44 = vsub.f32 1.5, %v2093_v35  ;;  %v2316_v7 = vperm.slane %v2029_v43, %v3884_v27  ;;  %v2146_v52 = vsel %vm2145_vm11, %v3891_v37, %v2144_v31  ;;  %vm2109_vm8 = vcmp.eq.f32.partialorder %v3961_v62, inf }
 0xe7f   :  { %v2654_v39 = vpop.eup %2653  ;;  %v2154_v63 = vsub.f32 1.5, %v2153_v3  ;;  %vm2111_vm12 = vcmp.eq.f32.partialorder %v3961_v62, 0.0  ;;  %vm2159_vm14 = vcmp.eq.f32.partialorder %v3927_v60, 0.0  ;;  %v4051_v19 = vsel %vm2147_vm3, %v2148_v45, %v2146_v52 }
 0xe80   :  { %v2103_v15 = vmul.f32 %v2654_v39, %v3961_v62  ;;  %v4004_v41 = vpop.xlane.xlu2 %1884  ;;  %v4006_v47 = vpop.xlane.xlu0 %1926  ;;  %v2095_v26 = vmul.f32 %v2650_v6, %v2094_v44  ;;  %v2323_v6 = vperm.slane %v2077_v16, %v3884_v27  ;;  %v2317_v1 = vsel %vm2309_vm5, %v2316_v7, %v3954_v48 }
 0xe81   :  { %v2656_v12 = vpop.eup %2655  ;;  %2657 = vrsqrt.f32 %v4004_v41  ;;  %v4014_v55 = vpop.xlane.xlu1 %1928  ;;  %v2155_v58 = vmul.f32 %v2652_v9, %v2154_v63  ;;  %v2112_v31 = vand.u32 2147483648, %v3961_v62  ;;  %vm2169_vm2 = vcmp.eq.f32.partialorder %v3963_v50, inf }
 0xe82   :  { %v2104_v61 = vmul.f32 %v2654_v39, %v2103_v15  ;;  %v2163_v14 = vmul.f32 %v2656_v12, %v3963_v50  ;;  %2659 = vrsqrt.f32 %v4006_v47  ;;  %v2096_v35 = vmul.f32 %v2095_v26, %v3925_v5 }
 0xe83   :  { %2661 = vrsqrt.f32 %v4014_v55  ;;  %v2324_v44 = vsel %vm2309_vm5, %v2323_v6, %v2322_v4  ;;  %v2156_v48 = vmul.f32 %v2155_v58, %v3927_v60  ;;  %v4063_v37 = vadd.f32 %v2317_v1, %v3729_v11 }
 0xe84   :  { %v2105_v23 = vmul.f32 0.5, %v2104_v61  ;;  %v2164_v13 = vmul.f32 %v2656_v12, %v2163_v14  ;;  %v2098_v43 = vsel %vm2097_vm0, %v3925_v5, %v2096_v35  ;;  %v4066_v45 = vadd.f32 %v2324_v44, %v3751_v18 }
 0xe85   :  { %vm2171_vm10 = vcmp.eq.f32.partialorder %v3963_v50, 0.0  ;;  %v2172_v61 = vand.u32 2147483648, %v3963_v50  ;;  %v2333_v7 = vperm.slane %v4051_v19, %v3834_v59  ;;  %v2101_v6 = vsel %vm2099_vm13, %v2100_v56, %v2098_v43 }
 0xe86   :  { %v2106_v34 = vsub.f32 1.5, %v2105_v23  ;;  %v2165_v42 = vmul.f32 0.5, %v2164_v13  ;;  %v2158_v18 = vsel %vm2157_vm6, %v3927_v60, %v2156_v48  ;;  %vm1977_vm1 = vcmp.eq.f32.partialorder %v4004_v41, inf }
 0xe87   :  { %v2658_v21 = vpop.eup %2657  ;;  %vm1979_vm7 = vcmp.eq.f32.partialorder %v4004_v41, 0.0  ;;  %v1980_v5 = vand.u32 2147483648, %v4004_v41  ;;  %v2161_v44 = vsel %vm2159_vm14, %v2160_v40, %v2158_v18  ;;  %vm2229_vm11 = vcmp.eq.f32.partialorder %v4006_v47, inf }
 0xe88   :  { %v2107_v25 = vmul.f32 %v2654_v39, %v2106_v34  ;;  %v2166_v9 = vsub.f32 1.5, %v2165_v42  ;;  %v1971_v28 = vmul.f32 %v2658_v21, %v4004_v41  ;;  %v4046_v54 = vpop.xlane.xlu2 %1918  ;;  %v2660_v3 = vpop.eup %2659  ;;  %vm2231_vm3 = vcmp.eq.f32.partialorder %v4006_v47, 0.0 }
 0xe89   :  { %2663 = vrsqrt.f32 %v4046_v54  ;;  %v2223_v26 = vmul.f32 %v2660_v3, %v4006_v47  ;;  %v2662_v63 = vpop.eup %2661  ;;  %v2232_v40 = vand.u32 2147483648, %v4006_v47  ;;  %vm2241_vm0 = vcmp.eq.f32.partialorder %v4014_v55, inf }
 0xe8a   :  { %v2108_v39 = vmul.f32 %v2107_v25, %v3961_v62  ;;  %v2167_v15 = vmul.f32 %v2656_v12, %v2166_v9  ;;  %v1972_v16 = vmul.f32 %v2658_v21, %v1971_v28  ;;  %v2235_v23 = vmul.f32 %v2662_v63, %v4014_v55 }
 0xe8b   :  { %v2224_v12 = vmul.f32 %v2660_v3, %v2223_v26  ;;  %v2326_v28 = vperm.slane %v2101_v6, %v3834_v59  ;;  %vm2243_vm13 = vcmp.eq.f32.partialorder %v4014_v55, 0.0  ;;  %v2334_v29 = vsel %vm2301_vm15, %v2333_v7, %v2332_v8 }
 0xe8c   :  { %v1973_v14 = vmul.f32 0.5, %v1972_v16  ;;  %v2110_v11 = vsel %vm2109_vm8, %v3961_v62, %v2108_v39  ;;  %v2168_v13 = vmul.f32 %v2167_v15, %v3963_v50  ;;  %v2236_v56 = vmul.f32 %v2662_v63, %v2235_v23 }
 0xe8d   :  { %v2225_v58 = vmul.f32 0.5, %v2224_v12  ;;  %v2113_v52 = vsel %vm2111_vm12, %v2112_v31, %v2110_v11  ;;  %v2327_v23 = vsel %vm2301_vm15, %v2326_v28, %v2325_v0  ;;  %vm2181_vm6 = vcmp.eq.f32.partialorder %v4046_v54, inf }
 0xe8e   :  { %v1974_v35 = vsub.f32 1.5, %v1973_v14  ;;  %v2237_v19 = vmul.f32 0.5, %v2236_v56  ;;  %v2170_v62 = vsel %vm2169_vm2, %v3963_v50, %v2168_v13  ;;  %v2328_v15 = vperm.slane %v2113_v52, %v3757_v36 }
 0xe8f   :  { %v2664_v4 = vpop.eup %2663  ;;  %v2226_v42 = vsub.f32 1.5, %v2225_v58  ;;  %v2173_v12 = vsel %vm2171_vm10, %v2172_v61, %v2170_v62  ;;  %vm2375_vm8 = vcmask 1041409   ;;  %vm2183_vm2 = vcmp.eq.f32.partialorder %v4046_v54, 0.0 }
 0xe90   :  { %v1975_v34 = vmul.f32 %v2658_v21, %v1974_v35  ;;  %v2175_v1 = vmul.f32 %v2664_v4, %v4046_v54  ;;  %v4088_v25 = vpop.xlane.xlu2 %1922  ;;  %v4090_v9 = vpop.xlane.xlu0 %1930  ;;  %v2238_v16 = vsub.f32 1.5, %v2237_v19  ;;  %v2184_v35 = vand.u32 2147483648, %v4046_v54 }
 0xe91   :  { %2665 = vrsqrt.f32 %v4088_v25  ;;  %v2227_v43 = vmul.f32 %v2660_v3, %v2226_v42  ;;  %v4100_v39 = vpop.xlane.xlu1 %1932  ;;  %v2335_v3 = vperm.slane %v2161_v44, %v3757_v36  ;;  %v2329_v58 = vsel %vm2305_vm4, %v2328_v15, %v2327_v23 }
 0xe92   :  { %v1976_v21 = vmul.f32 %v1975_v34, %v4004_v41  ;;  %v2176_v48 = vmul.f32 %v2664_v4, %v2175_v1  ;;  %2667 = vrsqrt.f32 %v4090_v9  ;;  %v2239_v11 = vmul.f32 %v2662_v63, %v2238_v16 }
 0xe93   :  { %v2228_v14 = vmul.f32 %v2227_v43, %v4006_v47  ;;  %2669 = vrsqrt.f32 %v4100_v39  ;;  %v2337_v0 = vperm.slane %v2173_v12, %v3884_v27  ;;  %v2336_v52 = vsel %vm2305_vm4, %v2335_v3, %v2334_v29 }
 0xe94   :  { %v1978_v60 = vsel %vm1977_vm1, %v4004_v41, %v1976_v21  ;;  %v2177_v26 = vmul.f32 0.5, %v2176_v48  ;;  %v2244_v41 = vand.u32 2147483648, %v4014_v55  ;;  %v2374_v34 = vrot.slane %v4063_v37, 7 }
 0xe95   :  { %v1981_v31 = vsel %vm1979_vm7, %v1980_v5, %v1978_v60  ;;  %v2230_v56 = vsel %vm2229_vm11, %v4006_v47, %v2228_v14  ;;  %v2331_v8 = vsel %vm2309_vm5, %v2330_v20, %v2329_v58  ;;  %v2377_v44 = vrot.slane %v4066_v45, 6 }
 0xe96   :  { %v2308_v6 = vperm.slane %v1981_v31, %v3884_v27  ;;  %v2178_v13 = vsub.f32 1.5, %v2177_v26  ;;  %vm2205_vm12 = vcmp.eq.f32.partialorder %v4088_v25, inf  ;;  %v2338_v21 = vsel %vm2309_vm5, %v2337_v0, %v2336_v52 }
 0xe97   :  { %v2666_v18 = vpop.eup %2665  ;;  %v2208_v49 = vand.u32 2147483648, %v4088_v25  ;;  %vm2253_vm14 = vcmp.eq.f32.partialorder %v4090_v9, inf  ;;  %v2233_v20 = vsel %vm2231_vm3, %v2232_v40, %v2230_v56  ;;  %vm2255_vm10 = vcmp.eq.f32.partialorder %v4090_v9, 0.0 }
 0xe98   :  { %v2199_v50 = vmul.f32 %v2666_v18, %v4088_v25  ;;  %v4128_v63 = vpop.xlane.xlu2 %1924  ;;  %v2310_v61 = vsel %vm2309_vm5, %v2308_v6, %v4024_v30  ;;  %v2668_v5 = vpop.eup %2667  ;;  %v2240_v30 = vmul.f32 %v2239_v11, %v4014_v55  ;;  %v2179_v1 = vmul.f32 %v2664_v4, %v2178_v13 }
 0xe99   :  { %2671 = vrsqrt.f32 %v4128_v63  ;;  %v2247_v24 = vmul.f32 %v2668_v5, %v4090_v9  ;;  %v2670_v7 = vpop.eup %2669  ;;  %v2360_v28 = vadd.f32 %v2310_v61, %v3723_v10  ;;  %v2363_v10 = vadd.f32 %v2331_v8, %v3761_v53 }
 0xe9a   :  { %v2200_v42 = vmul.f32 %v2666_v18, %v2199_v50  ;;  %v2259_v62 = vmul.f32 %v2670_v7, %v4100_v39  ;;  %v2242_v45 = vsel %vm2241_vm0, %v4014_v55, %v2240_v30  ;;  %v2180_v16 = vmul.f32 %v2179_v1, %v4046_v54 }
 0xe9b   :  { %v2248_v19 = vmul.f32 %v2668_v5, %v2247_v24  ;;  %vm2207_vm1 = vcmp.eq.f32.partialorder %v4088_v25, 0.0  ;;  %v2364_v47 = vadd.f32 %v2338_v21, %v3780_v46  ;;  %v2376_v53 = vsel %vm2375_vm8, %v2374_v34, %v2360_v28 }
 0xe9c   :  { %v2201_v37 = vmul.f32 0.5, %v2200_v42  ;;  %v2260_v48 = vmul.f32 %v2670_v7, %v2259_v62  ;;  %vm2378_vm7 = vcmask 1042434   ;;  %vm2195_vm11 = vcmp.eq.f32.partialorder %v3824_v32, 0.0 }
 0xe9d   :  { %v2249_v43 = vmul.f32 0.5, %v2248_v19  ;;  %v2245_v31 = vsel %vm2243_vm13, %v2244_v41, %v2242_v45  ;;  %v2379_v14 = vsel %vm2378_vm7, %v2377_v44, %v2376_v53  ;;  %v2380_v12 = vrot.slane %v2363_v10, 5 }
 0xe9e   :  { %v2202_v4 = vsub.f32 1.5, %v2201_v37  ;;  %v2261_v26 = vmul.f32 0.5, %v2260_v48  ;;  %vm2381_vm3 = vcmask 1043459   ;;  %v2256_v13 = vand.u32 2147483648, %v4090_v9 }
 0xe9f   :  { %v2672_v15 = vpop.eup %2671  ;;  %v2250_v40 = vsub.f32 1.5, %v2249_v43  ;;  %v2382_v58 = vsel %vm2381_vm3, %v2380_v12, %v2379_v14  ;;  %v2383_v50 = vrot.slane %v2364_v47, 4  ;;  %vm2384_vm0 = vcmask 1044484  }
 0xea0   :  { %v2203_v60 = vmul.f32 %v2666_v18, %v2202_v4  ;;  %v2211_v3 = vmul.f32 %v2672_v15, %v4128_v63  ;;  %v2262_v46 = vsub.f32 1.5, %v2261_v26  ;;  %v2182_v18 = vsel %vm2181_vm6, %v4046_v54, %v2180_v16 }
 0xea1   :  { %v2251_v11 = vmul.f32 %v2668_v5, %v2250_v40  ;;  %vm1861_vm13 = vcmp.eq.f32.partialorder %v3668_v38, inf  ;;  %v2346_v0 = vperm.slane %v2233_v20, %v2995_v33  ;;  %v2347_v5 = vperm.slane %v2245_v31, %v3834_v59 }
 0xea2   :  { %v2204_v6 = vmul.f32 %v2203_v60, %v4088_v25  ;;  %v2212_v23 = vmul.f32 %v2672_v15, %v2211_v3  ;;  %v2263_v41 = vmul.f32 %v2670_v7, %v2262_v46  ;;  %v2385_v56 = vsel %vm2384_vm0, %v2383_v50, %v2382_v58 }
 0xea3   :  { %v2252_v55 = vmul.f32 %v2251_v11, %v4090_v9  ;;  %vm2265_vm6 = vcmp.eq.f32.partialorder %v4100_v39, inf  ;;  %v2185_v42 = vsel %vm2183_vm2, %v2184_v35, %v2182_v18  ;;  %vm2267_vm8 = vcmp.eq.f32.partialorder %v4100_v39, 0.0 }
 0xea4   :  { %v2213_v61 = vmul.f32 0.5, %v2212_v23  ;;  %v2206_v29 = vsel %vm2205_vm12, %v4088_v25, %v2204_v6  ;;  %v2264_v34 = vmul.f32 %v2263_v41, %v4100_v39  ;;  %v2268_v8 = vand.u32 2147483648, %v4100_v39 }
 0xea5   :  { %v2254_v52 = vsel %vm2253_vm14, %v4090_v9, %v2252_v55  ;;  %v2209_v28 = vsel %vm2207_vm1, %v2208_v49, %v2206_v29  ;;  %v2197_v54 = vsel %vm2195_vm11, %v2196_v17, %v4000_v51  ;;  %v1860_v9 = vmul.f32 %v3783_v2, %v3668_v38 }
 0xea6   :  { %v2214_v30 = vsub.f32 1.5, %v2213_v61  ;;  %v2257_v24 = vsel %vm2255_vm10, %v2256_v13, %v2254_v52  ;;  %v2266_v7 = vsel %vm2265_vm6, %v4100_v39, %v2264_v34  ;;  %v2348_v37 = vsel %vm2301_vm15, %v2347_v5, %v2346_v0 }
 0xea7   :  { %v2349_v44 = vperm.slane %v2257_v24, %v3757_v36  ;;  %v2269_v35 = vsel %vm2267_vm8, %v2268_v8, %v2266_v7  ;;  %v2339_v19 = vperm.slane %v2185_v42, %v2995_v33  ;;  %vm2217_vm12 = vcmp.eq.f32.partialorder %v4128_v63, inf }
 0xea8   :  { %v2215_v1 = vmul.f32 %v2672_v15, %v2214_v30  ;;  %v2351_v62 = vperm.slane %v2269_v35, %v3884_v27  ;;  %v2220_v21 = vand.u32 2147483648, %v4128_v63  ;;  %vm1873_vm14 = vcmp.eq.f32.partialorder %v3685_v22, inf }
 0xea9   :  { %v2350_v25 = vsel %vm2305_vm4, %v2349_v44, %v2348_v37  ;;  %v2342_v32 = vperm.slane %v2209_v28, %v3757_v36  ;;  %vm2219_vm2 = vcmp.eq.f32.partialorder %v4128_v63, 0.0  ;;  %v1874_v17 = vsel %vm1873_vm14, %v3685_v22, %v3840_v57 }
 0xeaa   :  { %v2216_v39 = vmul.f32 %v2215_v1, %v4128_v63  ;;  %v2340_v33 = vperm.slane %v2197_v54, %v3834_v59  ;;  %v1862_v51 = vsel %vm1861_vm13, %v3668_v38, %v1860_v9  ;;  %v1876_v49 = vand.u32 2147483648, %v3685_v22 }
 0xeab   :  { %v2352_v10 = vsel %vm2309_vm5, %v2351_v62, %v2350_v25  ;;  %v1864_v36 = vand.u32 2147483648, %v3668_v38  ;;  %vm1875_vm10 = vcmp.eq.f32.partialorder %v3685_v22, 0.0  ;;  %vm1863_vm1 = vcmp.eq.f32.partialorder %v3668_v38, 0.0 }
 0xeac   :  { %v2218_v2 = vsel %vm2217_vm12, %v4128_v63, %v2216_v39  ;;  %v2341_v63 = vsel %vm2301_vm15, %v2340_v33, %v2339_v19  ;;  %v1877_v59 = vsel %vm1875_vm10, %v1876_v49, %v1874_v17  ;;  %vm2387_vm7 = vcmask 1045509  }
 0xead   :  { %v2221_v20 = vsel %vm2219_vm2, %v2220_v21, %v2218_v2  ;;  %v2343_v57 = vsel %vm2305_vm4, %v2342_v32, %v2341_v63  ;;  %v1865_v4 = vsel %vm1863_vm1, %v1864_v36, %v1862_v51  ;;  %v2366_v48 = vadd.f32 %v2352_v10, %v1877_v59 }
 0xeae   :  { %v2344_v45 = vperm.slane %v2221_v20, %v3884_v27  ;;  %vm2390_vm11 = vcmask 1046534   ;;  %vm2393_vm3 = vcmask 260096   ;;  %vm2405_vm15 = vcmask 0  }
 0xeaf   :  { %v2389_v47 = vrot.slane %v2366_v48, 2 }
 0xeb0   :  { %v2345_v43 = vsel %vm2309_vm5, %v2344_v45, %v2343_v57 }
 0xeb1   :  { %v2365_v15 = vadd.f32 %v2345_v43, %v1865_v4 }
 0xeb3   :  { %v2386_v16 = vrot.slane %v2365_v15, 3 }
 0xeb5   :  { %v2388_v22 = vsel %vm2387_vm7, %v2386_v16, %v2385_v56 }
 0xeb6   :  { %v2391_v53 = vsel %vm2390_vm11, %v2389_v47, %v2388_v22 }
 0xeb7   :  { %v2394_v60 = vsel %vm2393_vm3, %v2391_v53, 0.0 }
 0xeb8   :  { %2395 = vadd.xlane.f32.xlu2 %v2394_v60 }
 0xf2b   :  { %v2396_v27 = vpop.xlane.xlu2 %2395 }
 0xf2c   :  { %v2397_v38 = vsel %vm272_vm9, %v2396_v27, 0.0 }
 0xf2d   :  { %v2398_v40 = vrot.slane %v2397_v38, 4 }
 0xf2f   :  { %v2399_v26 = vadd.f32 %v2398_v40, %v2397_v38 }
 0xf31   :  { %v2400_v3 = vrot.slane %v2399_v26, 2 }
 0xf33   :  { %v2401_v31 = vadd.f32 %v2400_v3, %v2399_v26 }
 0xf35   :  { %v2402_v14 = vrot.slane %v2401_v31, 1 }
 0xf37   :  { %v2403_v12 = vadd.f32 %v2402_v14, %v2401_v31 }
 0xf39   :  { %v2404_v6 = vmul.f32 0.14285715, %v2403_v12 }
 0xf3b   :  { %2406 = vst.msk [vmem:[#allocation8] sm:$0x1] %vm2405_vm15, %v2404_v6 }
 0xf3c   :  { %2417 = dma.vmem_to_hbm [thread:$0]  %s2413_s30, 16, %s2415_s1, [#allocation4]  }
 0xf3d   :  { %2773 = dma.done.wait [#allocation4], 16  }
 0xf3e   :  { %2774 = vsyncadd [#allocation4], 4294967280 }
 0xf3f   :  { %2422 = vsyncpa [#allocation3], 1 }
 0xf40   :  { %2423 = vsyncpa [#allocation6], 1 }
 0xf41   :  { %2424 = vsyncpa [#allocation4], 1 }

</bundles_post_ra>
